<compile_context>
chip_gen: v5e
topology: v5e:2x2
jax: 0.10.0
libtpu: 0.0.40
codegen_flags: <defaults>
</compile_context>

<pallas_src>
import functools

import jax
import jax.numpy as jnp
from jax.experimental import pallas as pl
from jax.experimental.pallas import tpu as pltpu

LANE = 128

# forward-tap offsets, tap index t = dm*2 + dn
TAPS_CONV_S2 = ((1, 1), (1, 0), (0, 1), (0, 0))   # stride-2 conv on s2d input
TAPS_DECONV = ((0, 0), (0, 1), (1, 0), (1, 1))    # sub-pixel conv-transpose


def _round_up(x, m):
    return ((x + m - 1) // m) * m


# ----------------------------------------------------------------------------
# Pallas kernels
# ----------------------------------------------------------------------------
def _conv_tap_kernel(x_ref, w_ref, b_ref, o_ref, *, taps, ho, wo, cin,
                     activation):
    """4-tap fused conv GEMM: taps are sliced straight out of the VMEM block.

    x_ref: (1, Hp, Wp, cin) padded activation for one image
    w_ref: (len(taps)*cin, N) tap-major GEMM weight
    o_ref: (1, ho*wo, N)
    """
    n = o_ref.shape[-1]
    acc = jnp.zeros((ho * wo, n), jnp.float32)
    for t, (dy, dx) in enumerate(taps):
        patch = x_ref[0, dy:dy + ho, dx:dx + wo, :].reshape(ho * wo, cin)
        acc = acc + jnp.dot(patch, w_ref[t * cin:(t + 1) * cin, :],
                            preferred_element_type=jnp.float32)
    r = acc + b_ref[...]                                # f32 epilogue
    if activation == "relu":
        r = jnp.maximum(r, 0.0)
    elif activation == "sigmoid":
        r = jax.nn.sigmoid(r)
    o_ref[...] = r[None].astype(o_ref.dtype)


def conv_tap_gemm(x_pad, w, bias, ho, wo, taps, activation, out_dtype):
    """activation(4-tap conv GEMM); gridded over batch ("parallel")."""
    B, Hp, Wp, C = x_pad.shape
    N = w.shape[1]
    kernel = functools.partial(_conv_tap_kernel, taps=taps, ho=ho, wo=wo,
                               cin=C, activation=activation)
    return pl.pallas_call(
        kernel,
        out_shape=jax.ShapeDtypeStruct((B, ho * wo, N), out_dtype),
        grid=(B,),
        in_specs=[
            pl.BlockSpec((1, Hp, Wp, C), lambda i: (i, 0, 0, 0)),
            pl.BlockSpec((w.shape[0], N), lambda i: (0, 0)),
            pl.BlockSpec((1, N), lambda i: (0, 0)),
        ],
        out_specs=pl.BlockSpec((1, ho * wo, N), lambda i: (i, 0, 0)),
        compiler_params=pltpu.CompilerParams(
            dimension_semantics=("parallel",)),
    )(x_pad, w, bias)


def _latent_concept_kernel(h_ref, wl_ref, bl_ref, eps_ref, wd_ref, bd_ref,
                           w1_ref, b1_ref, w2_ref, b2_ref, w3_ref, b3_ref,
                           lat_ref, hdec_ref, con_ref, pred_ref, *, zpad):
    """fc_zy+fc_zd -> reparameterize -> decoder_input + concept MLPs + heads."""
    lat = (jnp.dot(h_ref[...], wl_ref[...],
                   preferred_element_type=jnp.float32) + bl_ref[...])
    lat_ref[...] = lat
    mu = lat[:, :zpad]                 # 128-lane aligned [mu | pad]
    logvar = lat[:, zpad:]             # 128-lane aligned [logvar | pad]
    # pad lanes stay exactly 0: mu=0, logvar=0 -> exp=1, eps(pad)=0.
    z = mu + eps_ref[...] * jnp.exp(0.5 * logvar)
    z_bf = z.astype(jnp.bfloat16)
    hdec_ref[...] = (jnp.dot(z_bf, wd_ref[...],
                             preferred_element_type=jnp.float32)
                     + bd_ref[...]).astype(hdec_ref.dtype)
    c1 = jnp.maximum(jnp.dot(z_bf, w1_ref[...],
                             preferred_element_type=jnp.float32)
                     + b1_ref[...], 0.0)
    con = (jnp.dot(c1.astype(jnp.bfloat16), w2_ref[...],
                   preferred_element_type=jnp.float32) + b2_ref[...])
    con_ref[...] = con
    pred_ref[...] = (jnp.dot(con.astype(jnp.bfloat16), w3_ref[...],
                             preferred_element_type=jnp.float32)
                     + b3_ref[...])


def latent_concept(h_flat, eps_pad, P, *, zpad):
    B = h_flat.shape[0]
    return pl.pallas_call(
        functools.partial(_latent_concept_kernel, zpad=zpad),
        out_shape=(
            jax.ShapeDtypeStruct((B, 2 * zpad), jnp.float32),           # [mu|lv]
            jax.ShapeDtypeStruct((B, P["decin_w"].shape[1]), jnp.bfloat16),
            jax.ShapeDtypeStruct((B, P["cp2_w"].shape[1]), jnp.float32),  # concepts
            jax.ShapeDtypeStruct((B, P["cls_w"].shape[1]), jnp.float32),  # logits
        ),
    )(h_flat, P["lat_w"], P["lat_b"], eps_pad, P["decin_w"], P["decin_b"],
      P["cp1_w"], P["cp1_b"], P["cp2_w"], P["cp2_b"], P["cls_w"], P["cls_b"])


# ----------------------------------------------------------------------------
# XLA glue (fused under jit): space-to-depth, pixel shuffle
# ----------------------------------------------------------------------------
def space_to_depth2(x):
    """(B,H,W,C) -> (B,H/2,W/2,4C), channel order (p, q, c)."""
    B, H, W, C = x.shape
    x = x.reshape(B, H // 2, 2, W // 2, 2, C)
    x = x.transpose(0, 1, 3, 2, 4, 5)
    return x.reshape(B, H // 2, W // 2, 4 * C)


def pixel_shuffle(y, B, H, W, cout):
    """(B, H*W, 4*cout) phase-major -> (B, 2H, 2W, cout)."""
    y = y.reshape(B, H, W, 2, 2, cout)
    y = y.transpose(0, 1, 3, 2, 4, 5)
    return y.reshape(B, 2 * H, 2 * W, cout)


# ----------------------------------------------------------------------------
# Parameters: PyTorch-layout init + one-time repacking (pad + bf16) for kernels
# ----------------------------------------------------------------------------
def init_params(key, meta):
    in_ch, img = meta["input_channels"], meta["img_size"]
    zy, zd, cd = meta["zy_dim"], meta["zd_dim"], meta["concept_dim"]
    n_cls, n_dom = meta["n_classes"], meta["n_domains"]
    flat = 64 * (img // 4) * (img // 4)
    keys = iter(jax.random.split(key, 32))

    def nrm(shape, scale=0.05):
        return scale * jax.random.normal(next(keys), shape, jnp.float32)

    p = {}
    p["inv_c1_w"], p["inv_c1_b"] = nrm((32, in_ch, 3, 3)), nrm((32,))
    p["inv_c2_w"], p["inv_c2_b"] = nrm((64, 32, 3, 3)), nrm((64,))
    p["var_c1_w"], p["var_c1_b"] = nrm((32, in_ch, 3, 3)), nrm((32,))
    p["var_c2_w"], p["var_c2_b"] = nrm((64, 32, 3, 3)), nrm((64,))
    p["fc_zy_w"], p["fc_zy_b"] = nrm((2 * zy, flat)), nrm((2 * zy,))
    p["fc_zd_w"], p["fc_zd_b"] = nrm((2 * zd, flat)), nrm((2 * zd,))
    p["cpy1_w"], p["cpy1_b"] = nrm((cd, zy)), nrm((cd,))
    p["cpy2_w"], p["cpy2_b"] = nrm((cd, cd)), nrm((cd,))
    p["cpd1_w"], p["cpd1_b"] = nrm((cd, zd)), nrm((cd,))
    p["cpd2_w"], p["cpd2_b"] = nrm((cd, cd)), nrm((cd,))
    p["digit_w"], p["digit_b"] = nrm((n_cls, cd)), nrm((n_cls,))
    p["domain_w"], p["domain_b"] = nrm((n_dom, cd)), nrm((n_dom,))
    p["dec_in_w"], p["dec_in_b"] = nrm((flat, zy + zd)), nrm((flat,))
    p["dec_t1_w"], p["dec_t1_b"] = nrm((64, 32, 3, 3)), nrm((32,))
    p["dec_t2_w"], p["dec_t2_b"] = nrm((32, in_ch, 3, 3)), nrm((in_ch,))
    return p


def conv_s2_tap_matrix(w, cin_total, cin_off, cout_total, cout_off):
    """Conv2d(k=3, s=2, p=1) weight (Cout,Cin,3,3) -> rows of the 4-tap GEMM
    matrix over a space-to-depth(2), top/left-padded input with cin_total
    channels. Row layout: (tap, phase, cin); cols: output channels."""
    Cout, Cin, _, _ = w.shape
    mat = jnp.zeros((4 * 4 * cin_total, cout_total), jnp.float32)
    for dm in range(2):
        for dn in range(2):
            t = dm * 2 + dn
            for p in range(2):
                for q in range(2):
                    kh, kw = p - 2 * dm + 1, q - 2 * dn + 1
                    if 0 <= kh < 3 and 0 <= kw < 3:
                        row0 = t * (4 * cin_total) + (p * 2 + q) * cin_total + cin_off
                        mat = mat.at[row0:row0 + Cin,
                                     cout_off:cout_off + Cout].set(w[:, :, kh, kw].T)
    return mat


def convt_phase_matrix(w):
    """ConvTranspose2d(s=2,p=1,op=1) weight (Cin,Cout,3,3) -> (4*Cin, 4*Cout)
    forward-tap (2x2, bottom/right zero pad) x output-phase GEMM matrix."""
    Cin, Cout = w.shape[0], w.shape[1]
    mat = jnp.zeros((4 * Cin, 4 * Cout), jnp.float32)
    for p in range(2):
        for q in range(2):
            for dm in range(2):
                for dn in range(2):
                    kh, kw = p - 2 * dm + 1, q - 2 * dn + 1
                    if 0 <= kh < 3 and 0 <= kw < 3:
                        tap, ph = dm * 2 + dn, p * 2 + q
                        mat = mat.at[tap * Cin:(tap + 1) * Cin,
                                     ph * Cout:(ph + 1) * Cout].set(w[:, :, kh, kw])
    return mat


def blockdiag(wa, wb, kpad=None):
    """Two PyTorch (out,in) Linears -> block-diagonal (in_a+in_b[->kpad], out_a+out_b)."""
    ia, oa = wa.shape[1], wa.shape[0]
    ib, ob = wb.shape[1], wb.shape[0]
    k = kpad if kpad is not None else ia + ib
    m = jnp.zeros((k, oa + ob), jnp.float32)
    m = m.at[:ia, :oa].set(wa.T)
    m = m.at[ia:ia + ib, oa:oa + ob].set(wb.T)
    return m


def prepare_params(raw, meta):
    in_ch = meta["input_channels"]
    zy, zd = meta["zy_dim"], meta["zd_dim"]
    Hq = meta["img_size"] // 4
    z_total = zy + zd
    zpad = _round_up(z_total, LANE)
    bf, f32 = jnp.bfloat16, jnp.float32
    p = {}

    # encoder conv1: both branches share the input -> concat along Cout (N=64)
    w1 = (conv_s2_tap_matrix(raw["inv_c1_w"], in_ch, 0, 64, 0)
          + conv_s2_tap_matrix(raw["var_c1_w"], in_ch, 0, 64, 32))
    p["enc1_w"] = w1.astype(bf)
    p["enc1_b"] = jnp.concatenate(
        [raw["inv_c1_b"], raw["var_c1_b"]]).reshape(1, -1).astype(f32)

    # encoder conv2: block-diagonal over [inv32|var32] -> [inv64|var64] (N=128)
    w2 = (conv_s2_tap_matrix(raw["inv_c2_w"], 64, 0, 128, 0)
          + conv_s2_tap_matrix(raw["var_c2_w"], 64, 32, 128, 64))
    p["enc2_w"] = w2.astype(bf)
    p["enc2_b"] = jnp.concatenate(
        [raw["inv_c2_b"], raw["var_c2_b"]]).reshape(1, -1).astype(f32)

    # fc_zy + fc_zd combined; rows follow the NHWC (h,w,[inv64|var64]) flatten
    # of h2; columns: [mu|pad](zpad) then [logvar|pad](zpad), lane-aligned.
    zy2, zd2 = 2 * zy, 2 * zd
    w_zy = raw["fc_zy_w"].reshape(zy2, 64, Hq, Hq).transpose(2, 3, 1, 0)
    w_zd = raw["fc_zd_w"].reshape(zd2, 64, Hq, Hq).transpose(2, 3, 1, 0)
    W = jnp.zeros((Hq, Hq, 128, 2 * zpad), f32)
    W = W.at[:, :, :64, 0:zy].set(w_zy[..., :zy])
    W = W.at[:, :, 64:, zy:z_total].set(w_zd[..., :zd])
    W = W.at[:, :, :64, zpad:zpad + zy].set(w_zy[..., zy:])
    W = W.at[:, :, 64:, zpad + zy:zpad + z_total].set(w_zd[..., zd:])
    p["lat_w"] = W.reshape(Hq * Hq * 128, 2 * zpad).astype(bf)
    lat_b = jnp.zeros((2 * zpad,), f32)
    lat_b = lat_b.at[0:zy].set(raw["fc_zy_b"][:zy])
    lat_b = lat_b.at[zy:z_total].set(raw["fc_zd_b"][:zd])
    lat_b = lat_b.at[zpad:zpad + zy].set(raw["fc_zy_b"][zy:])
    lat_b = lat_b.at[zpad + zy:zpad + z_total].set(raw["fc_zd_b"][zd:])
    p["lat_b"] = lat_b.reshape(1, -1)

    # decoder input Linear: K padded to zpad, outputs in NHWC-flat (h,w,c) order
    decin = (raw["dec_in_w"].reshape(64, Hq, Hq, z_total)
             .transpose(3, 1, 2, 0).reshape(z_total, Hq * Hq * 64))
    p["decin_w"] = jnp.pad(decin, ((0, zpad - z_total), (0, 0))).astype(bf)
    p["decin_b"] = (raw["dec_in_b"].reshape(64, Hq, Hq)
                    .transpose(1, 2, 0).reshape(1, -1)).astype(f32)

    # concept MLPs + classifier heads (block-diagonal y-branch | d-branch)
    p["cp1_w"] = blockdiag(raw["cpy1_w"], raw["cpd1_w"], kpad=zpad).astype(bf)
    p["cp1_b"] = jnp.concatenate(
        [raw["cpy1_b"], raw["cpd1_b"]]).reshape(1, -1).astype(f32)
    p["cp2_w"] = blockdiag(raw["cpy2_w"], raw["cpd2_w"]).astype(bf)
    p["cp2_b"] = jnp.concatenate(
        [raw["cpy2_b"], raw["cpd2_b"]]).reshape(1, -1).astype(f32)
    p["cls_w"] = blockdiag(raw["digit_w"], raw["domain_w"]).astype(bf)
    p["cls_b"] = jnp.concatenate(
        [raw["digit_b"], raw["domain_b"]]).reshape(1, -1).astype(f32)

    # transposed convs as 4-tap sub-pixel phase GEMMs
    p["dect1_w"] = convt_phase_matrix(raw["dec_t1_w"]).astype(bf)
    p["dect1_b"] = jnp.tile(raw["dec_t1_b"], 4).reshape(1, -1).astype(f32)
    p["dect2_w"] = convt_phase_matrix(raw["dec_t2_w"]).astype(bf)
    p["dect2_b"] = jnp.tile(raw["dec_t2_b"], 4).reshape(1, -1).astype(f32)
    return p


# ----------------------------------------------------------------------------
# Forward pass (jit-wrapped in main): 5 pallas_calls total
# ----------------------------------------------------------------------------
def concept_vae_forward(params, x, eps, *, meta):
    B = x.shape[0]
    zy, zd = meta["zy_dim"], meta["zd_dim"]
    cd, n_cls = meta["concept_dim"], meta["n_classes"]
    in_ch, img = meta["input_channels"], meta["img_size"]
    Hh, Hq = img // 2, img // 4
    z_total = zy + zd
    zpad = _round_up(z_total, LANE)

    x_nhwc = jnp.transpose(x, (0, 2, 3, 1)).astype(jnp.bfloat16)

    # fused encoders (both branches). TODO(synk): fold space-to-depth/pad into
    # the conv kernel via a halo index_map.
    x1 = jnp.pad(space_to_depth2(x_nhwc), ((0, 0), (1, 0), (1, 0), (0, 0)))
    h1 = conv_tap_gemm(x1, params["enc1_w"], params["enc1_b"],
                       Hh, Hh, TAPS_CONV_S2, "relu", jnp.bfloat16)
    h1 = h1.reshape(B, Hh, Hh, 64)

    x2 = jnp.pad(space_to_depth2(h1), ((0, 0), (1, 0), (1, 0), (0, 0)))
    h2 = conv_tap_gemm(x2, params["enc2_w"], params["enc2_b"],
                       Hq, Hq, TAPS_CONV_S2, "relu", jnp.bfloat16)
    h_flat = h2.reshape(B, Hq * Hq * 128)

    # latent params + reparameterization + decoder input + concept/classifier
    # heads, all in one kernel (z never leaves VMEM).
    eps_pad = jnp.pad(eps.astype(jnp.float32),
                      ((0, 0), (0, zpad - z_total)))
    lat, hdec, concepts, preds = latent_concept(h_flat, eps_pad, params,
                                                zpad=zpad)
    zy_mu = lat[:, :zy]
    zd_mu = lat[:, zy:z_total]
    zy_logvar = lat[:, zpad:zpad + zy]
    zd_logvar = lat[:, zpad + zy:zpad + z_total]
    inv_concepts, var_concepts = concepts[:, :cd], concepts[:, cd:]
    digit_pred, domain_pred = preds[:, :n_cls], preds[:, n_cls:]

    # decoder: two sub-pixel (phase-decomposed) transposed convs.
    # TODO(synk): scatter the 2x2 phases straight from the kernel epilogue
    # (phase-keyed out index_map) to remove the pixel_shuffle transposes.
    d0 = jnp.pad(hdec.reshape(B, Hq, Hq, 64),
                 ((0, 0), (0, 1), (0, 1), (0, 0)))
    d1p = conv_tap_gemm(d0, params["dect1_w"], params["dect1_b"],
                        Hq, Hq, TAPS_DECONV, "relu", jnp.bfloat16)
    d1 = pixel_shuffle(d1p, B, Hq, Hq, 32)

    d1pad = jnp.pad(d1, ((0, 0), (0, 1), (0, 1), (0, 0)))
    d2p = conv_tap_gemm(d1pad, params["dect2_w"], params["dect2_b"],
                        Hh, Hh, TAPS_DECONV, "sigmoid", jnp.float32)
    recon = pixel_shuffle(d2p, B, Hh, Hh, in_ch)
    recon = jnp.transpose(recon, (0, 3, 1, 2))           # back to NCHW

    return {
        "recon": recon,
        "zy_mu": zy_mu, "zy_logvar": zy_logvar,
        "zd_mu": zd_mu, "zd_logvar": zd_logvar,
        "invariant_concepts": inv_concepts, "variant_concepts": var_concepts,
        "digit_pred": digit_pred, "domain_pred": domain_pred,
    }


# ----------------------------------------------------------------------------
# Pure-JAX (f32, PyTorch-layout) reference for correctness checking
# ----------------------------------------------------------------------------
def reference_forward(raw, x, eps, meta):
    zy, zd = meta["zy_dim"], meta["zd_dim"]
    B = x.shape[0]
    dn = ("NCHW", "OIHW", "NCHW")
    relu = jax.nn.relu

    def conv(h, w, b):
        out = jax.lax.conv_general_dilated(h, w, (2, 2), ((1, 1), (1, 1)),
                                           dimension_numbers=dn)
        return out + b.reshape(1, -1, 1, 1)

    def convt(h, w, b):
        wf = jnp.flip(w, (2, 3)).transpose(1, 0, 2, 3)
        out = jax.lax.conv_general_dilated(h, wf, (1, 1), ((1, 2), (1, 2)),
                                           lhs_dilation=(2, 2),
                                           dimension_numbers=dn)
        return out + b.reshape(1, -1, 1, 1)

    h = relu(conv(relu(conv(x, raw["inv_c1_w"], raw["inv_c1_b"])),
                  raw["inv_c2_w"], raw["inv_c2_b"])).reshape(B, -1)
    g = relu(conv(relu(conv(x, raw["var_c1_w"], raw["var_c1_b"])),
                  raw["var_c2_w"], raw["var_c2_b"])).reshape(B, -1)
    zyp = h @ raw["fc_zy_w"].T + raw["fc_zy_b"]
    zdp = g @ raw["fc_zd_w"].T + raw["fc_zd_b"]
    zy_mu, zy_lv = zyp[:, :zy], zyp[:, zy:]
    zd_mu, zd_lv = zdp[:, :zd], zdp[:, zd:]
    zys = zy_mu + eps[:, :zy] * jnp.exp(0.5 * zy_lv)
    zds = zd_mu + eps[:, zy:] * jnp.exp(0.5 * zd_lv)
    inv_c = relu(zys @ raw["cpy1_w"].T + raw["cpy1_b"]) @ raw["cpy2_w"].T + raw["cpy2_b"]
    var_c = relu(zds @ raw["cpd1_w"].T + raw["cpd1_b"]) @ raw["cpd2_w"].T + raw["cpd2_b"]
    digit = inv_c @ raw["digit_w"].T + raw["digit_b"]
    domain = var_c @ raw["domain_w"].T + raw["domain_b"]
    z = jnp.concatenate([zys, zds], axis=1)
    hd = (z @ raw["dec_in_w"].T + raw["dec_in_b"]).reshape(
        B, 64, meta["img_size"] // 4, meta["img_size"] // 4)
    d1 = relu(convt(hd, raw["dec_t1_w"], raw["dec_t1_b"]))
    recon = jax.nn.sigmoid(convt(d1, raw["dec_t2_w"], raw["dec_t2_b"]))
    return {"recon": recon, "zy_mu": zy_mu, "zy_logvar": zy_lv,
            "zd_mu": zd_mu, "zd_logvar": zd_lv,
            "invariant_concepts": inv_c, "variant_concepts": var_c,
            "digit_pred": digit, "domain_pred": domain}


# ----------------------------------------------------------------------------
# Main
# ----------------------------------------------------------------------------
if __name__ == "__main__":
    batch, in_ch, img = 2, 3, 16
    zy_dim, zd_dim, concept_dim, n_classes, n_domains = 16, 16, 32, 10, 4
    meta = dict(input_channels=in_ch, img_size=img, zy_dim=zy_dim, zd_dim=zd_dim,
                concept_dim=concept_dim, n_classes=n_classes, n_domains=n_domains)

    root = jax.random.PRNGKey(0)
    k_params, k_x, k_eps = jax.random.split(root, 3)

    raw_params = init_params(k_params, meta)
    prepared = prepare_params(raw_params, meta)
    x = jax.random.normal(k_x, (batch, in_ch, img, img), jnp.float32)
    # torch.randn_like noise is supplied externally (eps = [eps_y | eps_d])
    eps = jax.random.normal(k_eps, (batch, zy_dim + zd_dim), jnp.float32)

    forward = jax.jit(functools.partial(concept_vae_forward, meta=meta))
    out = forward(prepared, x, eps)
    jax.block_until_ready(out)

    # shape checks
    assert out["recon"].shape == (batch, in_ch, img, img)
    assert out["zy_mu"].shape == (batch, zy_dim)
    assert out["zd_logvar"].shape == (batch, zd_dim)
    assert out["invariant_concepts"].shape == (batch, concept_dim)
    assert out["variant_concepts"].shape == (batch, concept_dim)
    assert out["digit_pred"].shape == (batch, n_classes)
    assert out["domain_pred"].shape == (batch, n_domains)

    # numerical check vs f32 pure-JAX reference (bf16 operands -> loose tol)
    ref = reference_forward(raw_params, x, eps, meta)
    for name in ref:
        err = float(jnp.max(jnp.abs(out[name] - ref[name])))
        assert err < 3e-2, f"{name}: max abs err {err}"

    print("KERNEL_OK")
</pallas_src>

<mosaic_0001>
module attributes {stable_mosaic.version = 11 : i64} {
  func.func @_conv_tap_kernel(%arg0: i32, %arg1: memref<1x9x9x12xbf16, #tpu.memory_space<vmem>>, %arg2: memref<48x64xbf16, #tpu.memory_space<vmem>>, %arg3: memref<1x64xf32, #tpu.memory_space<vmem>>, %arg4: memref<1x64x64xbf16, #tpu.memory_space<vmem>>) attributes {dimension_semantics = [#tpu.dimension_semantics<parallel>], iteration_bounds = array<i64: 2>, scalar_prefetch = 0 : i64, scratch_operands = 0 : i64, tpu.core_type = #tpu.core_type<tc>, window_params = [{transform_indices = @transform_0, window_bounds = array<i64: 1, 9, 9, 12>}, {pipeline_mode = #tpu.pipeline_mode<synchronous>, transform_indices = @transform_1, window_bounds = array<i64: 48, 64>}, {pipeline_mode = #tpu.pipeline_mode<synchronous>, transform_indices = @transform_2, window_bounds = array<i64: 1, 64>}, {transform_indices = @transform_3, window_bounds = array<i64: 1, 64, 64>}]} {
    %cst = arith.constant 0.000000e+00 : f32
    %0 = vector.broadcast %cst : f32 to vector<64x64xf32>
    %c0 = arith.constant 0 : index
    %c1 = arith.constant 1 : index
    %c1_0 = arith.constant 1 : index
    %c0_1 = arith.constant 0 : index
    %1 = vector.load %arg1[%c0, %c1, %c1_0, %c0_1] : memref<1x9x9x12xbf16, #tpu.memory_space<vmem>>, vector<1x8x8x12xbf16>
    %2 = vector.shape_cast %1 : vector<1x8x8x12xbf16> to vector<8x8x12xbf16>
    %3 = vector.shape_cast %2 : vector<8x8x12xbf16> to vector<64x12xbf16>
    %c0_2 = arith.constant 0 : index
    %c0_3 = arith.constant 0 : index
    %4 = vector.load %arg2[%c0_2, %c0_3] : memref<48x64xbf16, #tpu.memory_space<vmem>>, vector<12x64xbf16>
    %cst_4 = arith.constant dense<0.000000e+00> : vector<64x64xf32>
    %5 = tpu.matmul %3, %4, %cst_4 {dimension_numbers = #tpu.dot_dimension_numbers<[1], [0], [0], [1], [0, 0, 1, 1], [], []>} : vector<64x12xbf16>, vector<12x64xbf16>, vector<64x64xf32> -> vector<64x64xf32>
    %6 = arith.addf %0, %5 : vector<64x64xf32>
    %c0_5 = arith.constant 0 : index
    %c1_6 = arith.constant 1 : index
    %c0_7 = arith.constant 0 : index
    %c0_8 = arith.constant 0 : index
    %7 = vector.load %arg1[%c0_5, %c1_6, %c0_7, %c0_8] : memref<1x9x9x12xbf16, #tpu.memory_space<vmem>>, vector<1x8x8x12xbf16>
    %8 = vector.shape_cast %7 : vector<1x8x8x12xbf16> to vector<8x8x12xbf16>
    %9 = vector.shape_cast %8 : vector<8x8x12xbf16> to vector<64x12xbf16>
    %c12 = arith.constant 12 : index
    %c0_9 = arith.constant 0 : index
    %10 = vector.load %arg2[%c12, %c0_9] : memref<48x64xbf16, #tpu.memory_space<vmem>>, vector<12x64xbf16>
    %cst_10 = arith.constant dense<0.000000e+00> : vector<64x64xf32>
    %11 = tpu.matmul %9, %10, %cst_10 {dimension_numbers = #tpu.dot_dimension_numbers<[1], [0], [0], [1], [0, 0, 1, 1], [], []>} : vector<64x12xbf16>, vector<12x64xbf16>, vector<64x64xf32> -> vector<64x64xf32>
    %12 = arith.addf %6, %11 : vector<64x64xf32>
    %c0_11 = arith.constant 0 : index
    %c0_12 = arith.constant 0 : index
    %c1_13 = arith.constant 1 : index
    %c0_14 = arith.constant 0 : index
    %13 = vector.load %arg1[%c0_11, %c0_12, %c1_13, %c0_14] : memref<1x9x9x12xbf16, #tpu.memory_space<vmem>>, vector<1x8x8x12xbf16>
    %14 = vector.shape_cast %13 : vector<1x8x8x12xbf16> to vector<8x8x12xbf16>
    %15 = vector.shape_cast %14 : vector<8x8x12xbf16> to vector<64x12xbf16>
    %c24 = arith.constant 24 : index
    %c0_15 = arith.constant 0 : index
    %16 = vector.load %arg2[%c24, %c0_15] : memref<48x64xbf16, #tpu.memory_space<vmem>>, vector<12x64xbf16>
    %cst_16 = arith.constant dense<0.000000e+00> : vector<64x64xf32>
    %17 = tpu.matmul %15, %16, %cst_16 {dimension_numbers = #tpu.dot_dimension_numbers<[1], [0], [0], [1], [0, 0, 1, 1], [], []>} : vector<64x12xbf16>, vector<12x64xbf16>, vector<64x64xf32> -> vector<64x64xf32>
    %18 = arith.addf %12, %17 : vector<64x64xf32>
    %c0_17 = arith.constant 0 : index
    %c0_18 = arith.constant 0 : index
    %c0_19 = arith.constant 0 : index
    %c0_20 = arith.constant 0 : index
    %19 = vector.load %arg1[%c0_17, %c0_18, %c0_19, %c0_20] : memref<1x9x9x12xbf16, #tpu.memory_space<vmem>>, vector<1x8x8x12xbf16>
    %20 = vector.shape_cast %19 : vector<1x8x8x12xbf16> to vector<8x8x12xbf16>
    %21 = vector.shape_cast %20 : vector<8x8x12xbf16> to vector<64x12xbf16>
    %c36 = arith.constant 36 : index
    %c0_21 = arith.constant 0 : index
    %22 = vector.load %arg2[%c36, %c0_21] : memref<48x64xbf16, #tpu.memory_space<vmem>>, vector<12x64xbf16>
    %cst_22 = arith.constant dense<0.000000e+00> : vector<64x64xf32>
    %23 = tpu.matmul %21, %22, %cst_22 {dimension_numbers = #tpu.dot_dimension_numbers<[1], [0], [0], [1], [0, 0, 1, 1], [], []>} : vector<64x12xbf16>, vector<12x64xbf16>, vector<64x64xf32> -> vector<64x64xf32>
    %24 = arith.addf %18, %23 : vector<64x64xf32>
    %c0_23 = arith.constant 0 : index
    %c0_24 = arith.constant 0 : index
    %25 = vector.load %arg3[%c0_23, %c0_24] : memref<1x64xf32, #tpu.memory_space<vmem>>, vector<1x64xf32>
    %26 = vector.broadcast %25 : vector<1x64xf32> to vector<64x64xf32>
    %27 = arith.addf %24, %26 : vector<64x64xf32>
    %cst_25 = arith.constant 0.000000e+00 : f32
    %28 = vector.broadcast %cst_25 : f32 to vector<64x64xf32>
    %29 = arith.maximumf %27, %28 : vector<64x64xf32>
    %30 = vector.shape_cast %29 : vector<64x64xf32> to vector<1x64x64xf32>
    %31 = arith.truncf %30 : vector<1x64x64xf32> to vector<1x64x64xbf16>
    %c0_26 = arith.constant 0 : index
    %c0_27 = arith.constant 0 : index
    %c0_28 = arith.constant 0 : index
    %32 = vector.load %arg4[%c0_26, %c0_27, %c0_28] : memref<1x64x64xbf16, #tpu.memory_space<vmem>>, vector<1x64x64xbf16>
    tpu.vector_store %arg4[%c0_26, %c0_27, %c0_28], %31 {strides = array<i32>} : memref<1x64x64xbf16, #tpu.memory_space<vmem>>, vector<1x64x64xbf16>,
    return
  }
  func.func @transform_0(%arg0: i32) -> (i32, i32, i32, i32) {
    %c0_i32 = arith.constant 0 : i32
    %c0_i32_0 = arith.constant 0 : i32
    %c0_i32_1 = arith.constant 0 : i32
    %c0_i32_2 = arith.constant 0 : i32
    return %arg0, %c0_i32, %c0_i32_0, %c0_i32_1 : i32, i32, i32, i32
  }
  func.func @transform_1(%arg0: i32) -> (i32, i32) {
    %c0_i32 = arith.constant 0 : i32
    %c0_i32_0 = arith.constant 0 : i32
    %c0_i32_1 = arith.constant 0 : i32
    return %c0_i32, %c0_i32_0 : i32, i32
  }
  func.func @transform_2(%arg0: i32) -> (i32, i32) {
    %c0_i32 = arith.constant 0 : i32
    %c0_i32_0 = arith.constant 0 : i32
    %c0_i32_1 = arith.constant 0 : i32
    return %c0_i32, %c0_i32_0 : i32, i32
  }
  func.func @transform_3(%arg0: i32) -> (i32, i32, i32) {
    %c0_i32 = arith.constant 0 : i32
    %c0_i32_0 = arith.constant 0 : i32
    %c0_i32_1 = arith.constant 0 : i32
    return %arg0, %c0_i32, %c0_i32_0 : i32, i32, i32
  }
}

module attributes {stable_mosaic.version = 11 : i64} {
  func.func @_conv_tap_kernel(%arg0: i32, %arg1: memref<1x5x5x256xbf16, #tpu.memory_space<vmem>>, %arg2: memref<1024x128xbf16, #tpu.memory_space<vmem>>, %arg3: memref<1x128xf32, #tpu.memory_space<vmem>>, %arg4: memref<1x16x128xbf16, #tpu.memory_space<vmem>>) attributes {dimension_semantics = [#tpu.dimension_semantics<parallel>], iteration_bounds = array<i64: 2>, scalar_prefetch = 0 : i64, scratch_operands = 0 : i64, tpu.core_type = #tpu.core_type<tc>, window_params = [{transform_indices = @transform_0, window_bounds = array<i64: 1, 5, 5, 256>}, {pipeline_mode = #tpu.pipeline_mode<synchronous>, transform_indices = @transform_1, window_bounds = array<i64: 1024, 128>}, {pipeline_mode = #tpu.pipeline_mode<synchronous>, transform_indices = @transform_2, window_bounds = array<i64: 1, 128>}, {transform_indices = @transform_3, window_bounds = array<i64: 1, 16, 128>}]} {
    %cst = arith.constant 0.000000e+00 : f32
    %0 = vector.broadcast %cst : f32 to vector<16x128xf32>
    %c0 = arith.constant 0 : index
    %c1 = arith.constant 1 : index
    %c1_0 = arith.constant 1 : index
    %c0_1 = arith.constant 0 : index
    %1 = vector.load %arg1[%c0, %c1, %c1_0, %c0_1] : memref<1x5x5x256xbf16, #tpu.memory_space<vmem>>, vector<1x4x4x256xbf16>
    %2 = vector.shape_cast %1 : vector<1x4x4x256xbf16> to vector<4x4x256xbf16>
    %3 = vector.shape_cast %2 : vector<4x4x256xbf16> to vector<16x256xbf16>
    %c0_2 = arith.constant 0 : index
    %c0_3 = arith.constant 0 : index
    %4 = vector.load %arg2[%c0_2, %c0_3] : memref<1024x128xbf16, #tpu.memory_space<vmem>>, vector<256x128xbf16>
    %cst_4 = arith.constant dense<0.000000e+00> : vector<16x128xf32>
    %5 = tpu.matmul %3, %4, %cst_4 {dimension_numbers = #tpu.dot_dimension_numbers<[1], [0], [0], [1], [0, 0, 1, 1], [], []>} : vector<16x256xbf16>, vector<256x128xbf16>, vector<16x128xf32> -> vector<16x128xf32>
    %6 = arith.addf %0, %5 : vector<16x128xf32>
    %c0_5 = arith.constant 0 : index
    %c1_6 = arith.constant 1 : index
    %c0_7 = arith.constant 0 : index
    %c0_8 = arith.constant 0 : index
    %7 = vector.load %arg1[%c0_5, %c1_6, %c0_7, %c0_8] : memref<1x5x5x256xbf16, #tpu.memory_space<vmem>>, vector<1x4x4x256xbf16>
    %8 = vector.shape_cast %7 : vector<1x4x4x256xbf16> to vector<4x4x256xbf16>
    %9 = vector.shape_cast %8 : vector<4x4x256xbf16> to vector<16x256xbf16>
    %c256 = arith.constant 256 : index
    %c0_9 = arith.constant 0 : index
    %10 = vector.load %arg2[%c256, %c0_9] : memref<1024x128xbf16, #tpu.memory_space<vmem>>, vector<256x128xbf16>
    %cst_10 = arith.constant dense<0.000000e+00> : vector<16x128xf32>
    %11 = tpu.matmul %9, %10, %cst_10 {dimension_numbers = #tpu.dot_dimension_numbers<[1], [0], [0], [1], [0, 0, 1, 1], [], []>} : vector<16x256xbf16>, vector<256x128xbf16>, vector<16x128xf32> -> vector<16x128xf32>
    %12 = arith.addf %6, %11 : vector<16x128xf32>
    %c0_11 = arith.constant 0 : index
    %c0_12 = arith.constant 0 : index
    %c1_13 = arith.constant 1 : index
    %c0_14 = arith.constant 0 : index
    %13 = vector.load %arg1[%c0_11, %c0_12, %c1_13, %c0_14] : memref<1x5x5x256xbf16, #tpu.memory_space<vmem>>, vector<1x4x4x256xbf16>
    %14 = vector.shape_cast %13 : vector<1x4x4x256xbf16> to vector<4x4x256xbf16>
    %15 = vector.shape_cast %14 : vector<4x4x256xbf16> to vector<16x256xbf16>
    %c512 = arith.constant 512 : index
    %c0_15 = arith.constant 0 : index
    %16 = vector.load %arg2[%c512, %c0_15] : memref<1024x128xbf16, #tpu.memory_space<vmem>>, vector<256x128xbf16>
    %cst_16 = arith.constant dense<0.000000e+00> : vector<16x128xf32>
    %17 = tpu.matmul %15, %16, %cst_16 {dimension_numbers = #tpu.dot_dimension_numbers<[1], [0], [0], [1], [0, 0, 1, 1], [], []>} : vector<16x256xbf16>, vector<256x128xbf16>, vector<16x128xf32> -> vector<16x128xf32>
    %18 = arith.addf %12, %17 : vector<16x128xf32>
    %c0_17 = arith.constant 0 : index
    %c0_18 = arith.constant 0 : index
    %c0_19 = arith.constant 0 : index
    %c0_20 = arith.constant 0 : index
    %19 = vector.load %arg1[%c0_17, %c0_18, %c0_19, %c0_20] : memref<1x5x5x256xbf16, #tpu.memory_space<vmem>>, vector<1x4x4x256xbf16>
    %20 = vector.shape_cast %19 : vector<1x4x4x256xbf16> to vector<4x4x256xbf16>
    %21 = vector.shape_cast %20 : vector<4x4x256xbf16> to vector<16x256xbf16>
    %c768 = arith.constant 768 : index
    %c0_21 = arith.constant 0 : index
    %22 = vector.load %arg2[%c768, %c0_21] : memref<1024x128xbf16, #tpu.memory_space<vmem>>, vector<256x128xbf16>
    %cst_22 = arith.constant dense<0.000000e+00> : vector<16x128xf32>
    %23 = tpu.matmul %21, %22, %cst_22 {dimension_numbers = #tpu.dot_dimension_numbers<[1], [0], [0], [1], [0, 0, 1, 1], [], []>} : vector<16x256xbf16>, vector<256x128xbf16>, vector<16x128xf32> -> vector<16x128xf32>
    %24 = arith.addf %18, %23 : vector<16x128xf32>
    %c0_23 = arith.constant 0 : index
    %c0_24 = arith.constant 0 : index
    %25 = vector.load %arg3[%c0_23, %c0_24] : memref<1x128xf32, #tpu.memory_space<vmem>>, vector<1x128xf32>
    %26 = vector.broadcast %25 : vector<1x128xf32> to vector<16x128xf32>
    %27 = arith.addf %24, %26 : vector<16x128xf32>
    %cst_25 = arith.constant 0.000000e+00 : f32
    %28 = vector.broadcast %cst_25 : f32 to vector<16x128xf32>
    %29 = arith.maximumf %27, %28 : vector<16x128xf32>
    %30 = vector.shape_cast %29 : vector<16x128xf32> to vector<1x16x128xf32>
    %31 = arith.truncf %30 : vector<1x16x128xf32> to vector<1x16x128xbf16>
    %c0_26 = arith.constant 0 : index
    %c0_27 = arith.constant 0 : index
    %c0_28 = arith.constant 0 : index
    %32 = vector.load %arg4[%c0_26, %c0_27, %c0_28] : memref<1x16x128xbf16, #tpu.memory_space<vmem>>, vector<1x16x128xbf16>
    tpu.vector_store %arg4[%c0_26, %c0_27, %c0_28], %31 {strides = array<i32>} : memref<1x16x128xbf16, #tpu.memory_space<vmem>>, vector<1x16x128xbf16>,
    return
  }
  func.func @transform_0(%arg0: i32) -> (i32, i32, i32, i32) {
    %c0_i32 = arith.constant 0 : i32
    %c0_i32_0 = arith.constant 0 : i32
    %c0_i32_1 = arith.constant 0 : i32
    %c0_i32_2 = arith.constant 0 : i32
    return %arg0, %c0_i32, %c0_i32_0, %c0_i32_1 : i32, i32, i32, i32
  }
  func.func @transform_1(%arg0: i32) -> (i32, i32) {
    %c0_i32 = arith.constant 0 : i32
    %c0_i32_0 = arith.constant 0 : i32
    %c0_i32_1 = arith.constant 0 : i32
    return %c0_i32, %c0_i32_0 : i32, i32
  }
  func.func @transform_2(%arg0: i32) -> (i32, i32) {
    %c0_i32 = arith.constant 0 : i32
    %c0_i32_0 = arith.constant 0 : i32
    %c0_i32_1 = arith.constant 0 : i32
    return %c0_i32, %c0_i32_0 : i32, i32
  }
  func.func @transform_3(%arg0: i32) -> (i32, i32, i32) {
    %c0_i32 = arith.constant 0 : i32
    %c0_i32_0 = arith.constant 0 : i32
    %c0_i32_1 = arith.constant 0 : i32
    return %arg0, %c0_i32, %c0_i32_0 : i32, i32, i32
  }
}

module attributes {stable_mosaic.version = 11 : i64} {
  func.func @_latent_concept_kernel(%arg0: memref<2x2048xbf16, #tpu.memory_space<vmem>>, %arg1: memref<2048x256xbf16, #tpu.memory_space<vmem>>, %arg2: memref<1x256xf32, #tpu.memory_space<vmem>>, %arg3: memref<2x128xf32, #tpu.memory_space<vmem>>, %arg4: memref<128x1024xbf16, #tpu.memory_space<vmem>>, %arg5: memref<1x1024xf32, #tpu.memory_space<vmem>>, %arg6: memref<128x64xbf16, #tpu.memory_space<vmem>>, %arg7: memref<1x64xf32, #tpu.memory_space<vmem>>, %arg8: memref<64x64xbf16, #tpu.memory_space<vmem>>, %arg9: memref<1x64xf32, #tpu.memory_space<vmem>>, %arg10: memref<64x14xbf16, #tpu.memory_space<vmem>>, %arg11: memref<1x14xf32, #tpu.memory_space<vmem>>, %arg12: memref<2x256xf32, #tpu.memory_space<vmem>>, %arg13: memref<2x1024xbf16, #tpu.memory_space<vmem>>, %arg14: memref<2x64xf32, #tpu.memory_space<vmem>>, %arg15: memref<2x14xf32, #tpu.memory_space<vmem>>) attributes {dimension_semantics = [], scalar_prefetch = 0 : i64, scratch_operands = 0 : i64, tpu.core_type = #tpu.core_type<tc>} {
    %c0 = arith.constant 0 : index
    %c0_0 = arith.constant 0 : index
    %0 = vector.load %arg0[%c0, %c0_0] : memref<2x2048xbf16, #tpu.memory_space<vmem>>, vector<2x2048xbf16>
    %c0_1 = arith.constant 0 : index
    %c0_2 = arith.constant 0 : index
    %1 = vector.load %arg1[%c0_1, %c0_2] : memref<2048x256xbf16, #tpu.memory_space<vmem>>, vector<2048x256xbf16>
    %cst = arith.constant dense<0.000000e+00> : vector<2x256xf32>
    %2 = tpu.matmul %0, %1, %cst {dimension_numbers = #tpu.dot_dimension_numbers<[1], [0], [0], [1], [0, 0, 1, 1], [], []>} : vector<2x2048xbf16>, vector<2048x256xbf16>, vector<2x256xf32> -> vector<2x256xf32>
    %c0_3 = arith.constant 0 : index
    %c0_4 = arith.constant 0 : index
    %3 = vector.load %arg2[%c0_3, %c0_4] : memref<1x256xf32, #tpu.memory_space<vmem>>, vector<1x256xf32>
    %4 = vector.broadcast %3 : vector<1x256xf32> to vector<2x256xf32>
    %5 = arith.addf %2, %4 : vector<2x256xf32>
    %c0_5 = arith.constant 0 : index
    %c0_6 = arith.constant 0 : index
    %6 = vector.load %arg12[%c0_5, %c0_6] : memref<2x256xf32, #tpu.memory_space<vmem>>, vector<2x256xf32>
    tpu.vector_store %arg12[%c0_5, %c0_6], %5 {strides = array<i32>} : memref<2x256xf32, #tpu.memory_space<vmem>>, vector<2x256xf32>,
    %7 = vector.extract_strided_slice %5 {offsets = [0, 0], sizes = [2, 128], strides = [1, 1]} : vector<2x256xf32> to vector<2x128xf32>
    %8 = vector.extract_strided_slice %5 {offsets = [0, 128], sizes = [2, 128], strides = [1, 1]} : vector<2x256xf32> to vector<2x128xf32>
    %c0_7 = arith.constant 0 : index
    %c0_8 = arith.constant 0 : index
    %9 = vector.load %arg3[%c0_7, %c0_8] : memref<2x128xf32, #tpu.memory_space<vmem>>, vector<2x128xf32>
    %cst_9 = arith.constant 5.000000e-01 : f32
    %10 = vector.broadcast %cst_9 : f32 to vector<2x128xf32>
    %11 = arith.mulf %10, %8 : vector<2x128xf32>
    %12 = math.exp %11 : vector<2x128xf32>
    %13 = arith.mulf %9, %12 : vector<2x128xf32>
    %14 = arith.addf %7, %13 : vector<2x128xf32>
    %15 = arith.truncf %14 : vector<2x128xf32> to vector<2x128xbf16>
    %c0_10 = arith.constant 0 : index
    %c0_11 = arith.constant 0 : index
    %16 = vector.load %arg4[%c0_10, %c0_11] : memref<128x1024xbf16, #tpu.memory_space<vmem>>, vector<128x1024xbf16>
    %cst_12 = arith.constant dense<0.000000e+00> : vector<2x1024xf32>
    %17 = tpu.matmul %15, %16, %cst_12 {dimension_numbers = #tpu.dot_dimension_numbers<[1], [0], [0], [1], [0, 0, 1, 1], [], []>} : vector<2x128xbf16>, vector<128x1024xbf16>, vector<2x1024xf32> -> vector<2x1024xf32>
    %c0_13 = arith.constant 0 : index
    %c0_14 = arith.constant 0 : index
    %18 = vector.load %arg5[%c0_13, %c0_14] : memref<1x1024xf32, #tpu.memory_space<vmem>>, vector<1x1024xf32>
    %19 = vector.broadcast %18 : vector<1x1024xf32> to vector<2x1024xf32>
    %20 = arith.addf %17, %19 : vector<2x1024xf32>
    %21 = arith.truncf %20 : vector<2x1024xf32> to vector<2x1024xbf16>
    %c0_15 = arith.constant 0 : index
    %c0_16 = arith.constant 0 : index
    %22 = vector.load %arg13[%c0_15, %c0_16] : memref<2x1024xbf16, #tpu.memory_space<vmem>>, vector<2x1024xbf16>
    tpu.vector_store %arg13[%c0_15, %c0_16], %21 {strides = array<i32>} : memref<2x1024xbf16, #tpu.memory_space<vmem>>, vector<2x1024xbf16>,
    %c0_17 = arith.constant 0 : index
    %c0_18 = arith.constant 0 : index
    %23 = vector.load %arg6[%c0_17, %c0_18] : memref<128x64xbf16, #tpu.memory_space<vmem>>, vector<128x64xbf16>
    %cst_19 = arith.constant dense<0.000000e+00> : vector<2x64xf32>
    %24 = tpu.matmul %15, %23, %cst_19 {dimension_numbers = #tpu.dot_dimension_numbers<[1], [0], [0], [1], [0, 0, 1, 1], [], []>} : vector<2x128xbf16>, vector<128x64xbf16>, vector<2x64xf32> -> vector<2x64xf32>
    %c0_20 = arith.constant 0 : index
    %c0_21 = arith.constant 0 : index
    %25 = vector.load %arg7[%c0_20, %c0_21] : memref<1x64xf32, #tpu.memory_space<vmem>>, vector<1x64xf32>
    %26 = vector.broadcast %25 : vector<1x64xf32> to vector<2x64xf32>
    %27 = arith.addf %24, %26 : vector<2x64xf32>
    %cst_22 = arith.constant 0.000000e+00 : f32
    %28 = vector.broadcast %cst_22 : f32 to vector<2x64xf32>
    %29 = arith.maximumf %27, %28 : vector<2x64xf32>
    %30 = arith.truncf %29 : vector<2x64xf32> to vector<2x64xbf16>
    %c0_23 = arith.constant 0 : index
    %c0_24 = arith.constant 0 : index
    %31 = vector.load %arg8[%c0_23, %c0_24] : memref<64x64xbf16, #tpu.memory_space<vmem>>, vector<64x64xbf16>
    %cst_25 = arith.constant dense<0.000000e+00> : vector<2x64xf32>
    %32 = tpu.matmul %30, %31, %cst_25 {dimension_numbers = #tpu.dot_dimension_numbers<[1], [0], [0], [1], [0, 0, 1, 1], [], []>} : vector<2x64xbf16>, vector<64x64xbf16>, vector<2x64xf32> -> vector<2x64xf32>
    %c0_26 = arith.constant 0 : index
    %c0_27 = arith.constant 0 : index
    %33 = vector.load %arg9[%c0_26, %c0_27] : memref<1x64xf32, #tpu.memory_space<vmem>>, vector<1x64xf32>
    %34 = vector.broadcast %33 : vector<1x64xf32> to vector<2x64xf32>
    %35 = arith.addf %32, %34 : vector<2x64xf32>
    %c0_28 = arith.constant 0 : index
    %c0_29 = arith.constant 0 : index
    %36 = vector.load %arg14[%c0_28, %c0_29] : memref<2x64xf32, #tpu.memory_space<vmem>>, vector<2x64xf32>
    tpu.vector_store %arg14[%c0_28, %c0_29], %35 {strides = array<i32>} : memref<2x64xf32, #tpu.memory_space<vmem>>, vector<2x64xf32>,
    %37 = arith.truncf %35 : vector<2x64xf32> to vector<2x64xbf16>
    %c0_30 = arith.constant 0 : index
    %c0_31 = arith.constant 0 : index
    %38 = vector.load %arg10[%c0_30, %c0_31] : memref<64x14xbf16, #tpu.memory_space<vmem>>, vector<64x14xbf16>
    %cst_32 = arith.constant dense<0.000000e+00> : vector<2x14xf32>
    %39 = tpu.matmul %37, %38, %cst_32 {dimension_numbers = #tpu.dot_dimension_numbers<[1], [0], [0], [1], [0, 0, 1, 1], [], []>} : vector<2x64xbf16>, vector<64x14xbf16>, vector<2x14xf32> -> vector<2x14xf32>
    %c0_33 = arith.constant 0 : index
    %c0_34 = arith.constant 0 : index
    %40 = vector.load %arg11[%c0_33, %c0_34] : memref<1x14xf32, #tpu.memory_space<vmem>>, vector<1x14xf32>
    %41 = vector.broadcast %40 : vector<1x14xf32> to vector<2x14xf32>
    %42 = arith.addf %39, %41 : vector<2x14xf32>
    %c0_35 = arith.constant 0 : index
    %c0_36 = arith.constant 0 : index
    %43 = vector.load %arg15[%c0_35, %c0_36] : memref<2x14xf32, #tpu.memory_space<vmem>>, vector<2x14xf32>
    tpu.vector_store %arg15[%c0_35, %c0_36], %42 {strides = array<i32>} : memref<2x14xf32, #tpu.memory_space<vmem>>, vector<2x14xf32>,
    return
  }
}

module attributes {stable_mosaic.version = 11 : i64} {
  func.func @_conv_tap_kernel(%arg0: i32, %arg1: memref<1x5x5x64xbf16, #tpu.memory_space<vmem>>, %arg2: memref<256x128xbf16, #tpu.memory_space<vmem>>, %arg3: memref<1x128xf32, #tpu.memory_space<vmem>>, %arg4: memref<1x16x128xbf16, #tpu.memory_space<vmem>>) attributes {dimension_semantics = [#tpu.dimension_semantics<parallel>], iteration_bounds = array<i64: 2>, scalar_prefetch = 0 : i64, scratch_operands = 0 : i64, tpu.core_type = #tpu.core_type<tc>, window_params = [{transform_indices = @transform_0, window_bounds = array<i64: 1, 5, 5, 64>}, {pipeline_mode = #tpu.pipeline_mode<synchronous>, transform_indices = @transform_1, window_bounds = array<i64: 256, 128>}, {pipeline_mode = #tpu.pipeline_mode<synchronous>, transform_indices = @transform_2, window_bounds = array<i64: 1, 128>}, {transform_indices = @transform_3, window_bounds = array<i64: 1, 16, 128>}]} {
    %cst = arith.constant 0.000000e+00 : f32
    %0 = vector.broadcast %cst : f32 to vector<16x128xf32>
    %c0 = arith.constant 0 : index
    %c0_0 = arith.constant 0 : index
    %c0_1 = arith.constant 0 : index
    %c0_2 = arith.constant 0 : index
    %1 = vector.load %arg1[%c0, %c0_0, %c0_1, %c0_2] : memref<1x5x5x64xbf16, #tpu.memory_space<vmem>>, vector<1x4x4x64xbf16>
    %2 = vector.shape_cast %1 : vector<1x4x4x64xbf16> to vector<4x4x64xbf16>
    %3 = vector.shape_cast %2 : vector<4x4x64xbf16> to vector<16x64xbf16>
    %c0_3 = arith.constant 0 : index
    %c0_4 = arith.constant 0 : index
    %4 = vector.load %arg2[%c0_3, %c0_4] : memref<256x128xbf16, #tpu.memory_space<vmem>>, vector<64x128xbf16>
    %cst_5 = arith.constant dense<0.000000e+00> : vector<16x128xf32>
    %5 = tpu.matmul %3, %4, %cst_5 {dimension_numbers = #tpu.dot_dimension_numbers<[1], [0], [0], [1], [0, 0, 1, 1], [], []>} : vector<16x64xbf16>, vector<64x128xbf16>, vector<16x128xf32> -> vector<16x128xf32>
    %6 = arith.addf %0, %5 : vector<16x128xf32>
    %c0_6 = arith.constant 0 : index
    %c0_7 = arith.constant 0 : index
    %c1 = arith.constant 1 : index
    %c0_8 = arith.constant 0 : index
    %7 = vector.load %arg1[%c0_6, %c0_7, %c1, %c0_8] : memref<1x5x5x64xbf16, #tpu.memory_space<vmem>>, vector<1x4x4x64xbf16>
    %8 = vector.shape_cast %7 : vector<1x4x4x64xbf16> to vector<4x4x64xbf16>
    %9 = vector.shape_cast %8 : vector<4x4x64xbf16> to vector<16x64xbf16>
    %c64 = arith.constant 64 : index
    %c0_9 = arith.constant 0 : index
    %10 = vector.load %arg2[%c64, %c0_9] : memref<256x128xbf16, #tpu.memory_space<vmem>>, vector<64x128xbf16>
    %cst_10 = arith.constant dense<0.000000e+00> : vector<16x128xf32>
    %11 = tpu.matmul %9, %10, %cst_10 {dimension_numbers = #tpu.dot_dimension_numbers<[1], [0], [0], [1], [0, 0, 1, 1], [], []>} : vector<16x64xbf16>, vector<64x128xbf16>, vector<16x128xf32> -> vector<16x128xf32>
    %12 = arith.addf %6, %11 : vector<16x128xf32>
    %c0_11 = arith.constant 0 : index
    %c1_12 = arith.constant 1 : index
    %c0_13 = arith.constant 0 : index
    %c0_14 = arith.constant 0 : index
    %13 = vector.load %arg1[%c0_11, %c1_12, %c0_13, %c0_14] : memref<1x5x5x64xbf16, #tpu.memory_space<vmem>>, vector<1x4x4x64xbf16>
    %14 = vector.shape_cast %13 : vector<1x4x4x64xbf16> to vector<4x4x64xbf16>
    %15 = vector.shape_cast %14 : vector<4x4x64xbf16> to vector<16x64xbf16>
    %c128 = arith.constant 128 : index
    %c0_15 = arith.constant 0 : index
    %16 = vector.load %arg2[%c128, %c0_15] : memref<256x128xbf16, #tpu.memory_space<vmem>>, vector<64x128xbf16>
    %cst_16 = arith.constant dense<0.000000e+00> : vector<16x128xf32>
    %17 = tpu.matmul %15, %16, %cst_16 {dimension_numbers = #tpu.dot_dimension_numbers<[1], [0], [0], [1], [0, 0, 1, 1], [], []>} : vector<16x64xbf16>, vector<64x128xbf16>, vector<16x128xf32> -> vector<16x128xf32>
    %18 = arith.addf %12, %17 : vector<16x128xf32>
    %c0_17 = arith.constant 0 : index
    %c1_18 = arith.constant 1 : index
    %c1_19 = arith.constant 1 : index
    %c0_20 = arith.constant 0 : index
    %19 = vector.load %arg1[%c0_17, %c1_18, %c1_19, %c0_20] : memref<1x5x5x64xbf16, #tpu.memory_space<vmem>>, vector<1x4x4x64xbf16>
    %20 = vector.shape_cast %19 : vector<1x4x4x64xbf16> to vector<4x4x64xbf16>
    %21 = vector.shape_cast %20 : vector<4x4x64xbf16> to vector<16x64xbf16>
    %c192 = arith.constant 192 : index
    %c0_21 = arith.constant 0 : index
    %22 = vector.load %arg2[%c192, %c0_21] : memref<256x128xbf16, #tpu.memory_space<vmem>>, vector<64x128xbf16>
    %cst_22 = arith.constant dense<0.000000e+00> : vector<16x128xf32>
    %23 = tpu.matmul %21, %22, %cst_22 {dimension_numbers = #tpu.dot_dimension_numbers<[1], [0], [0], [1], [0, 0, 1, 1], [], []>} : vector<16x64xbf16>, vector<64x128xbf16>, vector<16x128xf32> -> vector<16x128xf32>
    %24 = arith.addf %18, %23 : vector<16x128xf32>
    %c0_23 = arith.constant 0 : index
    %c0_24 = arith.constant 0 : index
    %25 = vector.load %arg3[%c0_23, %c0_24] : memref<1x128xf32, #tpu.memory_space<vmem>>, vector<1x128xf32>
    %26 = vector.broadcast %25 : vector<1x128xf32> to vector<16x128xf32>
    %27 = arith.addf %24, %26 : vector<16x128xf32>
    %cst_25 = arith.constant 0.000000e+00 : f32
    %28 = vector.broadcast %cst_25 : f32 to vector<16x128xf32>
    %29 = arith.maximumf %27, %28 : vector<16x128xf32>
    %30 = vector.shape_cast %29 : vector<16x128xf32> to vector<1x16x128xf32>
    %31 = arith.truncf %30 : vector<1x16x128xf32> to vector<1x16x128xbf16>
    %c0_26 = arith.constant 0 : index
    %c0_27 = arith.constant 0 : index
    %c0_28 = arith.constant 0 : index
    %32 = vector.load %arg4[%c0_26, %c0_27, %c0_28] : memref<1x16x128xbf16, #tpu.memory_space<vmem>>, vector<1x16x128xbf16>
    tpu.vector_store %arg4[%c0_26, %c0_27, %c0_28], %31 {strides = array<i32>} : memref<1x16x128xbf16, #tpu.memory_space<vmem>>, vector<1x16x128xbf16>,
    return
  }
  func.func @transform_0(%arg0: i32) -> (i32, i32, i32, i32) {
    %c0_i32 = arith.constant 0 : i32
    %c0_i32_0 = arith.constant 0 : i32
    %c0_i32_1 = arith.constant 0 : i32
    %c0_i32_2 = arith.constant 0 : i32
    return %arg0, %c0_i32, %c0_i32_0, %c0_i32_1 : i32, i32, i32, i32
  }
  func.func @transform_1(%arg0: i32) -> (i32, i32) {
    %c0_i32 = arith.constant 0 : i32
    %c0_i32_0 = arith.constant 0 : i32
    %c0_i32_1 = arith.constant 0 : i32
    return %c0_i32, %c0_i32_0 : i32, i32
  }
  func.func @transform_2(%arg0: i32) -> (i32, i32) {
    %c0_i32 = arith.constant 0 : i32
    %c0_i32_0 = arith.constant 0 : i32
    %c0_i32_1 = arith.constant 0 : i32
    return %c0_i32, %c0_i32_0 : i32, i32
  }
  func.func @transform_3(%arg0: i32) -> (i32, i32, i32) {
    %c0_i32 = arith.constant 0 : i32
    %c0_i32_0 = arith.constant 0 : i32
    %c0_i32_1 = arith.constant 0 : i32
    return %arg0, %c0_i32, %c0_i32_0 : i32, i32, i32
  }
}

module attributes {stable_mosaic.version = 11 : i64} {
  func.func @_conv_tap_kernel(%arg0: i32, %arg1: memref<1x9x9x32xbf16, #tpu.memory_space<vmem>>, %arg2: memref<128x12xbf16, #tpu.memory_space<vmem>>, %arg3: memref<1x12xf32, #tpu.memory_space<vmem>>, %arg4: memref<1x64x12xf32, #tpu.memory_space<vmem>>) attributes {dimension_semantics = [#tpu.dimension_semantics<parallel>], iteration_bounds = array<i64: 2>, scalar_prefetch = 0 : i64, scratch_operands = 0 : i64, tpu.core_type = #tpu.core_type<tc>, window_params = [{transform_indices = @transform_0, window_bounds = array<i64: 1, 9, 9, 32>}, {pipeline_mode = #tpu.pipeline_mode<synchronous>, transform_indices = @transform_1, window_bounds = array<i64: 128, 12>}, {pipeline_mode = #tpu.pipeline_mode<synchronous>, transform_indices = @transform_2, window_bounds = array<i64: 1, 12>}, {transform_indices = @transform_3, window_bounds = array<i64: 1, 64, 12>}]} {
    %cst = arith.constant 0.000000e+00 : f32
    %0 = vector.broadcast %cst : f32 to vector<64x12xf32>
    %c0 = arith.constant 0 : index
    %c0_0 = arith.constant 0 : index
    %c0_1 = arith.constant 0 : index
    %c0_2 = arith.constant 0 : index
    %1 = vector.load %arg1[%c0, %c0_0, %c0_1, %c0_2] : memref<1x9x9x32xbf16, #tpu.memory_space<vmem>>, vector<1x8x8x32xbf16>
    %2 = vector.shape_cast %1 : vector<1x8x8x32xbf16> to vector<8x8x32xbf16>
    %3 = vector.shape_cast %2 : vector<8x8x32xbf16> to vector<64x32xbf16>
    %c0_3 = arith.constant 0 : index
    %c0_4 = arith.constant 0 : index
    %4 = vector.load %arg2[%c0_3, %c0_4] : memref<128x12xbf16, #tpu.memory_space<vmem>>, vector<32x12xbf16>
    %cst_5 = arith.constant dense<0.000000e+00> : vector<64x12xf32>
    %5 = tpu.matmul %3, %4, %cst_5 {dimension_numbers = #tpu.dot_dimension_numbers<[1], [0], [0], [1], [0, 0, 1, 1], [], []>} : vector<64x32xbf16>, vector<32x12xbf16>, vector<64x12xf32> -> vector<64x12xf32>
    %6 = arith.addf %0, %5 : vector<64x12xf32>
    %c0_6 = arith.constant 0 : index
    %c0_7 = arith.constant 0 : index
    %c1 = arith.constant 1 : index
    %c0_8 = arith.constant 0 : index
    %7 = vector.load %arg1[%c0_6, %c0_7, %c1, %c0_8] : memref<1x9x9x32xbf16, #tpu.memory_space<vmem>>, vector<1x8x8x32xbf16>
    %8 = vector.shape_cast %7 : vector<1x8x8x32xbf16> to vector<8x8x32xbf16>
    %9 = vector.shape_cast %8 : vector<8x8x32xbf16> to vector<64x32xbf16>
    %c32 = arith.constant 32 : index
    %c0_9 = arith.constant 0 : index
    %10 = vector.load %arg2[%c32, %c0_9] : memref<128x12xbf16, #tpu.memory_space<vmem>>, vector<32x12xbf16>
    %cst_10 = arith.constant dense<0.000000e+00> : vector<64x12xf32>
    %11 = tpu.matmul %9, %10, %cst_10 {dimension_numbers = #tpu.dot_dimension_numbers<[1], [0], [0], [1], [0, 0, 1, 1], [], []>} : vector<64x32xbf16>, vector<32x12xbf16>, vector<64x12xf32> -> vector<64x12xf32>
    %12 = arith.addf %6, %11 : vector<64x12xf32>
    %c0_11 = arith.constant 0 : index
    %c1_12 = arith.constant 1 : index
    %c0_13 = arith.constant 0 : index
    %c0_14 = arith.constant 0 : index
    %13 = vector.load %arg1[%c0_11, %c1_12, %c0_13, %c0_14] : memref<1x9x9x32xbf16, #tpu.memory_space<vmem>>, vector<1x8x8x32xbf16>
    %14 = vector.shape_cast %13 : vector<1x8x8x32xbf16> to vector<8x8x32xbf16>
    %15 = vector.shape_cast %14 : vector<8x8x32xbf16> to vector<64x32xbf16>
    %c64 = arith.constant 64 : index
    %c0_15 = arith.constant 0 : index
    %16 = vector.load %arg2[%c64, %c0_15] : memref<128x12xbf16, #tpu.memory_space<vmem>>, vector<32x12xbf16>
    %cst_16 = arith.constant dense<0.000000e+00> : vector<64x12xf32>
    %17 = tpu.matmul %15, %16, %cst_16 {dimension_numbers = #tpu.dot_dimension_numbers<[1], [0], [0], [1], [0, 0, 1, 1], [], []>} : vector<64x32xbf16>, vector<32x12xbf16>, vector<64x12xf32> -> vector<64x12xf32>
    %18 = arith.addf %12, %17 : vector<64x12xf32>
    %c0_17 = arith.constant 0 : index
    %c1_18 = arith.constant 1 : index
    %c1_19 = arith.constant 1 : index
    %c0_20 = arith.constant 0 : index
    %19 = vector.load %arg1[%c0_17, %c1_18, %c1_19, %c0_20] : memref<1x9x9x32xbf16, #tpu.memory_space<vmem>>, vector<1x8x8x32xbf16>
    %20 = vector.shape_cast %19 : vector<1x8x8x32xbf16> to vector<8x8x32xbf16>
    %21 = vector.shape_cast %20 : vector<8x8x32xbf16> to vector<64x32xbf16>
    %c96 = arith.constant 96 : index
    %c0_21 = arith.constant 0 : index
    %22 = vector.load %arg2[%c96, %c0_21] : memref<128x12xbf16, #tpu.memory_space<vmem>>, vector<32x12xbf16>
    %cst_22 = arith.constant dense<0.000000e+00> : vector<64x12xf32>
    %23 = tpu.matmul %21, %22, %cst_22 {dimension_numbers = #tpu.dot_dimension_numbers<[1], [0], [0], [1], [0, 0, 1, 1], [], []>} : vector<64x32xbf16>, vector<32x12xbf16>, vector<64x12xf32> -> vector<64x12xf32>
    %24 = arith.addf %18, %23 : vector<64x12xf32>
    %c0_23 = arith.constant 0 : index
    %c0_24 = arith.constant 0 : index
    %25 = vector.load %arg3[%c0_23, %c0_24] : memref<1x12xf32, #tpu.memory_space<vmem>>, vector<1x12xf32>
    %26 = vector.broadcast %25 : vector<1x12xf32> to vector<64x12xf32>
    %27 = arith.addf %24, %26 : vector<64x12xf32>
    %28 = arith.negf %27 : vector<64x12xf32>
    %29 = math.exp %28 : vector<64x12xf32>
    %cst_25 = arith.constant 1.000000e+00 : f32
    %30 = vector.broadcast %cst_25 : f32 to vector<64x12xf32>
    %31 = arith.addf %30, %29 : vector<64x12xf32>
    %32 = arith.divf %30, %31 : vector<64x12xf32>
    %33 = vector.shape_cast %32 : vector<64x12xf32> to vector<1x64x12xf32>
    %c0_26 = arith.constant 0 : index
    %c0_27 = arith.constant 0 : index
    %c0_28 = arith.constant 0 : index
    %34 = vector.load %arg4[%c0_26, %c0_27, %c0_28] : memref<1x64x12xf32, #tpu.memory_space<vmem>>, vector<1x64x12xf32>
    tpu.vector_store %arg4[%c0_26, %c0_27, %c0_28], %33 {strides = array<i32>} : memref<1x64x12xf32, #tpu.memory_space<vmem>>, vector<1x64x12xf32>,
    return
  }
  func.func @transform_0(%arg0: i32) -> (i32, i32, i32, i32) {
    %c0_i32 = arith.constant 0 : i32
    %c0_i32_0 = arith.constant 0 : i32
    %c0_i32_1 = arith.constant 0 : i32
    %c0_i32_2 = arith.constant 0 : i32
    return %arg0, %c0_i32, %c0_i32_0, %c0_i32_1 : i32, i32, i32, i32
  }
  func.func @transform_1(%arg0: i32) -> (i32, i32) {
    %c0_i32 = arith.constant 0 : i32
    %c0_i32_0 = arith.constant 0 : i32
    %c0_i32_1 = arith.constant 0 : i32
    return %c0_i32, %c0_i32_0 : i32, i32
  }
  func.func @transform_2(%arg0: i32) -> (i32, i32) {
    %c0_i32 = arith.constant 0 : i32
    %c0_i32_0 = arith.constant 0 : i32
    %c0_i32_1 = arith.constant 0 : i32
    return %c0_i32, %c0_i32_0 : i32, i32
  }
  func.func @transform_3(%arg0: i32) -> (i32, i32, i32) {
    %c0_i32 = arith.constant 0 : i32
    %c0_i32_0 = arith.constant 0 : i32
    %c0_i32_1 = arith.constant 0 : i32
    return %arg0, %c0_i32, %c0_i32_0 : i32, i32, i32
  }
}

</mosaic_0001>

<bundles_post_ra>
// kernel: concept_vae_forward.5
= control target key start
LH: loop header
LB: loop body
LE: loop exit
PB: predicated region body
PF: predicated region fallthrough
CT: control target
= control target key end

     0   :  { %s961_s12 = smov 0   ;;  %s1148_s0 = inlined_call_operand.vmem [shape: bf16[2,9,9,12], index: 0, kind: input, shape index: {}]   ;;  %s1149_s1 = inlined_call_operand.vmem [shape: bf16[48,64], index: 1, kind: input, shape index: {}]   ;;  %s1150_s2 = inlined_call_operand.vmem [shape: f32[1,64], index: 2, kind: input, shape index: {}]   ;;  %s1151_s3 = inlined_call_operand.vmem [shape: bf16[2,64,64], index: 3, kind: output, shape index: {}]  }
   0x1 LB: > { %s820_s13 = sadd.s32 4294967295, %s939_s12   ;;  %p824_p0 = scmp.ge.s32.totalorder %s939_s12, 1  ;;  %s939_s12 = sphi %s961_s12, %s13_s12  }
   0x2   : > { %p137_p1 = scmp.lt.s32.totalorder %s939_s12, 3 }
   0x4   : > { %p138_p2 = pnand %p824_p0, %p137_p1 }
   0x5   : > { %p161_p3 = scmp.lt.s32.totalorder (!%p138_p2), %s820_s13, 1 }
   0x6   : > { %141 = sbr.rel (%p138_p2) target bundleno = 236 (0xec), region = 32 }
   0xb   : > { %v902_v0 = vld [vmem:[%s1149_s1 + $0x10] sm:$0xc]  ;;  %v922_v1 = vld [vmem:[%s1149_s1 + $0x10] sm:$0xf0]  ;;  %v862_v3 = vld [vmem:[%s1149_s1 + $0x4] sm:$0xc] }
   0xc   : > { %v903_v2 = vor.u32 %v922_v1, %v902_v0  ;;  %v916_v4 = vld [vmem:[%s1149_s1 + $0x4] sm:$0xf0]  ;;  %vm347_vm0 = vcmask 1045504   ;;  %s1155_s13 = smov (!%p161_p3, %s820_s13), 1  ;;  %v870_v6 = vld [vmem:[%s1149_s1] sm:$0xf] }
   0xd   : > { %v863_v5 = vor.u32 %v916_v4, %v862_v3  ;;  %v915_v7 = vld [vmem:[%s1149_s1] sm:$0x30]  ;;  %v878_v10 = vld [vmem:[%s1149_s1 + $0xc] sm:$0xf]  ;;  %v917_v11 = vld [vmem:[%s1149_s1 + $0xc] sm:$0x30] }
   0xe   : > { %v675_v8 = vrot.slane %v903_v2, 2  ;;  %v871_v9 = vor.u32 %v915_v7, %v870_v6  ;;  %s923_s30 = smul.u32 72, %s1155_s13  ;;  %v879_v13 = vor.u32 %v917_v11, %v878_v10  ;;  %vm334_vm1 = vcmask 97280   ;;  %v1113_v49 = vld [vmem:[%s1150_s2] ss:$0 sm:$0xff]  ;;  %s910_s9 = sshll.u32 %s1155_s13, 5 }
   0xf   : > { %v333_v12 = vrot.slane %v863_v5, 2  ;;  %vm189_vm2 = vsmask.f32 3328  ;;  %vm190_vm3 = vsmask.f32 7440  ;;  %s1120_s14 = scalar_lea.vmem %s1151_s3, %s910_s9  ;;  %vm756_vm5 = vcmask 519168  }
  0x10   : > { %v689_v14 = vsel %vm347_vm0, %v675_v8, 0  ;;  %v410_v15 = vsel %vm347_vm0, %v871_v9, 0  ;;  %s1002_s6 = scalar_lea.vmem %s1148_s0, %s923_s30  ;;  %v601_v17 = vsel %vm347_vm0, %v879_v13, 0  ;;  %vm1024_vm4 = vmor %vm189_vm2, %vm190_vm3 }
  0x11   : > { %698 = vmatpush.bf16.msra.mxu3 %v689_v14  ;;  %v349_v16 = vsel %vm347_vm0, %v333_v12, 0  ;;  %419 = vmatpush.bf16.msra.mxu1 %v410_v15  ;;  %v886_v18 = vld [vmem:[%s1002_s6] sm:$0xf]  ;;  %v918_v19 = vld [vmem:[%s1002_s6 + $0x4] sm:$0xf0] }
  0x12   : > { %358 = vmatpush.bf16.msra.mxu0 %v349_v16  ;;  %v846_v20 = vld [vmem:[%s1002_s6 + $0x8] sm:$0xf]  ;;  %610 = vmatpush.bf16.msra.mxu2 %v601_v17  ;;  %v887_v21 = vor.u32 %v918_v19, %v886_v18  ;;  %v911_v22 = vld [vmem:[%s1002_s6 + $0xc] sm:$0xf0]  ;;  %v829_v24 = vld [vmem:[%s1002_s6 + $0xc] sm:$0x1] }
  0x13   : > { %v828_v23 = vld [vmem:[%s1002_s6 + $0x8] sm:$0xf]  ;;  %v847_v25 = vor.u32 %v911_v22, %v846_v20  ;;  %v830_v26 = vld [vmem:[%s1002_s6 + $0x10] sm:$0xf]  ;;  %v831_v27 = vld [vmem:[%s1002_s6 + $0x14] sm:$0x1] }
  0x14   : > { %v193_v28 = vshrl.u32 %v828_v23, 16  ;;  %v196_v29 = vshll.u32 %v828_v23, 16  ;;  %904 = vmatmul.msk.bf16.vlgmr.msra.gmra.mxu3 %vm334_vm1, %v887_v21  ;;  %v202_v30 = vshll.u32 %v829_v24, 16  ;;  %v207_v31 = vshrl.u32 %v830_v26, 16  ;;  %v441_v34 = vld [vmem:[%s1002_s6] sm:$0xf] }
  0x15   : > { %v210_v32 = vshll.u32 %v830_v26, 16  ;;  %v216_v33 = vshll.u32 %v831_v27, 16  ;;  %864 = vmatmul.msk.bf16.vlgmr.msra.gmra.mxu0 %vm334_vm1, %v847_v25  ;;  %v442_v37 = vld [vmem:[%s1002_s6 + $0x4] sm:$0x1]  ;;  %v443_v38 = vld [vmem:[%s1002_s6 + $0x8] sm:$0xf] }
  0x16   : > { %v195_v35 = vrot.slane %v193_v28, 4  ;;  %v198_v36 = vrot.slane %v196_v29, 5  ;;  %v204_v39 = vrot.slane %v202_v30, 5  ;;  %v209_v40 = vrot.slane %v207_v31, 4  ;;  %v444_v43 = vld [vmem:[%s1002_s6 + $0xc] sm:$0x1] }
  0x17   : > { %v212_v41 = vrot.slane %v210_v32, 5  ;;  %v218_v42 = vrot.slane %v216_v33, 5  ;;  %v458_v45 = vshrl.u32 %v441_v34, 16  ;;  %v461_v46 = vshll.u32 %v441_v34, 16  ;;  %v1020_v48 = vld [vmem:[%s1002_s6 + $0x10] sm:$0xf] }
  0x18   : > { %v199_v44 = vor.u32 %v198_v36, %v195_v35  ;;  %v467_v47 = vshll.u32 %v442_v37, 16  ;;  %v472_v51 = vshrl.u32 %v443_v38, 16  ;;  %v475_v52 = vshll.u32 %v443_v38, 16  ;;  %v919_v54 = vld [vmem:[%s1002_s6 + $0x14] sm:$0xf0] }
  0x19   : > { %v213_v50 = vor.u32 %v212_v41, %v209_v40  ;;  %v481_v53 = vshll.u32 %v444_v43, 16  ;;  %v460_v56 = vrot.slane %v458_v45, 4  ;;  %v463_v57 = vrot.slane %v461_v46, 5  ;;  %v850_v59 = vld [vmem:[%s1002_s6 + $0x18] sm:$0xf] }
  0x1a   : > { %v200_v55 = vrot.slane %v199_v44, 4  ;;  %v469_v58 = vrot.slane %v467_v47, 5  ;;  %v474_v61 = vrot.slane %v472_v51, 4  ;;  %v477_v62 = vrot.slane %v475_v52, 5  ;;  %v912_v0 = vld [vmem:[%s1002_s6 + $0x1c] sm:$0xf0] }
  0x1b   : > { %v214_v60 = vrot.slane %v213_v50, 4  ;;  %v483_v63 = vrot.slane %v481_v53, 5  ;;  %v464_v2 = vor.u32 %v463_v57, %v460_v56  ;;  %v891_v3 = vor.u32 %v919_v54, %v1020_v48  ;;  %v832_v5 = vld [vmem:[%s1002_s6 + $0x18] sm:$0xf]  ;;  %v833_v6 = vld [vmem:[%s1002_s6 + $0x1c] sm:$0x1] }
  0x1c   : > { %v205_v1 = vsel %vm1024_vm4, %v200_v55, %v204_v39  ;;  %v851_v4 = vor.u32 %v912_v0, %v850_v59  ;;  %v834_v7 = vld [vmem:[%s1002_s6 + $0x20] sm:$0xf]  ;;  %v478_v10 = vor.u32 %v477_v62, %v474_v61  ;;  %v221_v11 = vshrl.u32 %v832_v5, 16  ;;  %v835_v14 = vld [vmem:[%s1002_s6 + $0x24] sm:$0x1] }
  0x1d   : > { %v219_v8 = vsel %vm1024_vm4, %v214_v60, %v218_v42  ;;  %v380_v9 = vunpack.c.l.b16 %v205_v1  ;;  %v465_v13 = vrot.slane %v464_v2, 4  ;;  %v224_v15 = vshll.u32 %v832_v5, 16  ;;  %v445_v21 = vld [vmem:[%s1002_s6 + $0x10] sm:$0xf]  ;;  %v446_v26 = vld [vmem:[%s1002_s6 + $0x14] sm:$0x1] }
  0x1e   : > { %v381_v12 = vunpack.c.l.b16 %v219_v8  ;;  %v230_v16 = vshll.u32 %v833_v6, 16  ;;  %v479_v17 = vrot.slane %v478_v10, 4  ;;  %v223_v18 = vrot.slane %v221_v11, 4  ;;  %v447_v27 = vld [vmem:[%s1002_s6 + $0x18] sm:$0xf] }
  0x1f   : > { %v235_v19 = vshrl.u32 %v834_v7, 16  ;;  %v238_v20 = vshll.u32 %v834_v7, 16  ;;  %v470_v23 = vsel %vm1024_vm4, %v465_v13, %v469_v58  ;;  %v226_v24 = vrot.slane %v224_v15, 5  ;;  %v448_v37 = vld [vmem:[%s1002_s6 + $0x1c] sm:$0x1] }
  0x20   : > { %v388_v22 = vpack.c.b16 %v381_v12, %v380_v9  ;;  %v232_v25 = vrot.slane %v230_v16, 5  ;;  %v484_v28 = vsel %vm1024_vm4, %v479_v17, %v483_v63  ;;  %v571_v29 = vunpack.c.l.b16 %v470_v23  ;;  %v836_v47 = vld [vmem:[%s1002_s6 + $0x28] sm:$0xf]  ;;  %v838_v53 = vld [vmem:[%s1002_s6 + $0x30] sm:$0xf] }
  0x21   : > { %v237_v30 = vrot.slane %v235_v19, 4  ;;  %v240_v31 = vrot.slane %v238_v20, 5  ;;  %v572_v32 = vunpack.c.l.b16 %v484_v28  ;;  %v227_v33 = vor.u32 %v226_v24, %v223_v18  ;;  %v894_v57 = vld [vmem:[%s1002_s6 + $0x20] sm:$0xf]  ;;  %v920_v61 = vld [vmem:[%s1002_s6 + $0x24] sm:$0xf0] }
  0x22   : > { %872 = vmatmul.msk.bf16.vlgmr.msra.gmra.mxu1 %vm334_vm1, %v388_v22  ;;  %v244_v34 = vshll.u32 %v835_v14, 16  ;;  %v486_v35 = vshrl.u32 %v445_v21, 16  ;;  %v489_v38 = vshll.u32 %v445_v21, 16  ;;  %v495_v39 = vshll.u32 %v446_v26, 16  ;;  %v837_v62 = vld [vmem:[%s1002_s6 + $0x2c] sm:$0x1] }
  0x23   : > { %v241_v36 = vor.u32 %v240_v31, %v237_v30  ;;  %v500_v40 = vshrl.u32 %v447_v27, 16  ;;  %v579_v41 = vpack.c.b16 %v572_v32, %v571_v29  ;;  %v228_v42 = vrot.slane %v227_v33, 4  ;;  %v839_v1 = vld [vmem:[%s1002_s6 + $0x34] sm:$0x1]  ;;  %v449_v8 = vld [vmem:[%s1002_s6 + $0x20] sm:$0xf] }
  0x24   : > { %v246_v43 = vrot.slane %v244_v34, 5  ;;  %v488_v44 = vrot.slane %v486_v35, 4  ;;  %905 = vmatmul.msk.bf16.gmra.mxu3 %vm334_vm1, %v891_v3  ;;  %v491_v46 = vrot.slane %v489_v38, 5  ;;  %v503_v51 = vshll.u32 %v447_v27, 16  ;;  %v451_v13 = vld [vmem:[%s1002_s6 + $0x28] sm:$0xf] }
  0x25   : > { %v242_v45 = vrot.slane %v241_v36, 4  ;;  %880 = vmatmul.msk.bf16.vlgmr.msra.gmra.mxu2 %vm334_vm1, %v579_v41  ;;  %865 = vmatmul.msk.bf16.gmra.mxu0 %vm334_vm1, %v851_v4  ;;  %v233_v48 = vsel %vm1024_vm4, %v228_v42, %v232_v25  ;;  %v502_v50 = vrot.slane %v500_v40, 4  ;;  %v509_v52 = vshll.u32 %v448_v37, 16  ;;  %v450_v20 = vld [vmem:[%s1002_s6 + $0x24] sm:$0x1] }
  0x26   : > { %v492_v55 = vor.u32 %v491_v46, %v488_v44  ;;  %v497_v56 = vrot.slane %v495_v39, 5  ;;  %v382_v58 = vunpack.c.l.b16 %v233_v48  ;;  %v505_v60 = vrot.slane %v503_v51, 5  ;;  %v854_v25 = vld [vmem:[%s1002_s6 + $0x28] sm:$0xf]  ;;  %v452_v27 = vld [vmem:[%s1002_s6 + $0x2c] sm:$0x1] }
  0x27   : > { %v247_v54 = vsel %vm1024_vm4, %v242_v45, %v246_v43  ;;  %v249_v63 = vshrl.u32 %v836_v47, 16  ;;  %v252_v2 = vshll.u32 %v836_v47, 16  ;;  %v263_v3 = vshrl.u32 %v838_v53, 16  ;;  %v913_v30 = vld [vmem:[%s1002_s6 + $0x2c] sm:$0xf0] }
  0x28   : > { %v383_v59 = vunpack.c.l.b16 %v247_v54  ;;  %v493_v0 = vrot.slane %v492_v55, 4  ;;  %v506_v4 = vor.u32 %v505_v60, %v502_v50  ;;  %v511_v5 = vrot.slane %v509_v52, 5  ;;  %v840_v45 = vld [vmem:[%s1002_s6 + $0x38] sm:$0xf]  ;;  %v842_v46 = vld [vmem:[%s1002_s6 + $0x40] sm:$0xf] }
  0x29   : > { %v251_v6 = vrot.slane %v249_v63, 4  ;;  %v266_v7 = vshll.u32 %v838_v53, 16  ;;  %v254_v10 = vrot.slane %v252_v2, 5  ;;  %v258_v11 = vshll.u32 %v837_v62, 16  ;;  %v455_v60 = vld [vmem:[%s1002_s6 + $0x38] sm:$0xf] }
  0x2a   : > { %v498_v9 = vsel %vm1024_vm4, %v493_v0, %v497_v56  ;;  %v265_v12 = vrot.slane %v263_v3, 4  ;;  %v389_v14 = vpack.c.b16 %v383_v59, %v382_v58  ;;  %v507_v15 = vrot.slane %v506_v4, 4  ;;  %v453_v59 = vld [vmem:[%s1002_s6 + $0x30] sm:$0xf]  ;;  %v841_v2 = vld [vmem:[%s1002_s6 + $0x3c] sm:$0x1] }
  0x2b   : > { %v895_v16 = vor.u32 %v920_v61, %v894_v57  ;;  %v268_v17 = vrot.slane %v266_v7, 5  ;;  %v255_v18 = vor.u32 %v254_v10, %v251_v6  ;;  %v272_v19 = vshll.u32 %v839_v1, 16  ;;  %v843_v6 = vld [vmem:[%s1002_s6 + $0x44] sm:$0x1] }
  0x2c   : > { %v514_v21 = vshrl.u32 %v449_v8, 16  ;;  %v517_v22 = vshll.u32 %v449_v8, 16  ;;  %v512_v23 = vsel %vm1024_vm4, %v507_v15, %v511_v5  ;;  %v573_v24 = vunpack.c.l.b16 %v498_v9 }
  0x2d   : > { %v269_v26 = vor.u32 %v268_v17, %v265_v12  ;;  %v528_v28 = vshrl.u32 %v451_v13, 16  ;;  %v574_v29 = vunpack.c.l.b16 %v512_v23  ;;  %v260_v31 = vrot.slane %v258_v11, 5  ;;  %v858_v17 = vld [vmem:[%s1002_s6 + $0x38] sm:$0xf] }
  0x2e   : > { %v516_v32 = vrot.slane %v514_v21, 4  ;;  %v519_v33 = vrot.slane %v517_v22, 5  ;;  %v256_v34 = vrot.slane %v255_v18, 4  ;;  %v523_v35 = vshll.u32 %v450_v20, 16  ;;  %v914_v18 = vld [vmem:[%s1002_s6 + $0x3c] sm:$0xf0] }
  0x2f   : > { %v530_v36 = vrot.slane %v528_v28, 4  ;;  %v531_v37 = vshll.u32 %v451_v13, 16  ;;  %v270_v38 = vrot.slane %v269_v26, 4  ;;  %v274_v39 = vrot.slane %v272_v19, 5  ;;  %v898_v13 = vld [vmem:[%s1002_s6 + $0x30] sm:$0xf] }
  0x30   : > { %v520_v40 = vor.u32 %v519_v33, %v516_v32  ;;  %v537_v41 = vshll.u32 %v452_v27, 16  ;;  %v580_v42 = vpack.c.b16 %v574_v29, %v573_v24  ;;  %v855_v43 = vor.u32 %v913_v30, %v854_v25  ;;  %v454_v22 = vld [vmem:[%s1002_s6 + $0x34] sm:$0x1]  ;;  %v456_v27 = vld [vmem:[%s1002_s6 + $0x3c] sm:$0x1] }
  0x31   : > { %v533_v44 = vrot.slane %v531_v37, 5  ;;  %v261_v47 = vsel %vm1024_vm4, %v256_v34, %v260_v31  ;;  %v525_v48 = vrot.slane %v523_v35, 5  ;;  %v275_v51 = vsel %vm1024_vm4, %v270_v38, %v274_v39 }
  0x32   : > { %873 = vmatmul.msk.bf16.gmra.mxu1 %vm334_vm1, %v389_v14  ;;  %v521_v52 = vrot.slane %v520_v40, 4  ;;  %v539_v53 = vrot.slane %v537_v41, 5  ;;  %v277_v54 = vshrl.u32 %v840_v45, 16  ;;  %v280_v56 = vshll.u32 %v840_v45, 16  ;;  %v921_v14 = vld [vmem:[%s1002_s6 + $0x34] sm:$0xf0] }
  0x33   : > { %v534_v50 = vor.u32 %v533_v44, %v530_v36  ;;  %v291_v57 = vshrl.u32 %v842_v46, 16  ;;  %v294_v58 = vshll.u32 %v842_v46, 16  ;;  %v384_v61 = vunpack.c.l.b16 %v261_v47 }
  0x34   : > { %906 = vmatmul.msk.bf16.gmra.mxu3 %vm334_vm1, %v895_v16  ;;  %v385_v62 = vunpack.c.l.b16 %v275_v51  ;;  %v526_v63 = vsel %vm1024_vm4, %v521_v52, %v525_v48  ;;  %v279_v0 = vrot.slane %v277_v54, 4  ;;  %v282_v3 = vrot.slane %v280_v56, 5 }
  0x35   : > { %881 = vmatmul.msk.bf16.gmra.mxu2 %vm334_vm1, %v580_v42  ;;  %866 = vmatmul.msk.bf16.gmra.mxu0 %vm334_vm1, %v855_v43  ;;  %v535_v55 = vrot.slane %v534_v50, 4  ;;  %v293_v4 = vrot.slane %v291_v57, 4  ;;  %v296_v5 = vrot.slane %v294_v58, 5  ;;  %v542_v7 = vshrl.u32 %v453_v59, 16 }
  0x36   : > { %v545_v8 = vshll.u32 %v453_v59, 16  ;;  %v556_v9 = vshrl.u32 %v455_v60, 16  ;;  %v559_v10 = vshll.u32 %v455_v60, 16  ;;  %v390_v11 = vpack.c.b16 %v385_v62, %v384_v61 }
  0x37   : > { %v540_v1 = vsel %vm1024_vm4, %v535_v55, %v539_v53  ;;  %v575_v12 = vunpack.c.l.b16 %v526_v63  ;;  %v286_v15 = vshll.u32 %v841_v2, 16  ;;  %v283_v19 = vor.u32 %v282_v3, %v279_v0 }
  0x38   : > { %v576_v16 = vunpack.c.l.b16 %v540_v1  ;;  %v297_v20 = vor.u32 %v296_v5, %v293_v4  ;;  %v300_v21 = vshll.u32 %v843_v6, 16  ;;  %v544_v23 = vrot.slane %v542_v7, 4 }
  0x39   : > { %v547_v24 = vrot.slane %v545_v8, 5  ;;  %v558_v25 = vrot.slane %v556_v9, 4  ;;  %v561_v26 = vrot.slane %v559_v10, 5  ;;  %v899_v28 = vor.u32 %v921_v14, %v898_v13 }
  0x3a   : > { %v859_v29 = vor.u32 %v914_v18, %v858_v17  ;;  %v288_v30 = vrot.slane %v286_v15, 5  ;;  %v581_v31 = vpack.c.b16 %v576_v16, %v575_v12  ;;  %v284_v32 = vrot.slane %v283_v19, 4 }
  0x3b   : > { %v302_v33 = vrot.slane %v300_v21, 5  ;;  %v551_v34 = vshll.u32 %v454_v22, 16  ;;  %v298_v35 = vrot.slane %v297_v20, 4  ;;  %v548_v36 = vor.u32 %v547_v24, %v544_v23 }
  0x3c   : > { %v562_v37 = vor.u32 %v561_v26, %v558_v25  ;;  %v565_v38 = vshll.u32 %v456_v27, 16  ;;  %v289_v39 = vsel %vm1024_vm4, %v284_v32, %v288_v30 }
  0x3d   : > { %v553_v40 = vrot.slane %v551_v34, 5  ;;  %v303_v41 = vsel %vm1024_vm4, %v298_v35, %v302_v33  ;;  %v549_v42 = vrot.slane %v548_v36, 4  ;;  %v386_v45 = vunpack.c.l.b16 %v289_v39 }
  0x3e   : > { %v563_v43 = vrot.slane %v562_v37, 4  ;;  %v567_v44 = vrot.slane %v565_v38, 5  ;;  %v387_v46 = vunpack.c.l.b16 %v303_v41 }
  0x3f   : > { %v554_v47 = vsel %vm1024_vm4, %v549_v42, %v553_v40 }
  0x40   : > { %v568_v48 = vsel %vm1024_vm4, %v563_v43, %v567_v44  ;;  %v391_v50 = vpack.c.b16 %v387_v46, %v386_v45  ;;  %v577_v51 = vunpack.c.l.b16 %v554_v47 }
  0x41   : > { %v578_v52 = vunpack.c.l.b16 %v568_v48 }
  0x42   : > { %874 = vmatmul.msk.bf16.gmra.mxu1 %vm334_vm1, %v390_v11 }
  0x43   : > { %v582_v53 = vpack.c.b16 %v578_v52, %v577_v51 }
  0x44   : > { %907 = vmatmul.msk.bf16.gmra.mxu3 %vm334_vm1, %v899_v28 }
  0x45   : > { %882 = vmatmul.msk.bf16.gmra.mxu2 %vm334_vm1, %v581_v31  ;;  %867 = vmatmul.msk.bf16.gmra.mxu0 %vm334_vm1, %v859_v29 }
  0x52   : > { %875 = vmatmul.msk.bf16.gmra.mxu1 %vm334_vm1, %v391_v50 }
  0x55   : > { %883 = vmatmul.msk.bf16.gmra.mxu2 %vm334_vm1, %v582_v53 }
  0x92   : > { %v360_v54 = vpop.f32.mrf.mxu0 }
  0x97   : > { %v700_v55 = vpop.f32.mrf.mxu3 }
  0x9a   : > { %v362_v57 = vpop.f32.mrf.mxu0 }
  0x9f   : > { %v421_v56 = vpop.f32.mrf.mxu1  ;;  %v702_v60 = vpop.f32.mrf.mxu3 }
  0xa0   : > { %v422_v58 = vadd.f32 %v421_v56, %v360_v54 }
  0xa2   : > { %v365_v0 = vpop.f32.mrf.mxu0 }
  0xa7   : > { %v423_v59 = vpop.f32.mrf.mxu1  ;;  %v705_v6 = vpop.f32.mrf.mxu3 }
  0xa8   : > { %v612_v61 = vpop.f32.mrf.mxu2  ;;  %v424_v4 = vadd.f32 %v423_v59, %v362_v57 }
  0xa9   : > { %v632_v62 = vadd.f32 %v612_v61, %v422_v58 }
  0xaa   : > { %v367_v12 = vpop.f32.mrf.mxu0 }
  0xab   : > { %v720_v63 = vadd.f32 %v700_v55, %v632_v62 }
  0xad   : > { %v732_v1 = vadd.f32 %v1113_v49, %v720_v63 }
  0xaf   : > { %v426_v2 = vpop.f32.mrf.mxu1  ;;  %v740_v3 = vmax.f32 %v732_v1, 0.0  ;;  %v707_v18 = vpop.f32.mrf.mxu3 }
  0xb0   : > { %v614_v5 = vpop.f32.mrf.mxu2  ;;  %v427_v11 = vadd.f32 %v426_v2, %v365_v0 }
  0xb1   : > { %v748_v7 = vpack.c.bf16 %v740_v3, %v740_v3  ;;  %v633_v8 = vadd.f32 %v614_v5, %v424_v4 }
  0xb2   : > { %v370_v24 = vpop.f32.mrf.mxu0 }
  0xb3   : > { %757 = vst.msk [vmem:[%s1120_s14] sm:$0xf] %vm756_vm5, %v748_v7  ;;  %v721_v9 = vadd.f32 %v702_v60, %v633_v8 }
  0xb5   : > { %v733_v10 = vadd.f32 %v1113_v49, %v721_v9 }
  0xb7   : > { %v428_v13 = vpop.f32.mrf.mxu1  ;;  %v741_v14 = vmax.f32 %v733_v10, 0.0  ;;  %v710_v29 = vpop.f32.mrf.mxu3 }
  0xb8   : > { %v617_v15 = vpop.f32.mrf.mxu2  ;;  %v429_v23 = vadd.f32 %v428_v13, %v367_v12 }
  0xb9   : > { %v749_v16 = vpack.c.bf16 %v741_v14, %v741_v14  ;;  %v634_v17 = vadd.f32 %v617_v15, %v427_v11 }
  0xba   : > { %v372_v37 = vpop.f32.mrf.mxu0 }
  0xbb   : > { %758 = vst.msk [vmem:[%s1120_s14 + $0x4] sm:$0xf] %vm756_vm5, %v749_v16  ;;  %v722_v19 = vadd.f32 %v705_v6, %v634_v17 }
  0xbd   : > { %v734_v20 = vadd.f32 %v1113_v49, %v722_v19 }
  0xbf   : > { %v431_v21 = vpop.f32.mrf.mxu1  ;;  %v742_v22 = vmax.f32 %v734_v20, 0.0  ;;  %v712_v40 = vpop.f32.mrf.mxu3 }
  0xc0   : > { %v619_v25 = vpop.f32.mrf.mxu2  ;;  %v432_v31 = vadd.f32 %v431_v21, %v370_v24 }
  0xc1   : > { %v750_v26 = vpack.c.bf16 %v742_v22, %v742_v22  ;;  %v635_v27 = vadd.f32 %v619_v25, %v429_v23 }
  0xc2   : > { %v375_v48 = vpop.f32.mrf.mxu0 }
  0xc3   : > { %759 = vst.msk [vmem:[%s1120_s14 + $0x8] sm:$0xf] %vm756_vm5, %v750_v26  ;;  %v723_v28 = vadd.f32 %v707_v18, %v635_v27 }
  0xc5   : > { %v735_v30 = vadd.f32 %v1113_v49, %v723_v28 }
  0xc7   : > { %v743_v32 = vmax.f32 %v735_v30, 0.0  ;;  %v433_v34 = vpop.f32.mrf.mxu1  ;;  %v715_v53 = vpop.f32.mrf.mxu3 }
  0xc8   : > { %v622_v33 = vpop.f32.mrf.mxu2  ;;  %v434_v42 = vadd.f32 %v433_v34, %v372_v37 }
  0xc9   : > { %v751_v35 = vpack.c.bf16 %v743_v32, %v743_v32  ;;  %v636_v36 = vadd.f32 %v622_v33, %v432_v31 }
  0xca   : > { %v377_v60 = vpop.f32.mrf.mxu0 }
  0xcb   : > { %760 = vst.msk [vmem:[%s1120_s14 + $0xc] sm:$0xf] %vm756_vm5, %v751_v35  ;;  %v724_v38 = vadd.f32 %v710_v29, %v636_v36 }
  0xcd   : > { %v736_v39 = vadd.f32 %v1113_v49, %v724_v38 }
  0xcf   : > { %v744_v41 = vmax.f32 %v736_v39, 0.0  ;;  %v436_v46 = vpop.f32.mrf.mxu1  ;;  %v717_v2 = vpop.f32.mrf.mxu3 }
  0xd0   : > { %v624_v43 = vpop.f32.mrf.mxu2  ;;  %v437_v51 = vadd.f32 %v436_v46, %v375_v48 }
  0xd1   : > { %v752_v44 = vpack.c.bf16 %v744_v41, %v744_v41  ;;  %v637_v45 = vadd.f32 %v624_v43, %v434_v42 }
  0xd3   : > { %761 = vst.msk [vmem:[%s1120_s14 + $0x10] sm:$0xf] %vm756_vm5, %v752_v44  ;;  %v725_v47 = vadd.f32 %v712_v40, %v637_v45 }
  0xd5   : > { %v737_v50 = vadd.f32 %v1113_v49, %v725_v47 }
  0xd7   : > { %v745_v52 = vmax.f32 %v737_v50, 0.0  ;;  %v438_v58 = vpop.f32.mrf.mxu1 }
  0xd8   : > { %v627_v54 = vpop.f32.mrf.mxu2  ;;  %v439_v62 = vadd.f32 %v438_v58, %v377_v60 }
  0xd9   : > { %v753_v55 = vpack.c.bf16 %v745_v52, %v745_v52  ;;  %v638_v56 = vadd.f32 %v627_v54, %v437_v51 }
  0xdb   : > { %762 = vst.msk [vmem:[%s1120_s14 + $0x14] sm:$0xf] %vm756_vm5, %v753_v55  ;;  %v726_v57 = vadd.f32 %v715_v53, %v638_v56 }
  0xdd   : > { %v738_v59 = vadd.f32 %v1113_v49, %v726_v57 }
  0xdf   : > { %v746_v61 = vmax.f32 %v738_v59, 0.0 }
  0xe0   : > { %v629_v63 = vpop.f32.mrf.mxu2 }
  0xe1   : > { %v754_v0 = vpack.c.bf16 %v746_v61, %v746_v61  ;;  %v639_v1 = vadd.f32 %v629_v63, %v439_v62 }
  0xe3   : > { %763 = vst.msk [vmem:[%s1120_s14 + $0x18] sm:$0xf] %vm756_vm5, %v754_v0  ;;  %v727_v3 = vadd.f32 %v717_v2, %v639_v1 }
  0xe5   : > { %v739_v4 = vadd.f32 %v1113_v49, %v727_v3 }
  0xe7   : > { %v747_v5 = vmax.f32 %v739_v4, 0.0 }
  0xe9   : > { %v755_v6 = vpack.c.bf16 %v747_v5, %v747_v5 }
  0xeb   : > { %764 = vst.msk [vmem:[%s1120_s14 + $0x1c] sm:$0xf] %vm756_vm5, %v755_v6 }
  0xec PF: > { %s13_s12 = sadd.s32 1, %s939_s12  }
  0xed   : > { %p10_p4 = scmp.ge.s32.totalorder %s13_s12, 4  }
  0xef   :  { %12 = sbr.rel (!%p10_p4) target bundleno = 1 (0x1), region = 63 }

// kernel: concept_vae_forward.6
= control target key start
LH: loop header
LB: loop body
LE: loop exit
PB: predicated region body
PF: predicated region fallthrough
CT: control target
= control target key end

     0   :  { %s1534_s12 = smov 0   ;;  %s1840_s0 = inlined_call_operand.vmem [shape: bf16[2,5,5,256], index: 0, kind: input, shape index: {}]   ;;  %s1841_s1 = inlined_call_operand.vmem [shape: bf16[1024,128], index: 1, kind: input, shape index: {}]   ;;  %s1842_s2 = inlined_call_operand.vmem [shape: f32[1,128], index: 2, kind: input, shape index: {}]   ;;  %s1843_s3 = inlined_call_operand.vmem [shape: bf16[2,16,128], index: 3, kind: output, shape index: {}]  }
   0x1 LB: > { %s1152_s13 = sadd.s32 4294967295, %s1512_s12   ;;  %p1156_p0 = scmp.ge.s32.totalorder %s1512_s12, 1  ;;  %s1512_s12 = sphi %s1534_s12, %s13_s12  }
   0x2   : > { %p137_p1 = scmp.lt.s32.totalorder %s1512_s12, 3 }
   0x4   : > { %p138_p2 = pnand %p1156_p0, %p137_p1 }
   0x5   : > { %p161_p3 = scmp.lt.s32.totalorder (!%p138_p2), %s1152_s13, 1 }
   0x6   : > { %141 = sbr.rel (%p138_p2) target bundleno = 229 (0xe5), region = 32 }
   0xb   : > { %v1450_v0 = vld [vmem:[%s1841_s1 + $0xb8] sm:$0xff]  ;;  %v1449_v4 = vld [vmem:[%s1841_s1 + $0xb0] sm:$0xff]  ;;  %s1851_s13 = smov (!%p161_p3, %s1152_s13), 1  ;;  %v1448_v8 = vld [vmem:[%s1841_s1 + $0xa8] sm:$0xff]  ;;  %vm184_vm0 = vcmask 1041408   ;;  %vm188_vm1 = vcmask 1043458  }
   0xc   : > { %v1458_v1 = vld [vmem:[%s1841_s1 + $0xf8] sm:$0xff]  ;;  %464 = vmatpush.bf16.msra.mxu0 %v1450_v0  ;;  %v1457_v5 = vld [vmem:[%s1841_s1 + $0xf0] sm:$0xff]  ;;  %v1456_v9 = vld [vmem:[%s1841_s1 + $0xe8] sm:$0xff]  ;;  %s1496_s7 = smul.u32 40, %s1851_s13  ;;  %vm210_vm2 = vsmask.f32 1280 }
   0xd   : > { %v1434_v2 = vld [vmem:[%s1841_s1 + $0x38] sm:$0xff]  ;;  %478 = vmatpush.bf16.msra.mxu1 %v1458_v1  ;;  %v1433_v6 = vld [vmem:[%s1841_s1 + $0x30] sm:$0xff]  ;;  %v1432_v10 = vld [vmem:[%s1841_s1 + $0x28] sm:$0xff]  ;;  %vm211_vm3 = vsmask.f32 3336  ;;  %s1426_s26 = sshll.u32 %s1851_s13, 3 }
   0xe   : > { %v1442_v3 = vld [vmem:[%s1841_s1 + $0x78] sm:$0xff]  ;;  %603 = vmatpush.bf16.msra.mxu2 %v1434_v2  ;;  %v1441_v7 = vld [vmem:[%s1841_s1 + $0x70] sm:$0xff]  ;;  %v1440_v11 = vld [vmem:[%s1841_s1 + $0x68] sm:$0xff]  ;;  %s1590_s20 = scalar_lea.vmem %s1840_s0, %s1496_s7  ;;  %vm213_vm4 = vsmask.f32 5392  ;;  %s170_s29 = scalar_lea.vmem %s1843_s3, %s1426_s26 }
   0xf   : > { %617 = vmatpush.bf16.msra.mxu3 %v1442_v3  ;;  %v1447_v12 = vld [vmem:[%s1841_s1 + $0xa0] sm:$0xff]  ;;  %v1446_v16 = vld [vmem:[%s1841_s1 + $0x98] sm:$0xff]  ;;  %v1160_v18 = vld [vmem:[%s1590_s20 + $0x8] sm:$0x77]  ;;  %vm215_vm5 = vsmask.f32 7448 }
  0x10   : > { %465 = vmatpush.bf16.msra.mxu0 %v1449_v4  ;;  %v1455_v13 = vld [vmem:[%s1841_s1 + $0xe0] sm:$0xff]  ;;  %v1454_v17 = vld [vmem:[%s1841_s1 + $0xd8] sm:$0xff]  ;;  %v1161_v19 = vld [vmem:[%s1590_s20 + $0x10] sm:$0x77]  ;;  %v180_v22 = vrot.slane %v1160_v18, 2 }
  0x11   : > { %479 = vmatpush.bf16.msra.mxu1 %v1457_v5  ;;  %v1431_v14 = vld [vmem:[%s1841_s1 + $0x20] sm:$0xff]  ;;  %v1162_v20 = vld [vmem:[%s1590_s20 + $0x18] sm:$0x77]  ;;  %v181_v23 = vrot.slane %v1161_v19, 2  ;;  %v1445_v33 = vld [vmem:[%s1841_s1 + $0x90] sm:$0xff] }
  0x12   : > { %604 = vmatpush.bf16.msra.mxu2 %v1433_v6  ;;  %v1439_v15 = vld [vmem:[%s1841_s1 + $0x60] sm:$0xff]  ;;  %v1430_v24 = vld [vmem:[%s1841_s1 + $0x18] sm:$0xff]  ;;  %v182_v26 = vrot.slane %v1162_v20, 2  ;;  %v187_v28 = vsel %vm184_vm0, %v1160_v18, %v180_v22  ;;  %v189_v29 = vsel %vm188_vm1, %v1160_v18, %v180_v22  ;;  %v1453_v34 = vld [vmem:[%s1841_s1 + $0xd0] sm:$0xff] }
  0x13   : > { %618 = vmatpush.bf16.msra.mxu3 %v1441_v7  ;;  %v1163_v21 = vld [vmem:[%s1590_s20 + $0x20] sm:$0x77]  ;;  %v1438_v25 = vld [vmem:[%s1841_s1 + $0x58] sm:$0xff]  ;;  %v194_v30 = vsel %vm184_vm0, %v1161_v19, %v181_v23  ;;  %v195_v31 = vsel %vm188_vm1, %v1161_v19, %v181_v23  ;;  %v191_v32 = vrot.slane %v189_v29, 2  ;;  %v217_v37 = vshrl.u32 %v187_v28, 16  ;;  %v1429_v38 = vld [vmem:[%s1841_s1 + $0x10] sm:$0xff] }
  0x14   : > { %466 = vmatpush.bf16.msra.mxu0 %v1448_v8  ;;  %v183_v27 = vrot.slane %v1163_v21, 2  ;;  %v197_v35 = vrot.slane %v195_v31, 2  ;;  %v200_v36 = vsel %vm184_vm0, %v1162_v20, %v182_v26  ;;  %v1437_v39 = vld [vmem:[%s1841_s1 + $0x50] sm:$0xff]  ;;  %v201_v40 = vsel %vm188_vm1, %v1162_v20, %v182_v26  ;;  %v1444_v44 = vld [vmem:[%s1841_s1 + $0x88] sm:$0xff]  ;;  %vm1652_vm6 = vmor %vm210_vm2, %vm211_vm3 }
  0x15   : > { %480 = vmatpush.bf16.msra.mxu1 %v1456_v9  ;;  %v220_v42 = vshll.u32 %v187_v28, 16  ;;  %v230_v43 = vshrl.u32 %v194_v30, 16  ;;  %v1452_v45 = vld [vmem:[%s1841_s1 + $0xc8] sm:$0xff]  ;;  %v219_v47 = vrot.slane %v217_v37, 6  ;;  %v1640_v48 = vshll.u32 %v191_v32, 16  ;;  %v1443_v2 = vld [vmem:[%s1841_s1 + $0x80] sm:$0xff]  ;;  %vm1678_vm7 = vmor %vm1652_vm6, %vm213_vm4 }
  0x16   : > { %605 = vmatpush.bf16.msra.mxu2 %v1432_v10  ;;  %v206_v41 = vsel %vm184_vm0, %v1163_v21, %v183_v27  ;;  %v207_v46 = vsel %vm188_vm1, %v1163_v21, %v183_v27  ;;  %v233_v49 = vshll.u32 %v194_v30, 16  ;;  %v243_v52 = vshrl.u32 %v200_v36, 16  ;;  %v1164_v54 = vld [vmem:[%s1590_s20 + $0x8] sm:$0x33]  ;;  %v1165_v59 = vld [vmem:[%s1590_s20 + $0x10] sm:$0x33]  ;;  %vm1706_vm8 = vmor %vm1678_vm7, %vm215_vm5 }
  0x17   : > { %619 = vmatpush.bf16.msra.mxu3 %v1440_v11  ;;  %v222_v50 = vrot.slane %v220_v42, 7  ;;  %v232_v51 = vrot.slane %v230_v43, 6  ;;  %v246_v53 = vshll.u32 %v200_v36, 16  ;;  %v1428_v55 = vld [vmem:[%s1841_s1 + $0x8] sm:$0xff]  ;;  %v203_v57 = vrot.slane %v201_v40, 2  ;;  %v1451_v3 = vld [vmem:[%s1841_s1 + $0xc0] sm:$0xff] }
  0x18   : > { %467 = vmatpush.bf16.msra.mxu0 %v1447_v12  ;;  %v1436_v56 = vld [vmem:[%s1841_s1 + $0x48] sm:$0xff]  ;;  %v235_v58 = vrot.slane %v233_v49, 7  ;;  %v209_v60 = vrot.slane %v207_v46, 2  ;;  %v1656_v62 = vshll.u32 %v197_v35, 16  ;;  %v256_v63 = vshrl.u32 %v206_v41, 16  ;;  %v1427_v8 = vld [vmem:[%s1841_s1] sm:$0xff] }
  0x19   : > { %481 = vmatpush.bf16.msra.mxu1 %v1455_v13  ;;  %v259_v0 = vshll.u32 %v206_v41, 16  ;;  %v1166_v1 = vld [vmem:[%s1590_s20 + $0x18] sm:$0x33]  ;;  %v223_v4 = vor.u32 %v222_v50, %v219_v47  ;;  %v1167_v5 = vld [vmem:[%s1590_s20 + $0x20] sm:$0x33]  ;;  %v309_v6 = vrot.slane %v1164_v54, 2 }
  0x1a   : > { %606 = vmatpush.bf16.msra.mxu2 %v1431_v14  ;;  %v631_v7 = vld [vmem:[%s1590_s20] sm:$0x77]  ;;  %v228_v10 = vrot.slane %v1640_v48, 7  ;;  %v236_v11 = vor.u32 %v235_v58, %v232_v51  ;;  %v245_v12 = vrot.slane %v243_v52, 6  ;;  %v248_v13 = vrot.slane %v246_v53, 7  ;;  %v1474_v26 = vld [vmem:[%s1841_s1 + $0x178] sm:$0xff] }
  0x1b   : > { %620 = vmatpush.bf16.msra.mxu3 %v1439_v15  ;;  %v1435_v9 = vld [vmem:[%s1841_s1 + $0x40] sm:$0xff]  ;;  %v632_v14 = vld [vmem:[%s1590_s20 + $0x8] sm:$0x77]  ;;  %v310_v18 = vrot.slane %v1165_v59, 2  ;;  %v311_v19 = vrot.slane %v1166_v1, 2  ;;  %v241_v21 = vrot.slane %v1656_v62, 7  ;;  %v315_v28 = vsel %vm184_vm0, %v1164_v54, %v309_v6 }
  0x1c   : > { %468 = vmatpush.bf16.msra.mxu0 %v1446_v16  ;;  %v258_v16 = vrot.slane %v256_v63, 6  ;;  %v633_v20 = vld [vmem:[%s1590_s20 + $0x10] sm:$0x77]  ;;  %v1684_v22 = vshll.u32 %v203_v57, 16  ;;  %v1686_v23 = vshll.u32 %v209_v60, 16  ;;  %v224_v27 = vrot.slane %v223_v4, 2 }
  0x1d   : > { %482 = vmatpush.bf16.msra.mxu1 %v1454_v17  ;;  %v261_v17 = vrot.slane %v259_v0, 7  ;;  %v318_v29 = vsel %vm184_vm0, %v1165_v59, %v310_v18  ;;  %v321_v30 = vsel %vm184_vm0, %v1166_v1, %v311_v19  ;;  %v1482_v31 = vld [vmem:[%s1841_s1 + $0x1b8] sm:$0xff]  ;;  %v249_v35 = vor.u32 %v248_v13, %v245_v12  ;;  %357 = vst [vmem:[#allocation1] ss:$4 sm:$0xff] %v315_v28  ;;  %v1473_v46 = vld [vmem:[%s1841_s1 + $0x170] sm:$0xff]  ;;  %v1464_v1 = vld [vmem:[%s1841_s1 + $0x128] sm:$0xff] }
  0x1e   : > { %607 = vmatpush.bf16.msra.mxu2 %v1430_v24  ;;  %v312_v24 = vrot.slane %v1167_v5, 2  ;;  %v1490_v32 = vld [vmem:[%s1841_s1 + $0x1f8] sm:$0xff]  ;;  %v639_v37 = vrot.slane %v631_v7, 2  ;;  %359 = vst [vmem:[#allocation1 + $0x1] ss:$4 sm:$0xff] %v318_v29  ;;  %v640_v40 = vrot.slane %v632_v14, 2  ;;  %v229_v47 = vsel %vm1706_vm8, %v224_v27, %v228_v10 }
  0x1f   : > { %621 = vmatpush.bf16.msra.mxu3 %v1438_v25  ;;  %v1466_v25 = vld [vmem:[%s1841_s1 + $0x138] sm:$0xff]  ;;  %v641_v41 = vrot.slane %v633_v20, 2  ;;  %v254_v42 = vrot.slane %v1684_v22, 7  ;;  %361 = vst [vmem:[#allocation1 + $0x2] ss:$4 sm:$0xff] %v321_v30  ;;  %v267_v48 = vrot.slane %v1686_v23, 7 }
  0x20   : > { %469 = vmatpush.bf16.msra.mxu0 %v1445_v33  ;;  %v324_v36 = vsel %vm184_vm0, %v1167_v5, %v312_v24  ;;  %v645_v43 = vsel %vm184_vm0, %v631_v7, %v639_v37  ;;  %v651_v49 = vsel %vm184_vm0, %v632_v14, %v640_v40  ;;  %v1481_v51 = vld [vmem:[%s1841_s1 + $0x1b0] sm:$0xff]  ;;  %v250_v54 = vrot.slane %v249_v35, 2  ;;  %v1471_v22 = vld [vmem:[%s1841_s1 + $0x160] sm:$0xff]  ;;  %v1476_v33 = vld [vmem:[%s1841_s1 + $0x188] sm:$0xff] }
  0x21   : > { %483 = vmatpush.bf16.msra.mxu1 %v1453_v34  ;;  %v237_v34 = vrot.slane %v236_v11, 2  ;;  %363 = vst [vmem:[#allocation1 + $0x3] ss:$4 sm:$0xff] %v324_v36  ;;  %v667_v50 = vshrl.u32 %v645_v43, 16  ;;  %v1489_v52 = vld [vmem:[%s1841_s1 + $0x1f0] sm:$0xff]  ;;  %v652_v59 = vsel %vm188_vm1, %v632_v14, %v640_v40  ;;  %v670_v60 = vshll.u32 %v645_v43, 16 }
  0x22   : > { %608 = vmatpush.bf16.msra.mxu2 %v1429_v38  ;;  %v262_v38 = vor.u32 %v261_v17, %v258_v16  ;;  %v658_v61 = vsel %vm188_vm1, %v633_v20, %v641_v41  ;;  %v680_v63 = vshrl.u32 %v651_v49, 16  ;;  %v683_v0 = vshll.u32 %v651_v49, 16  ;;  %v1487_v27 = vld [vmem:[%s1841_s1 + $0x1e0] sm:$0xff] }
  0x23   : > { %622 = vmatpush.bf16.msra.mxu3 %v1437_v39  ;;  %v634_v39 = vld [vmem:[%s1590_s20 + $0x18] sm:$0x77]  ;;  %v242_v53 = vsel %vm1706_vm8, %v237_v34, %v241_v21  ;;  %v672_v4 = vrot.slane %v670_v60, 7  ;;  %v660_v13 = vrot.slane %v658_v61, 2  ;;  %v255_v17 = vsel %vm1706_vm8, %v250_v54, %v254_v42  ;;  %v1463_v21 = vld [vmem:[%s1841_s1 + $0x120] sm:$0xff]  ;;  %v1485_v54 = vld [vmem:[%s1841_s1 + $0x1d0] sm:$0xff] }
  0x24   : > { %470 = vmatpush.bf16.msra.mxu0 %v1444_v44  ;;  %v646_v44 = vsel %vm188_vm1, %v631_v7, %v639_v37  ;;  %v263_v57 = vrot.slane %v262_v38, 2  ;;  %v1480_v7 = vld [vmem:[%s1841_s1 + $0x1a8] sm:$0xff]  ;;  %v682_v11 = vrot.slane %v680_v63, 6  ;;  %v685_v12 = vrot.slane %v683_v0, 7  ;;  %v1462_v37 = vld [vmem:[%s1841_s1 + $0x118] sm:$0xff] }
  0x25   : > { %484 = vmatpush.bf16.msra.mxu1 %v1452_v45  ;;  %v1465_v45 = vld [vmem:[%s1841_s1 + $0x130] sm:$0xff]  ;;  %v648_v58 = vrot.slane %v646_v44, 2  ;;  %v1470_v38 = vld [vmem:[%s1841_s1 + $0x158] sm:$0xff]  ;;  %v1460_v60 = vld [vmem:[%s1841_s1 + $0x108] sm:$0xff] }
  0x26   : > { %609 = vmatpush.bf16.msra.mxu2 %v1428_v55  ;;  %v642_v55 = vrot.slane %v634_v39, 2  ;;  %v686_v28 = vor.u32 %v685_v12, %v682_v11  ;;  %v1486_v42 = vld [vmem:[%s1841_s1 + $0x1d8] sm:$0xff]  ;;  %v1468_v61 = vld [vmem:[%s1841_s1 + $0x148] sm:$0xff] }
  0x27   : > { %623 = vmatpush.bf16.msra.mxu3 %v1436_v56  ;;  %v657_v56 = vsel %vm184_vm0, %v633_v20, %v641_v41  ;;  %v268_v20 = vsel %vm1706_vm8, %v263_v57, %v267_v48  ;;  %v676_v24 = vshll.u32 %v648_v58, 16  ;;  %v1478_v41 = vld [vmem:[%s1841_s1 + $0x198] sm:$0xff]  ;;  %v1484_v63 = vld [vmem:[%s1841_s1 + $0x1c8] sm:$0xff] }
  0x28   : > { %471 = vmatpush.bf16.msra.mxu0 %v1443_v2  ;;  %v664_v62 = vsel %vm188_vm1, %v634_v39, %v642_v55  ;;  %v1472_v2 = vld [vmem:[%s1841_s1 + $0x168] sm:$0xff]  ;;  %v693_v5 = vshrl.u32 %v657_v56, 16  ;;  %v696_v6 = vshll.u32 %v657_v56, 16  ;;  %v663_v10 = vsel %vm184_vm0, %v634_v39, %v642_v55  ;;  %v364_v18 = vld.sshfl [vmem:[#allocation1] sm:$0xff pattern:$0x73625140] }
  0x29   : > { %485 = vmatpush.bf16.msra.mxu1 %v1451_v3  ;;  %v669_v3 = vrot.slane %v667_v50, 6  ;;  %v666_v14 = vrot.slane %v664_v62, 2  ;;  %v365_v19 = vld.sshfl [vmem:[#allocation1 + $0x8] sm:$0xff pattern:$0x73625140]  ;;  %v709_v30 = vshll.u32 %v663_v10, 16 }
  0x2a   : > { %610 = vmatpush.bf16.msra.mxu2 %v1427_v8  ;;  %v1488_v8 = vld [vmem:[%s1841_s1 + $0x1e8] sm:$0xff]  ;;  %v695_v15 = vrot.slane %v693_v5, 6  ;;  %v698_v16 = vrot.slane %v696_v6, 7  ;;  %493 = vst [vmem:[#allocation1] ss:$4 sm:$0xff] %v229_v47  ;;  %v678_v40 = vrot.slane %v676_v24, 7 }
  0x2b   : > { %624 = vmatpush.bf16.msra.mxu3 %v1435_v9  ;;  %v654_v9 = vrot.slane %v652_v59, 2  ;;  %v673_v23 = vor.u32 %v672_v4, %v669_v3  ;;  %496 = vst [vmem:[#allocation1 + $0x1] ss:$4 sm:$0xff] %v242_v53  ;;  %472 = vmatmul.bf16.vlgmr.msra.gmra.mxu0 %v364_v18  ;;  %v711_v35 = vrot.slane %v709_v30, 7  ;;  %v715_v36 = vshll.u32 %v666_v14, 16  ;;  %v1461_v50 = vld [vmem:[%s1841_s1 + $0x110] sm:$0xff] }
  0x2c   : > { %862 = vmatpush.bf16.msrb.mxu0 %v1466_v25  ;;  %v706_v25 = vshrl.u32 %v663_v10, 16  ;;  %499 = vst [vmem:[#allocation1 + $0x2] ss:$4 sm:$0xff] %v255_v17  ;;  %486 = vmatmul.bf16.vlgmr.msra.gmra.mxu1 %v365_v19  ;;  %v687_v43 = vrot.slane %v686_v28, 2  ;;  %v1477_v53 = vld [vmem:[%s1841_s1 + $0x190] sm:$0xff]  ;;  %v1459_v4 = vld [vmem:[%s1841_s1 + $0x100] sm:$0xff] }
  0x2d   : > { %876 = vmatpush.bf16.msrb.mxu1 %v1474_v26  ;;  %v1479_v26 = vld [vmem:[%s1841_s1 + $0x1a0] sm:$0xff]  ;;  %v689_v29 = vshll.u32 %v654_v9, 16  ;;  %502 = vst [vmem:[#allocation1 + $0x3] ss:$4 sm:$0xff] %v268_v20  ;;  %v674_v39 = vrot.slane %v673_v23, 2  ;;  %v717_v49 = vrot.slane %v715_v36, 7 }
  0x2e   : > { %1055 = vmatpush.bf16.msrb.mxu2 %v1482_v31  ;;  %v699_v31 = vor.u32 %v698_v16, %v695_v15  ;;  %v708_v34 = vrot.slane %v706_v25, 6  ;;  %v892_v62 = vld [vmem:[%s1590_s20] sm:$0x33]  ;;  %v893_v0 = vld [vmem:[%s1590_s20 + $0x8] sm:$0x33] }
  0x2f   : > { %1069 = vmatpush.bf16.msrb.mxu3 %v1490_v32  ;;  %v702_v32 = vshll.u32 %v660_v13, 16  ;;  %v691_v44 = vrot.slane %v689_v29, 7  ;;  %v900_v3 = vrot.slane %v892_v62, 2  ;;  %v1467_v5 = vld [vmem:[%s1841_s1 + $0x140] sm:$0xff]  ;;  %v901_v6 = vrot.slane %v893_v0, 2 }
  0x30   : > { %863 = vmatpush.bf16.msrb.mxu0 %v1465_v45  ;;  %v712_v45 = vor.u32 %v711_v35, %v708_v34 }
  0x31   : > { %877 = vmatpush.bf16.msrb.mxu1 %v1473_v46  ;;  %v700_v46 = vrot.slane %v699_v31, 2  ;;  %v704_v47 = vrot.slane %v702_v32, 7  ;;  %v692_v55 = vsel %vm1706_vm8, %v687_v43, %v691_v44  ;;  %v906_v11 = vsel %vm184_vm0, %v892_v62, %v900_v3 }
  0x32   : > { %1056 = vmatpush.bf16.msrb.mxu2 %v1481_v51  ;;  %v713_v48 = vrot.slane %v712_v45, 2  ;;  %v1469_v51 = vld [vmem:[%s1841_s1 + $0x150] sm:$0xff]  ;;  %v909_v12 = vsel %vm184_vm0, %v893_v0, %v901_v6  ;;  %v1505_v45 = vld [vmem:[%s1842_s2] ss:$0 sm:$0xff] }
  0x33   : > { %1070 = vmatpush.bf16.msrb.mxu3 %v1489_v52  ;;  %v679_v52 = vsel %vm1706_vm8, %v674_v39, %v678_v40  ;;  %v705_v58 = vsel %vm1706_vm8, %v700_v46, %v704_v47 }
  0x34   : > { %864 = vmatpush.bf16.msrb.mxu0 %v1464_v1  ;;  %v503_v56 = vld.sshfl [vmem:[#allocation1] sm:$0xff pattern:$0x73625140]  ;;  %v504_v57 = vld.sshfl [vmem:[#allocation1 + $0x8] sm:$0xff pattern:$0x73625140]  ;;  %v718_v59 = vsel %vm1706_vm8, %v713_v48, %v717_v49 }
  0x35   : > { %878 = vmatpush.bf16.msrb.mxu1 %v1472_v2  ;;  %611 = vmatmul.bf16.vlgmr.msra.gmra.mxu2 %v503_v56  ;;  %752 = vst [vmem:[#allocation1] ss:$4 sm:$0xff] %v679_v52  ;;  %v894_v1 = vld [vmem:[%s1590_s20 + $0x10] sm:$0x33]  ;;  %v895_v2 = vld [vmem:[%s1590_s20 + $0x18] sm:$0x33] }
  0x36   : > { %1057 = vmatpush.bf16.msrb.mxu2 %v1480_v7  ;;  %625 = vmatmul.bf16.vlgmr.msra.gmra.mxu3 %v504_v57  ;;  %755 = vst [vmem:[#allocation1 + $0x1] ss:$4 sm:$0xff] %v692_v55  ;;  %v1475_v7 = vld [vmem:[%s1841_s1 + $0x180] sm:$0xff]  ;;  %v902_v9 = vrot.slane %v894_v1, 2  ;;  %v903_v10 = vrot.slane %v895_v2, 2 }
  0x37   : > { %1071 = vmatpush.bf16.msrb.mxu3 %v1488_v8  ;;  %758 = vst [vmem:[#allocation1 + $0x2] ss:$4 sm:$0xff] %v705_v58  ;;  %v1483_v8 = vld [vmem:[%s1841_s1 + $0x1c0] sm:$0xff] }
  0x38   : > { %865 = vmatpush.bf16.msrb.mxu0 %v1463_v21  ;;  %761 = vst [vmem:[#allocation1 + $0x3] ss:$4 sm:$0xff] %v718_v59  ;;  %v912_v15 = vsel %vm184_vm0, %v894_v1, %v902_v9  ;;  %v915_v16 = vsel %vm184_vm0, %v895_v2, %v903_v10 }
  0x39   : > { %879 = vmatpush.bf16.msrb.mxu1 %v1471_v22 }
  0x3a   : > { %1058 = vmatpush.bf16.msrb.mxu2 %v1479_v26 }
  0x3b   : > { %1072 = vmatpush.bf16.msrb.mxu3 %v1487_v27 }
  0x3c   : > { %866 = vmatpush.bf16.msrb.mxu0 %v1462_v37 }
  0x3d   : > { %880 = vmatpush.bf16.msrb.mxu1 %v1470_v38 }
  0x3e   : > { %1059 = vmatpush.bf16.msrb.mxu2 %v1478_v41 }
  0x3f   : > { %1073 = vmatpush.bf16.msrb.mxu3 %v1486_v42  ;;  %v762_v13 = vld.sshfl [vmem:[#allocation1] sm:$0xff pattern:$0x73625140]  ;;  %v763_v14 = vld.sshfl [vmem:[#allocation1 + $0x8] sm:$0xff pattern:$0x73625140] }
  0x40   : > { %867 = vmatpush.bf16.msrb.mxu0 %v1461_v50  ;;  %948 = vst [vmem:[#allocation1] ss:$4 sm:$0xff] %v906_v11 }
  0x41   : > { %881 = vmatpush.bf16.msrb.mxu1 %v1469_v51  ;;  %950 = vst [vmem:[#allocation1 + $0x1] ss:$4 sm:$0xff] %v909_v12 }
  0x42   : > { %1060 = vmatpush.bf16.msrb.mxu2 %v1477_v53  ;;  %952 = vst [vmem:[#allocation1 + $0x2] ss:$4 sm:$0xff] %v912_v15 }
  0x43   : > { %1074 = vmatpush.bf16.msrb.mxu3 %v1485_v54  ;;  %954 = vst [vmem:[#allocation1 + $0x3] ss:$4 sm:$0xff] %v915_v16 }
  0x44   : > { %868 = vmatpush.bf16.msrb.mxu0 %v1460_v60 }
  0x45   : > { %882 = vmatpush.bf16.msrb.mxu1 %v1468_v61 }
  0x46   : > { %1061 = vmatpush.bf16.msrb.mxu2 %v1476_v33 }
  0x47   : > { %1075 = vmatpush.bf16.msrb.mxu3 %v1484_v63 }
  0x48   : > { %869 = vmatpush.bf16.msrb.mxu0 %v1459_v4 }
  0x49   : > { %883 = vmatpush.bf16.msrb.mxu1 %v1467_v5 }
  0x4a   : > { %1062 = vmatpush.bf16.msrb.mxu2 %v1475_v7  ;;  %v955_v17 = vld.sshfl [vmem:[#allocation1] sm:$0xff pattern:$0x73625140]  ;;  %v956_v18 = vld.sshfl [vmem:[#allocation1 + $0x8] sm:$0xff pattern:$0x73625140] }
  0x4b   : > { %1076 = vmatpush.bf16.msrb.mxu3 %v1483_v8  ;;  %870 = vmatmul.bf16.vlgmr.msrb.gmra.mxu0 %v762_v13 }
  0x4c   : > { %884 = vmatmul.bf16.vlgmr.msrb.gmra.mxu1 %v763_v14 }
  0x4d   : > { %1063 = vmatmul.bf16.vlgmr.msrb.gmra.mxu2 %v955_v17 }
  0x4e   : > { %1077 = vmatmul.bf16.vlgmr.msrb.gmra.mxu3 %v956_v18 }
  0xa8   : > { %v473_v19 = vpop.f32.mrf.mxu0 }
  0xa9   : > { %v487_v20 = vpop.f32.mrf.mxu1 }
  0xaa   : > { %v488_v29 = vadd.f32 %v487_v20, %v473_v19 }
  0xb0   : > { %v475_v23 = vpop.f32.mrf.mxu0 }
  0xb1   : > { %v489_v24 = vpop.f32.mrf.mxu1 }
  0xb2   : > { %v490_v31 = vadd.f32 %v489_v24, %v475_v23 }
  0xb8   : > { %v612_v21 = vpop.f32.mrf.mxu2 }
  0xb9   : > { %v626_v22 = vpop.f32.mrf.mxu3  ;;  %v613_v30 = vadd.f32 %v612_v21, %v488_v29 }
  0xbb   : > { %v627_v38 = vadd.f32 %v626_v22, %v613_v30 }
  0xc0   : > { %v614_v27 = vpop.f32.mrf.mxu2 }
  0xc1   : > { %v628_v28 = vpop.f32.mrf.mxu3  ;;  %v615_v39 = vadd.f32 %v614_v27, %v490_v31 }
  0xc3   : > { %v629_v43 = vadd.f32 %v628_v28, %v615_v39 }
  0xc8   : > { %v871_v25 = vpop.f32.mrf.mxu0 }
  0xc9   : > { %v885_v26 = vpop.f32.mrf.mxu1 }
  0xca   : > { %v886_v35 = vadd.f32 %v885_v26, %v871_v25 }
  0xcc   : > { %v890_v41 = vadd.f32 %v886_v35, %v627_v38 }
  0xd0   : > { %v1064_v32 = vpop.f32.mrf.mxu2  ;;  %v873_v36 = vpop.f32.mrf.mxu0 }
  0xd1   : > { %v1078_v34 = vpop.f32.mrf.mxu3  ;;  %v887_v37 = vpop.f32.mrf.mxu1 }
  0xd2   : > { %v1079_v40 = vadd.f32 %v1078_v34, %v1064_v32  ;;  %v888_v42 = vadd.f32 %v887_v37, %v873_v36 }
  0xd4   : > { %v1083_v44 = vadd.f32 %v1079_v40, %v890_v41  ;;  %v891_v48 = vadd.f32 %v888_v42, %v629_v43 }
  0xd6   : > { %v1089_v50 = vadd.f32 %v1505_v45, %v1083_v44 }
  0xd8   : > { %v1066_v46 = vpop.f32.mrf.mxu2  ;;  %v1091_v53 = vmax.f32 %v1089_v50, 0.0 }
  0xd9   : > { %v1080_v47 = vpop.f32.mrf.mxu3 }
  0xda   : > { %v1081_v49 = vadd.f32 %v1080_v47, %v1066_v46 }
  0xdc   : > { %v1084_v51 = vadd.f32 %v1081_v49, %v891_v48 }
  0xde   : > { %v1090_v52 = vadd.f32 %v1505_v45, %v1084_v51 }
  0xe0   : > { %v1092_v54 = vmax.f32 %v1090_v52, 0.0 }
  0xe2   : > { %v1494_v55 = vpack.c.bf16 %v1092_v54, %v1091_v53 }
  0xe4   : > { %1495 = vst [vmem:[%s170_s29] sm:$0xff] %v1494_v55  }
  0xe5 PF: > { %s13_s12 = sadd.s32 1, %s1512_s12  }
  0xe6   : > { %p10_p4 = scmp.ge.s32.totalorder %s13_s12, 4  }
  0xe8   :  { %12 = sbr.rel (!%p10_p4) target bundleno = 1 (0x1), region = 75 }

// kernel: concept_vae_forward.8
= control target key start
LH: loop header
LB: loop body
LE: loop exit
PB: predicated region body
PF: predicated region fallthrough
CT: control target
= control target key end

     0   :  { %s824_s12 = smov 0   ;;  %s957_s0 = inlined_call_operand.vmem [shape: bf16[2,5,5,64], index: 0, kind: input, shape index: {}]   ;;  %s958_s1 = inlined_call_operand.vmem [shape: bf16[256,128], index: 1, kind: input, shape index: {}]   ;;  %s959_s2 = inlined_call_operand.vmem [shape: f32[1,128], index: 2, kind: input, shape index: {}]   ;;  %s960_s3 = inlined_call_operand.vmem [shape: bf16[2,16,128], index: 3, kind: output, shape index: {}]  }
   0x1 LB: > { %s678_s13 = sadd.s32 4294967295, %s802_s12   ;;  %p682_p0 = scmp.ge.s32.totalorder %s802_s12, 1  ;;  %s802_s12 = sphi %s824_s12, %s13_s12  }
   0x2   : > { %p137_p1 = scmp.lt.s32.totalorder %s802_s12, 3 }
   0x4   : > { %p138_p2 = pnand %p682_p0, %p137_p1 }
   0x5   : > { %p161_p3 = scmp.lt.s32.totalorder (!%p138_p2), %s678_s13, 1 }
   0x6   : > { %141 = sbr.rel (%p138_p2) target bundleno = 224 (0xe0), region = 32 }
   0xb   : > { %v776_v0 = vld [vmem:[%s958_s1 + $0x58] sm:$0xff]  ;;  %v775_v3 = vld [vmem:[%s958_s1 + $0x50] sm:$0xff]  ;;  %s964_s13 = smov (!%p161_p3, %s678_s13), 1  ;;  %v774_v8 = vld [vmem:[%s958_s1 + $0x48] sm:$0xff]  ;;  %vm196_vm0 = vcmask 1041408   ;;  %vm200_vm1 = vcmask 1043458  }
   0xc   : > { %v772_v1 = vld [vmem:[%s958_s1 + $0x38] sm:$0xff]  ;;  %449 = vmatpush.bf16.msra.mxu2 %v776_v0  ;;  %v771_v4 = vld [vmem:[%s958_s1 + $0x30] sm:$0xff]  ;;  %s786_s30 = smul.u32 20, %s964_s13  ;;  %v770_v9 = vld [vmem:[%s958_s1 + $0x28] sm:$0xff]  ;;  %vm222_vm2 = vsmask.f32 1280 }
   0xd   : > { %v768_v2 = vld [vmem:[%s958_s1 + $0x18] sm:$0xff]  ;;  %332 = vmatpush.bf16.msra.mxu0 %v772_v1  ;;  %v767_v6 = vld [vmem:[%s958_s1 + $0x10] sm:$0xff]  ;;  %v766_v10 = vld [vmem:[%s958_s1 + $0x8] sm:$0xff]  ;;  %vm223_vm3 = vsmask.f32 3336  ;;  %vm325_vm9 = vcmask 523264  }
   0xe   : > { %v780_v5 = vld [vmem:[%s958_s1 + $0x78] sm:$0xff]  ;;  %384 = vmatpush.bf16.msra.mxu1 %v768_v2  ;;  %v779_v7 = vld [vmem:[%s958_s1 + $0x70] sm:$0xff]  ;;  %s868_s10 = scalar_lea.vmem %s957_s0, %s786_s30  ;;  %v773_v17 = vld [vmem:[%s958_s1 + $0x40] sm:$0xff]  ;;  %vm225_vm4 = vsmask.f32 5392  ;;  %s764_s27 = sshll.u32 %s964_s13, 3 }
   0xf   : > { %599 = vmatpush.bf16.msra.mxu3 %v780_v5  ;;  %v184_v11 = vld [vmem:[%s868_s10] sm:$0x7]  ;;  %v185_v12 = vld [vmem:[%s868_s10 + $0x4] sm:$0x7]  ;;  %v186_v13 = vld [vmem:[%s868_s10 + $0x8] sm:$0x7]  ;;  %s170_s30 = scalar_lea.vmem %s960_s3, %s764_s27 }
  0x10   : > { %450 = vmatpush.bf16.msra.mxu2 %v775_v3  ;;  %v187_v14 = vld [vmem:[%s868_s10 + $0xc] sm:$0x7]  ;;  %v192_v15 = vrot.slane %v184_v11, 2  ;;  %v193_v16 = vrot.slane %v185_v12, 2  ;;  %v769_v18 = vld [vmem:[%s958_s1 + $0x20] sm:$0xff]  ;;  %v194_v19 = vrot.slane %v186_v13, 2  ;;  %vm224_vm5 = vmor %vm222_vm2, %vm223_vm3 }
  0x11   : > { %333 = vmatpush.bf16.msra.mxu0 %v771_v4  ;;  %v195_v20 = vrot.slane %v187_v14, 2  ;;  %v765_v21 = vld [vmem:[%s958_s1] sm:$0xff]  ;;  %vm226_vm6 = vmor %vm224_vm5, %vm225_vm4  ;;  %vm227_vm7 = vsmask.f32 7448 }
  0x12   : > { %385 = vmatpush.bf16.msra.mxu1 %v767_v6  ;;  %v199_v22 = vsel %vm196_vm0, %v184_v11, %v192_v15  ;;  %v201_v23 = vsel %vm200_vm1, %v184_v11, %v192_v15  ;;  %v206_v24 = vsel %vm196_vm0, %v185_v12, %v193_v16  ;;  %v207_v25 = vsel %vm200_vm1, %v185_v12, %v193_v16  ;;  %vm897_vm8 = vmor %vm226_vm6, %vm227_vm7  ;;  %v777_v11 = vld [vmem:[%s958_s1 + $0x60] sm:$0xff]  ;;  %v744_v12 = vld [vmem:[%s868_s10 + $0x10] sm:$0x7] }
  0x13   : > { %600 = vmatpush.bf16.msra.mxu3 %v779_v7  ;;  %v203_v26 = vrot.slane %v201_v23, 2  ;;  %v209_v27 = vrot.slane %v207_v25, 2  ;;  %v212_v28 = vsel %vm196_vm0, %v186_v13, %v194_v19  ;;  %v213_v29 = vsel %vm200_vm1, %v186_v13, %v194_v19  ;;  %v741_v7 = vld [vmem:[%s868_s10 + $0x4] sm:$0x7] }
  0x14   : > { %451 = vmatpush.bf16.msra.mxu2 %v774_v8  ;;  %v215_v30 = vrot.slane %v213_v29, 2  ;;  %v218_v31 = vsel %vm196_vm0, %v187_v14, %v195_v20  ;;  %v219_v32 = vsel %vm200_vm1, %v187_v14, %v195_v20  ;;  %v229_v33 = vshrl.u32 %v199_v22, 16  ;;  %v778_v8 = vld [vmem:[%s958_s1 + $0x68] sm:$0xff]  ;;  %v172_v14 = vld [vmem:[%s868_s10] sm:$0x3] }
  0x15   : > { %334 = vmatpush.bf16.msra.mxu0 %v770_v9  ;;  %v221_v34 = vrot.slane %v219_v32, 2  ;;  %v232_v35 = vshll.u32 %v199_v22, 16  ;;  %v238_v36 = vshll.u32 %v203_v26, 16  ;;  %v242_v37 = vshrl.u32 %v206_v24, 16  ;;  %v742_v9 = vld [vmem:[%s868_s10 + $0x8] sm:$0x7] }
  0x16   : > { %386 = vmatpush.bf16.msra.mxu1 %v766_v10  ;;  %v231_v38 = vrot.slane %v229_v33, 6  ;;  %v245_v39 = vshll.u32 %v206_v24, 16  ;;  %v251_v40 = vshll.u32 %v209_v27, 16  ;;  %v255_v41 = vshrl.u32 %v212_v28, 16  ;;  %v743_v10 = vld [vmem:[%s868_s10 + $0xc] sm:$0x7] }
  0x17   : > { %v234_v42 = vrot.slane %v232_v35, 7  ;;  %v244_v43 = vrot.slane %v242_v37, 6  ;;  %v258_v44 = vshll.u32 %v212_v28, 16  ;;  %v240_v45 = vrot.slane %v238_v36, 7  ;;  %601 = vmatpush.bf16.msra.mxu3 %v778_v8  ;;  %v173_v16 = vld [vmem:[%s868_s10 + $0x4] sm:$0x3] }
  0x18   : > { %452 = vmatpush.bf16.msra.mxu2 %v773_v17  ;;  %v247_v46 = vrot.slane %v245_v39, 7  ;;  %v257_v47 = vrot.slane %v255_v41, 6  ;;  %v264_v48 = vshll.u32 %v215_v30, 16  ;;  %v268_v51 = vshrl.u32 %v218_v31, 16  ;;  %v720_v37 = vld [vmem:[%s868_s10 + $0x4] sm:$0x3] }
  0x19   : > { %335 = vmatpush.bf16.msra.mxu0 %v769_v18  ;;  %v235_v49 = vor.u32 %v234_v42, %v231_v38  ;;  %v260_v50 = vrot.slane %v258_v44, 7  ;;  %v271_v52 = vshll.u32 %v218_v31, 16  ;;  %v253_v55 = vrot.slane %v251_v40, 7  ;;  %v174_v18 = vld [vmem:[%s868_s10 + $0x8] sm:$0x3] }
  0x1a   : > { %387 = vmatpush.bf16.msra.mxu1 %v765_v21  ;;  %v248_v54 = vor.u32 %v247_v46, %v244_v43  ;;  %v266_v56 = vrot.slane %v264_v48, 7  ;;  %v277_v57 = vshll.u32 %v221_v34, 16  ;;  %v270_v60 = vrot.slane %v268_v51, 6  ;;  %v175_v21 = vld [vmem:[%s868_s10 + $0xc] sm:$0x3] }
  0x1b   : > { %v236_v58 = vrot.slane %v235_v49, 2  ;;  %v261_v59 = vor.u32 %v260_v50, %v257_v47  ;;  %v273_v61 = vrot.slane %v271_v52, 7  ;;  %v469_v13 = vrot.slane %v741_v7, 2  ;;  %602 = vmatpush.bf16.msra.mxu3 %v777_v11  ;;  %v721_v42 = vld [vmem:[%s868_s10 + $0x8] sm:$0x3] }
  0x1c   : > { %v249_v62 = vrot.slane %v248_v54, 2  ;;  %v279_v2 = vrot.slane %v277_v57, 7  ;;  %v470_v15 = vrot.slane %v742_v9, 2  ;;  %v471_v17 = vrot.slane %v743_v10, 2  ;;  %v722_v46 = vld [vmem:[%s868_s10 + $0xc] sm:$0x3] }
  0x1d   : > { %v241_v63 = vsel %vm897_vm8, %v236_v58, %v240_v45  ;;  %v262_v0 = vrot.slane %v261_v59, 2  ;;  %v274_v1 = vor.u32 %v273_v61, %v270_v60  ;;  %v472_v20 = vrot.slane %v744_v12, 2 }
  0x1e   : > { %v254_v3 = vsel %vm897_vm8, %v249_v62, %v253_v55  ;;  %290 = vst [vmem:[#allocation1] ss:$4 sm:$0xff] %v241_v63  ;;  %v475_v22 = vsel %vm196_vm0, %v741_v7, %v469_v13  ;;  %v481_v23 = vsel %vm196_vm0, %v742_v9, %v470_v15  ;;  %v487_v24 = vsel %vm196_vm0, %v743_v10, %v471_v17  ;;  %v723_v55 = vld [vmem:[%s868_s10 + $0x10] sm:$0x3] }
  0x1f   : > { %v267_v4 = vsel %vm897_vm8, %v262_v0, %v266_v56  ;;  %v275_v5 = vrot.slane %v274_v1, 2  ;;  %293 = vst [vmem:[#allocation1 + $0x1] ss:$4 sm:$0xff] %v254_v3  ;;  %v493_v25 = vsel %vm196_vm0, %v744_v12, %v472_v20  ;;  %v497_v26 = vshrl.u32 %v475_v22, 16 }
  0x20   : > { %296 = vst [vmem:[#allocation1 + $0x2] ss:$4 sm:$0xff] %v267_v4  ;;  %v500_v27 = vshll.u32 %v475_v22, 16  ;;  %v476_v28 = vsel %vm200_vm1, %v741_v7, %v469_v13  ;;  %v510_v29 = vshrl.u32 %v481_v23, 16  ;;  %v513_v30 = vshll.u32 %v481_v23, 16 }
  0x21   : > { %v280_v6 = vsel %vm897_vm8, %v275_v5, %v279_v2  ;;  %v482_v31 = vsel %vm200_vm1, %v742_v9, %v470_v15  ;;  %v523_v32 = vshrl.u32 %v487_v24, 16  ;;  %v526_v33 = vshll.u32 %v487_v24, 16  ;;  %v795_v24 = vld [vmem:[%s959_s2] ss:$0 sm:$0xff] }
  0x22   : > { %299 = vst [vmem:[#allocation1 + $0x3] ss:$4 sm:$0xff] %v280_v6  ;;  %v488_v34 = vsel %vm200_vm1, %v743_v10, %v471_v17  ;;  %v536_v35 = vshrl.u32 %v493_v25, 16  ;;  %v539_v36 = vshll.u32 %v493_v25, 16  ;;  %v478_v38 = vrot.slane %v476_v28, 2 }
  0x23   : > { %v494_v39 = vsel %vm200_vm1, %v744_v12, %v472_v20  ;;  %v499_v40 = vrot.slane %v497_v26, 6  ;;  %v502_v41 = vrot.slane %v500_v27, 7  ;;  %v484_v43 = vrot.slane %v482_v31, 2 }
  0x24   : > { %v512_v44 = vrot.slane %v510_v29, 6  ;;  %v515_v45 = vrot.slane %v513_v30, 7  ;;  %v490_v47 = vrot.slane %v488_v34, 2  ;;  %v525_v48 = vrot.slane %v523_v32, 6 }
  0x25   : > { %v528_v49 = vrot.slane %v526_v33, 7  ;;  %v496_v51 = vrot.slane %v494_v39, 2  ;;  %v538_v52 = vrot.slane %v536_v35, 6  ;;  %v541_v54 = vrot.slane %v539_v36, 7 }
  0x26   : > { %v503_v56 = vor.u32 %v502_v41, %v499_v40  ;;  %v506_v57 = vshll.u32 %v478_v38, 16  ;;  %v516_v58 = vor.u32 %v515_v45, %v512_v44  ;;  %v519_v59 = vshll.u32 %v484_v43, 16 }
  0x27   : > { %v529_v60 = vor.u32 %v528_v49, %v525_v48  ;;  %v532_v61 = vshll.u32 %v490_v47, 16  ;;  %v542_v62 = vor.u32 %v541_v54, %v538_v52  ;;  %v545_v63 = vshll.u32 %v496_v51, 16 }
  0x28   : > { %v504_v0 = vrot.slane %v503_v56, 2  ;;  %v508_v1 = vrot.slane %v506_v57, 7  ;;  %v517_v2 = vrot.slane %v516_v58, 2  ;;  %v521_v3 = vrot.slane %v519_v59, 7 }
  0x29   : > { %v300_v19 = vld.sshfl [vmem:[#allocation1] sm:$0xff pattern:$0x73625140]  ;;  %v530_v4 = vrot.slane %v529_v60, 2  ;;  %v534_v5 = vrot.slane %v532_v61, 7  ;;  %v543_v6 = vrot.slane %v542_v62, 2 }
  0x2a   : > { %343 = vst [vmem:[#allocation1] ss:$4 sm:$0xff] %v172_v14  ;;  %702 = vmatmul.msk.bf16.vlgmr.msra.gmra.mxu0 %vm325_vm9, %v300_v19  ;;  %v547_v7 = vrot.slane %v545_v63, 7  ;;  %v509_v8 = vsel %vm897_vm8, %v504_v0, %v508_v1  ;;  %v522_v9 = vsel %vm897_vm8, %v517_v2, %v521_v3 }
  0x2b   : > { %346 = vst [vmem:[#allocation1 + $0x1] ss:$4 sm:$0xff] %v173_v16  ;;  %v535_v11 = vsel %vm897_vm8, %v530_v4, %v534_v5 }
  0x2c   : > { %349 = vst [vmem:[#allocation1 + $0x2] ss:$4 sm:$0xff] %v174_v18  ;;  %v548_v12 = vsel %vm897_vm8, %v543_v6, %v547_v7 }
  0x2d   : > { %352 = vst [vmem:[#allocation1 + $0x3] ss:$4 sm:$0xff] %v175_v21 }
  0x34   : > { %v353_v50 = vld.sshfl [vmem:[#allocation1] sm:$0xff pattern:$0x73625140] }
  0x35   : > { %408 = vst [vmem:[#allocation1] ss:$4 sm:$0xff] %v720_v37  ;;  %719 = vmatmul.msk.bf16.vlgmr.msra.gmra.mxu1 %vm325_vm9, %v353_v50 }
  0x36   : > { %411 = vst [vmem:[#allocation1 + $0x1] ss:$4 sm:$0xff] %v721_v42 }
  0x37   : > { %414 = vst [vmem:[#allocation1 + $0x2] ss:$4 sm:$0xff] %v722_v46 }
  0x38   : > { %417 = vst [vmem:[#allocation1 + $0x3] ss:$4 sm:$0xff] %v723_v55 }
  0x3f   : > { %v418_v10 = vld.sshfl [vmem:[#allocation1] sm:$0xff pattern:$0x73625140] }
  0x40   : > { %740 = vmatmul.msk.bf16.vlgmr.msra.gmra.mxu2 %vm325_vm9, %v418_v10  ;;  %558 = vst [vmem:[#allocation1] ss:$4 sm:$0xff] %v509_v8 }
  0x41   : > { %561 = vst [vmem:[#allocation1 + $0x1] ss:$4 sm:$0xff] %v522_v9 }
  0x42   : > { %564 = vst [vmem:[#allocation1 + $0x2] ss:$4 sm:$0xff] %v535_v11 }
  0x43   : > { %567 = vst [vmem:[#allocation1 + $0x3] ss:$4 sm:$0xff] %v548_v12 }
  0x4a   : > { %v568_v13 = vld.sshfl [vmem:[#allocation1] sm:$0xff pattern:$0x73625140] }
  0x4b   : > { %761 = vmatmul.msk.bf16.vlgmr.msra.gmra.mxu3 %vm325_vm9, %v568_v13 }
  0xa7   : > { %v337_v14 = vpop.f32.mrf.mxu0 }
  0xaf   : > { %v339_v20 = vpop.f32.mrf.mxu0 }
  0xb2   : > { %v389_v15 = vpop.f32.mrf.mxu1 }
  0xb3   : > { %v390_v17 = vadd.f32 %v389_v15, %v337_v14 }
  0xba   : > { %v391_v21 = vpop.f32.mrf.mxu1 }
  0xbb   : > { %v392_v23 = vadd.f32 %v391_v21, %v339_v20 }
  0xc3   : > { %v454_v16 = vpop.f32.mrf.mxu2 }
  0xc4   : > { %v459_v19 = vadd.f32 %v454_v16, %v390_v17 }
  0xcb   : > { %v456_v22 = vpop.f32.mrf.mxu2 }
  0xcc   : > { %v460_v25 = vadd.f32 %v456_v22, %v392_v23 }
  0xce   : > { %v604_v18 = vpop.f32.mrf.mxu3 }
  0xcf   : > { %v609_v53 = vadd.f32 %v604_v18, %v459_v19 }
  0xd1   : > { %v615_v27 = vadd.f32 %v795_v24, %v609_v53 }
  0xd3   : > { %v617_v30 = vmax.f32 %v615_v27, 0.0 }
  0xd6   : > { %v606_v26 = vpop.f32.mrf.mxu3 }
  0xd7   : > { %v610_v28 = vadd.f32 %v606_v26, %v460_v25 }
  0xd9   : > { %v616_v29 = vadd.f32 %v795_v24, %v610_v28 }
  0xdb   : > { %v618_v31 = vmax.f32 %v616_v29, 0.0 }
  0xdd   : > { %v784_v32 = vpack.c.bf16 %v618_v31, %v617_v30 }
  0xdf   : > { %785 = vst [vmem:[%s170_s30] sm:$0xff] %v784_v32  }
  0xe0 PF: > { %s13_s12 = sadd.s32 1, %s802_s12  }
  0xe1   : > { %p10_p4 = scmp.ge.s32.totalorder %s13_s12, 4  }
  0xe3   :  { %12 = sbr.rel (!%p10_p4) target bundleno = 1 (0x1), region = 75 }

// kernel: concept_vae_forward.7
= control target key start
LH: loop header
LB: loop body
LE: loop exit
PB: predicated region body
PF: predicated region fallthrough
CT: control target
= control target key end

     0   :  { %21 = vsyncpa [#allocation3], 0  ;;  %s4550_s21 = smov [#allocation2]   ;;  %s4551_s23 = smov 128   ;;  %s5176_s0 = inlined_call_operand.vmem [shape: bf16[2,2048], index: 0, kind: input, shape index: {}]   ;;  %s5177_s1 = inlined_call_operand.hbm [shape: bf16[2048,256], index: 1, kind: input, shape index: {}]   ;;  %s5178_s2 = inlined_call_operand.vmem [shape: f32[1,256], index: 2, kind: input, shape index: {}]   ;;  %s5179_s3 = inlined_call_operand.vmem [shape: f32[2,128], index: 3, kind: input, shape index: {}]   ;;  %s5180_s4 = inlined_call_operand.vmem [shape: bf16[128,1024], index: 4, kind: input, shape index: {}]   ;;  %s5181_s5 = inlined_call_operand.vmem [shape: f32[1,1024], index: 5, kind: input, shape index: {}]   ;;  %s5182_s6 = inlined_call_operand.vmem [shape: bf16[128,64], index: 6, kind: input, shape index: {}]   ;;  %s5183_s7 = inlined_call_operand.vmem [shape: f32[1,64], index: 7, kind: input, shape index: {}]   ;;  %s5184_s8 = inlined_call_operand.vmem [shape: bf16[64,64], index: 8, kind: input, shape index: {}]   ;;  %s5185_s9 = inlined_call_operand.vmem [shape: f32[1,64], index: 9, kind: input, shape index: {}]   ;;  %s5186_s10 = inlined_call_operand.vmem [shape: bf16[64,14], index: 10, kind: input, shape index: {}]   ;;  %s5187_s11 = inlined_call_operand.vmem [shape: f32[1,14], index: 11, kind: input, shape index: {}]   ;;  %s5188_s12 = inlined_call_operand.vmem [shape: f32[2,256], index: 12, kind: output, shape index: {0}]   ;;  %s5189_s13 = inlined_call_operand.vmem [shape: bf16[2,1024], index: 13, kind: output, shape index: {1}]   ;;  %s5190_s14 = inlined_call_operand.vmem [shape: f32[2,64], index: 14, kind: output, shape index: {2}]   ;;  %s5191_s15 = inlined_call_operand.vmem [shape: f32[2,14], index: 15, kind: output, shape index: {3}]  }
   0x1   :  { %s28_s20 = sshll.u32 %s5177_s1, 4  ;;  %s30_s22 = sshll.u32 %s4550_s21, 4  ;;  %s29_s20 = int_to_ptr.hbm [resolvable:$true] %s28_s20  ;;  %s31_s22 = int_to_ptr.vmem [resolvable:$true] %s30_s22 }
   0x2   :  { %s4552_s24 = smov 8  }
   0x3   :  { %36 = dma.hbm_to_vmem [thread:$0]  %s29_s20, 32768, %s31_s22, [#allocation3], %s4551_s23, %s4551_s23, %s4552_s24  }
   0x4   :  { %4548 = dma.done.wait [#allocation3], 32768  }
   0x5   :  { %4549 = vsyncadd [#allocation3], 4294934528  ;;  %v2884_v0 = vld [vmem:[#allocation2 + $0x70] sm:$0xf]  ;;  %v4187_v1 = vld [vmem:[#allocation2 + $0x74] sm:$0xf0] }
   0x6   :  { %v2948_v2 = vld [vmem:[#allocation2 + $0xf0] sm:$0xf]  ;;  %v2885_v3 = vor.u32 %v4187_v1, %v2884_v0  ;;  %v4203_v4 = vld [vmem:[#allocation2 + $0xf4] sm:$0xf0]  ;;  %v2876_v11 = vld [vmem:[#allocation2 + $0x60] sm:$0xf] }
   0x7   :  { %v3012_v5 = vld [vmem:[#allocation2 + $0x170] sm:$0xf]  ;;  %v4219_v6 = vld [vmem:[#allocation2 + $0x174] sm:$0xf0]  ;;  %v2949_v7 = vor.u32 %v4203_v4, %v2948_v2  ;;  %v4185_v13 = vld [vmem:[#allocation2 + $0x64] sm:$0xf0] }
   0x8   :  { %v3013_v8 = vor.u32 %v4219_v6, %v3012_v5  ;;  %v3076_v9 = vld [vmem:[#allocation2 + $0x1f0] sm:$0xf]  ;;  %v4235_v10 = vld [vmem:[#allocation2 + $0x1f4] sm:$0xf0]  ;;  %1642 = vmatpush.bf16.msra.mxu0 %v2885_v3  ;;  %v2940_v14 = vld [vmem:[#allocation2 + $0xe0] sm:$0xf]  ;;  %v2877_v16 = vor.u32 %v4185_v13, %v2876_v11 }
   0x9   :  { %v3077_v12 = vor.u32 %v4235_v10, %v3076_v9  ;;  %v4201_v15 = vld [vmem:[#allocation2 + $0xe4] sm:$0xf0]  ;;  %1655 = vmatpush.bf16.msra.mxu1 %v2949_v7  ;;  %v3004_v18 = vld [vmem:[#allocation2 + $0x160] sm:$0xf]  ;;  %v2868_v23 = vld [vmem:[#allocation2 + $0x50] sm:$0xf] }
   0xa   :  { %1668 = vmatpush.bf16.msra.mxu2 %v3013_v8  ;;  %v2941_v17 = vor.u32 %v4201_v15, %v2940_v14  ;;  %v4217_v19 = vld [vmem:[#allocation2 + $0x164] sm:$0xf0]  ;;  %v3068_v20 = vld [vmem:[#allocation2 + $0x1e0] sm:$0xf]  ;;  %v4183_v24 = vld [vmem:[#allocation2 + $0x54] sm:$0xf0] }
   0xb   :  { %1681 = vmatpush.bf16.msra.mxu3 %v3077_v12  ;;  %v3005_v21 = vor.u32 %v4217_v19, %v3004_v18  ;;  %v4233_v22 = vld [vmem:[#allocation2 + $0x1e4] sm:$0xf0]  ;;  %v2932_v26 = vld [vmem:[#allocation2 + $0xd0] sm:$0xf]  ;;  %v4199_v27 = vld [vmem:[#allocation2 + $0xd4] sm:$0xf0]  ;;  %v2869_v29 = vor.u32 %v4183_v24, %v2868_v23 }
   0xc   :  { %v3069_v25 = vor.u32 %v4233_v22, %v3068_v20  ;;  %v2996_v28 = vld [vmem:[#allocation2 + $0x150] sm:$0xf]  ;;  %1643 = vmatpush.bf16.msra.mxu0 %v2877_v16  ;;  %v4215_v30 = vld [vmem:[#allocation2 + $0x154] sm:$0xf0]  ;;  %v2933_v33 = vor.u32 %v4199_v27, %v2932_v26  ;;  %v2860_v35 = vld [vmem:[#allocation2 + $0x40] sm:$0xf] }
   0xd   :  { %v3060_v31 = vld [vmem:[#allocation2 + $0x1d0] sm:$0xf]  ;;  %v4231_v32 = vld [vmem:[#allocation2 + $0x1d4] sm:$0xf0]  ;;  %1656 = vmatpush.bf16.msra.mxu1 %v2941_v17  ;;  %v2997_v34 = vor.u32 %v4215_v30, %v2996_v28  ;;  %v4181_v36 = vld [vmem:[#allocation2 + $0x44] sm:$0xf0] }
   0xe   :  { %1669 = vmatpush.bf16.msra.mxu2 %v3005_v21  ;;  %v2924_v37 = vld [vmem:[#allocation2 + $0xc0] sm:$0xf]  ;;  %v3061_v38 = vor.u32 %v4231_v32, %v3060_v31  ;;  %v4197_v39 = vld [vmem:[#allocation2 + $0xc4] sm:$0xf0]  ;;  %v2861_v44 = vor.u32 %v4181_v36, %v2860_v35  ;;  %v2852_v47 = vld [vmem:[#allocation2 + $0x30] sm:$0xf] }
   0xf   :  { %1682 = vmatpush.bf16.msra.mxu3 %v3069_v25  ;;  %v2988_v40 = vld [vmem:[#allocation2 + $0x140] sm:$0xf]  ;;  %v4213_v41 = vld [vmem:[#allocation2 + $0x144] sm:$0xf0]  ;;  %v2925_v45 = vor.u32 %v4197_v39, %v2924_v37  ;;  %v4179_v48 = vld [vmem:[#allocation2 + $0x34] sm:$0xf0] }
  0x10   :  { %v3052_v42 = vld [vmem:[#allocation2 + $0x1c0] sm:$0xf]  ;;  %v4229_v43 = vld [vmem:[#allocation2 + $0x1c4] sm:$0xf0]  ;;  %1644 = vmatpush.bf16.msra.mxu0 %v2869_v29  ;;  %v2989_v46 = vor.u32 %v4213_v41, %v2988_v40  ;;  %v2916_v49 = vld [vmem:[#allocation2 + $0xb0] sm:$0xf]  ;;  %v2853_v56 = vor.u32 %v4179_v48, %v2852_v47 }
  0x11   :  { %1657 = vmatpush.bf16.msra.mxu1 %v2933_v33  ;;  %v3053_v50 = vor.u32 %v4229_v43, %v3052_v42  ;;  %v4195_v51 = vld [vmem:[#allocation2 + $0xb4] sm:$0xf0]  ;;  %v2980_v52 = vld [vmem:[#allocation2 + $0x130] sm:$0xf]  ;;  %v2844_v59 = vld [vmem:[#allocation2 + $0x20] sm:$0xf] }
  0x12   :  { %1670 = vmatpush.bf16.msra.mxu2 %v2997_v34  ;;  %v4211_v53 = vld [vmem:[#allocation2 + $0x134] sm:$0xf0]  ;;  %v3044_v54 = vld [vmem:[#allocation2 + $0x1b0] sm:$0xf]  ;;  %v2917_v57 = vor.u32 %v4195_v51, %v2916_v49  ;;  %v4177_v60 = vld [vmem:[#allocation2 + $0x24] sm:$0xf0] }
  0x13   :  { %1683 = vmatpush.bf16.msra.mxu3 %v3061_v38  ;;  %v4227_v55 = vld [vmem:[#allocation2 + $0x1b4] sm:$0xf0]  ;;  %v2981_v58 = vor.u32 %v4211_v53, %v2980_v52  ;;  %v2908_v61 = vld [vmem:[#allocation2 + $0xa0] sm:$0xf]  ;;  %v4193_v63 = vld [vmem:[#allocation2 + $0xa4] sm:$0xf0]  ;;  %v2845_v4 = vor.u32 %v4177_v60, %v2844_v59 }
  0x14   :  { %1645 = vmatpush.bf16.msra.mxu0 %v2861_v44  ;;  %v3045_v62 = vor.u32 %v4227_v55, %v3044_v54  ;;  %v2972_v0 = vld [vmem:[#allocation2 + $0x120] sm:$0xf]  ;;  %v4209_v1 = vld [vmem:[#allocation2 + $0x124] sm:$0xf0]  ;;  %v2909_v5 = vor.u32 %v4193_v63, %v2908_v61  ;;  %v2836_v7 = vld [vmem:[#allocation2 + $0x10] sm:$0xf] }
  0x15   :  { %1658 = vmatpush.bf16.msra.mxu1 %v2925_v45  ;;  %v3036_v2 = vld [vmem:[#allocation2 + $0x1a0] sm:$0xf]  ;;  %v4225_v3 = vld [vmem:[#allocation2 + $0x1a4] sm:$0xf0]  ;;  %v2973_v6 = vor.u32 %v4209_v1, %v2972_v0  ;;  %v4175_v8 = vld [vmem:[#allocation2 + $0x14] sm:$0xf0] }
  0x16   :  { %1671 = vmatpush.bf16.msra.mxu2 %v2989_v46  ;;  %v2900_v9 = vld [vmem:[#allocation2 + $0x90] sm:$0xf]  ;;  %v3037_v10 = vor.u32 %v4225_v3, %v3036_v2  ;;  %v4191_v11 = vld [vmem:[#allocation2 + $0x94] sm:$0xf0]  ;;  %v2837_v16 = vor.u32 %v4175_v8, %v2836_v7  ;;  %v2828_v17 = vld [vmem:[#allocation2] sm:$0xf] }
  0x17   :  { %1684 = vmatpush.bf16.msra.mxu3 %v3053_v50  ;;  %v2964_v12 = vld [vmem:[#allocation2 + $0x110] sm:$0xf]  ;;  %v4207_v13 = vld [vmem:[#allocation2 + $0x114] sm:$0xf0]  ;;  %v4173_v18 = vld [vmem:[#allocation2 + $0x4] sm:$0xf0]  ;;  %v2901_v19 = vor.u32 %v4191_v11, %v2900_v9 }
  0x18   :  { %1646 = vmatpush.bf16.msra.mxu0 %v2853_v56  ;;  %v3028_v14 = vld [vmem:[#allocation2 + $0x190] sm:$0xf]  ;;  %v4223_v15 = vld [vmem:[#allocation2 + $0x194] sm:$0xf0]  ;;  %v2965_v20 = vor.u32 %v4207_v13, %v2964_v12  ;;  %v2892_v21 = vld [vmem:[#allocation2 + $0x80] sm:$0xf]  ;;  %v2829_v31 = vor.u32 %v4173_v18, %v2828_v17 }
  0x19   :  { %1659 = vmatpush.bf16.msra.mxu1 %v2917_v57  ;;  %v4189_v22 = vld [vmem:[#allocation2 + $0x84] sm:$0xf0]  ;;  %v2956_v23 = vld [vmem:[#allocation2 + $0x100] sm:$0xf]  ;;  %v3029_v24 = vor.u32 %v4223_v15, %v3028_v14  ;;  %v3140_v28 = vld [vmem:[#allocation2 + $0x270] sm:$0xf] }
  0x1a   :  { %1672 = vmatpush.bf16.msra.mxu2 %v2981_v58  ;;  %v4205_v25 = vld [vmem:[#allocation2 + $0x104] sm:$0xf0]  ;;  %v3020_v26 = vld [vmem:[#allocation2 + $0x180] sm:$0xf]  ;;  %v4251_v29 = vld [vmem:[#allocation2 + $0x274] sm:$0xf0]  ;;  %v2893_v35 = vor.u32 %v4189_v22, %v2892_v21 }
  0x1b   :  { %1685 = vmatpush.bf16.msra.mxu3 %v3045_v62  ;;  %v4221_v27 = vld [vmem:[#allocation2 + $0x184] sm:$0xf0]  ;;  %v3204_v30 = vld [vmem:[#allocation2 + $0x2f0] sm:$0xf]  ;;  %v4267_v32 = vld [vmem:[#allocation2 + $0x2f4] sm:$0xf0]  ;;  %v2957_v36 = vor.u32 %v4205_v25, %v2956_v23  ;;  %v3141_v40 = vor.u32 %v4251_v29, %v3140_v28 }
  0x1c   :  { %1647 = vmatpush.bf16.msra.mxu0 %v2845_v4  ;;  %v3268_v33 = vld [vmem:[#allocation2 + $0x370] sm:$0xf]  ;;  %v4283_v34 = vld [vmem:[#allocation2 + $0x374] sm:$0xf0]  ;;  %v3021_v39 = vor.u32 %v4221_v27, %v3020_v26  ;;  %v3205_v41 = vor.u32 %v4267_v32, %v3204_v30  ;;  %v3132_v43 = vld [vmem:[#allocation2 + $0x260] sm:$0xf] }
  0x1d   :  { %1660 = vmatpush.bf16.msra.mxu1 %v2909_v5  ;;  %v3332_v37 = vld [vmem:[#allocation2 + $0x3f0] sm:$0xf]  ;;  %v4299_v38 = vld [vmem:[#allocation2 + $0x3f4] sm:$0xf0]  ;;  %v3269_v42 = vor.u32 %v4283_v34, %v3268_v33  ;;  %v4249_v44 = vld [vmem:[#allocation2 + $0x264] sm:$0xf0] }
  0x1e   :  { %1673 = vmatpush.bf16.msra.mxu2 %v2973_v6  ;;  %v3196_v45 = vld [vmem:[#allocation2 + $0x2e0] sm:$0xf]  ;;  %v3333_v46 = vor.u32 %v4299_v38, %v3332_v37  ;;  %v4265_v47 = vld [vmem:[#allocation2 + $0x2e4] sm:$0xf0]  ;;  %v3133_v52 = vor.u32 %v4249_v44, %v3132_v43  ;;  %v3124_v55 = vld [vmem:[#allocation2 + $0x250] sm:$0xf] }
  0x1f   :  { %1686 = vmatpush.bf16.msra.mxu3 %v3037_v10  ;;  %v3260_v48 = vld [vmem:[#allocation2 + $0x360] sm:$0xf]  ;;  %v4281_v49 = vld [vmem:[#allocation2 + $0x364] sm:$0xf0]  ;;  %v3197_v53 = vor.u32 %v4265_v47, %v3196_v45  ;;  %v4247_v56 = vld [vmem:[#allocation2 + $0x254] sm:$0xf0] }
  0x20   :  { %1648 = vmatpush.bf16.msra.mxu0 %v2837_v16  ;;  %v3324_v50 = vld [vmem:[#allocation2 + $0x3e0] sm:$0xf]  ;;  %v4297_v51 = vld [vmem:[#allocation2 + $0x3e4] sm:$0xf0]  ;;  %v3261_v54 = vor.u32 %v4281_v49, %v3260_v48  ;;  %v3188_v57 = vld [vmem:[#allocation2 + $0x2d0] sm:$0xf]  ;;  %v3125_v0 = vor.u32 %v4247_v56, %v3124_v55 }
  0x21   :  { %1661 = vmatpush.bf16.msra.mxu1 %v2901_v19  ;;  %v3325_v58 = vor.u32 %v4297_v51, %v3324_v50  ;;  %v4263_v59 = vld [vmem:[#allocation2 + $0x2d4] sm:$0xf0]  ;;  %v3252_v60 = vld [vmem:[#allocation2 + $0x350] sm:$0xf]  ;;  %v3116_v1 = vld [vmem:[#allocation2 + $0x240] sm:$0xf] }
  0x22   :  { %1674 = vmatpush.bf16.msra.mxu2 %v2965_v20  ;;  %v4279_v61 = vld [vmem:[#allocation2 + $0x354] sm:$0xf0]  ;;  %v3316_v62 = vld [vmem:[#allocation2 + $0x3d0] sm:$0xf]  ;;  %v3189_v3 = vor.u32 %v4263_v59, %v3188_v57  ;;  %v4245_v5 = vld [vmem:[#allocation2 + $0x244] sm:$0xf0] }
  0x23   :  { %1687 = vmatpush.bf16.msra.mxu3 %v3029_v24  ;;  %v4295_v63 = vld [vmem:[#allocation2 + $0x3d4] sm:$0xf0]  ;;  %v3253_v4 = vor.u32 %v4279_v61, %v3252_v60  ;;  %v3180_v6 = vld [vmem:[#allocation2 + $0x2c0] sm:$0xf]  ;;  %v4261_v8 = vld [vmem:[#allocation2 + $0x2c4] sm:$0xf0]  ;;  %v3117_v13 = vor.u32 %v4245_v5, %v3116_v1 }
  0x24   :  { %1649 = vmatpush.bf16.msra.mxu0 %v2829_v31  ;;  %v62_v2 = vld [vmem:[%s5176_s0] sm:$0xff]  ;;  %v3317_v7 = vor.u32 %v4295_v63, %v3316_v62  ;;  %v3244_v9 = vld [vmem:[#allocation2 + $0x340] sm:$0xf]  ;;  %v4277_v10 = vld [vmem:[#allocation2 + $0x344] sm:$0xf0]  ;;  %v3181_v14 = vor.u32 %v4261_v8, %v3180_v6  ;;  %vm2061_vm0 = vcmask 1041408  }
  0x25   :  { %1662 = vmatpush.bf16.msra.mxu1 %v2893_v35  ;;  %327 = vst [vmem:[#allocation1] ss:$9 sm:$0xff] %v62_v2  ;;  %v3308_v11 = vld [vmem:[#allocation2 + $0x3c0] sm:$0xf]  ;;  %v4293_v12 = vld [vmem:[#allocation2 + $0x3c4] sm:$0xf0]  ;;  %v3245_v15 = vor.u32 %v4277_v10, %v3244_v9 }
  0x26   :  { %1675 = vmatpush.bf16.msra.mxu2 %v2957_v36  ;;  %v3108_v16 = vld [vmem:[#allocation2 + $0x230] sm:$0xf]  ;;  %v4243_v17 = vld [vmem:[#allocation2 + $0x234] sm:$0xf0]  ;;  %v3309_v19 = vor.u32 %v4293_v12, %v3308_v11  ;;  %v3100_v25 = vld [vmem:[#allocation2 + $0x220] sm:$0xf] }
  0x27   :  { %1688 = vmatpush.bf16.msra.mxu3 %v3021_v39  ;;  %v3172_v18 = vld [vmem:[#allocation2 + $0x2b0] sm:$0xf]  ;;  %v4259_v20 = vld [vmem:[#allocation2 + $0x2b4] sm:$0xf0]  ;;  %v3109_v26 = vor.u32 %v4243_v17, %v3108_v16  ;;  %v4241_v32 = vld [vmem:[#allocation2 + $0x224] sm:$0xf0] }
  0x28   :  { %1694 = vmatpush.bf16.msrb.mxu0 %v3141_v40  ;;  %v3236_v21 = vld [vmem:[#allocation2 + $0x330] sm:$0xf]  ;;  %v4275_v22 = vld [vmem:[#allocation2 + $0x334] sm:$0xf0]  ;;  %v3173_v30 = vor.u32 %v4259_v20, %v3172_v18  ;;  %v3164_v33 = vld [vmem:[#allocation2 + $0x2a0] sm:$0xf] }
  0x29   :  { %1707 = vmatpush.bf16.msrb.mxu1 %v3205_v41  ;;  %v3300_v23 = vld [vmem:[#allocation2 + $0x3b0] sm:$0xf]  ;;  %v4291_v24 = vld [vmem:[#allocation2 + $0x3b4] sm:$0xf0]  ;;  %v3237_v31 = vor.u32 %v4275_v22, %v3236_v21  ;;  %v4257_v36 = vld [vmem:[#allocation2 + $0x2a4] sm:$0xf0]  ;;  %v3101_v41 = vor.u32 %v4241_v32, %v3100_v25 }
  0x2a   :  { %1720 = vmatpush.bf16.msrb.mxu2 %v3269_v42  ;;  %v3301_v35 = vor.u32 %v4291_v24, %v3300_v23  ;;  %v3228_v37 = vld [vmem:[#allocation2 + $0x320] sm:$0xf]  ;;  %v4273_v38 = vld [vmem:[#allocation2 + $0x324] sm:$0xf0]  ;;  %v3092_v42 = vld [vmem:[#allocation2 + $0x210] sm:$0xf]  ;;  %v3165_v43 = vor.u32 %v4257_v36, %v3164_v33 }
  0x2b   :  { %1733 = vmatpush.bf16.msrb.mxu3 %v3333_v46  ;;  %v3292_v39 = vld [vmem:[#allocation2 + $0x3a0] sm:$0xf]  ;;  %v4289_v40 = vld [vmem:[#allocation2 + $0x3a4] sm:$0xf0]  ;;  %v3229_v44 = vor.u32 %v4273_v38, %v3228_v37  ;;  %v4239_v45 = vld [vmem:[#allocation2 + $0x214] sm:$0xf0] }
  0x2c   :  { %1695 = vmatpush.bf16.msrb.mxu0 %v3133_v52  ;;  %v4639_v27 = vld [vmem:[#allocation1 + $0x12] sm:$0xff]  ;;  %v4641_v28 = vld [vmem:[#allocation1] sm:$0xff]  ;;  %v4645_v34 = vld [vmem:[#allocation1 + $0x9] sm:$0xff]  ;;  %v3293_v48 = vor.u32 %v4289_v40, %v3292_v39  ;;  %v3093_v55 = vor.u32 %v4239_v45, %v3092_v42  ;;  %vm2597_vm1 = vcmask 1042434   ;;  %vm2593_vm2 = vcmask 1040384  }
  0x2d   :  { %1708 = vmatpush.bf16.msrb.mxu1 %v3197_v53  ;;  %v4643_v29 = vld [vmem:[#allocation1 + $0x1b] sm:$0xff]  ;;  %1676 = vmatmul.bf16.vlgmr.msra.gmra.mxu2 %v4639_v27  ;;  %v3084_v53 = vld [vmem:[#allocation2 + $0x200] sm:$0xf]  ;;  %v4253_v57 = vld [vmem:[#allocation2 + $0x284] sm:$0xf0]  ;;  %vm2602_vm3 = vcmask 1044484  }
  0x2e   :  { %1721 = vmatpush.bf16.msrb.mxu2 %v3261_v54  ;;  %1650 = vmatmul.bf16.vlgmr.msra.gmra.mxu0 %v4641_v28  ;;  %v3156_v46 = vld [vmem:[#allocation2 + $0x290] sm:$0xf]  ;;  %v4255_v47 = vld [vmem:[#allocation2 + $0x294] sm:$0xf0]  ;;  %v4237_v54 = vld [vmem:[#allocation2 + $0x204] sm:$0xf0] }
  0x2f   :  { %1734 = vmatpush.bf16.msrb.mxu3 %v3325_v58  ;;  %1663 = vmatmul.bf16.vlgmr.msra.gmra.mxu1 %v4645_v34  ;;  %v3220_v49 = vld [vmem:[#allocation2 + $0x310] sm:$0xf]  ;;  %v4271_v50 = vld [vmem:[#allocation2 + $0x314] sm:$0xf0]  ;;  %v3148_v56 = vld [vmem:[#allocation2 + $0x280] sm:$0xf]  ;;  %v3157_v62 = vor.u32 %v4255_v47, %v3156_v46  ;;  %v3085_v9 = vor.u32 %v4237_v54, %v3084_v53 }
  0x30   :  { %1696 = vmatpush.bf16.msrb.mxu0 %v3125_v0  ;;  %1689 = vmatmul.bf16.vlgmr.msra.gmra.mxu3 %v4643_v29  ;;  %v3284_v51 = vld [vmem:[#allocation2 + $0x390] sm:$0xf]  ;;  %v4287_v52 = vld [vmem:[#allocation2 + $0x394] sm:$0xf0]  ;;  %v3212_v58 = vld [vmem:[#allocation2 + $0x300] sm:$0xf]  ;;  %v3221_v63 = vor.u32 %v4271_v50, %v3220_v49 }
  0x31   :  { %1709 = vmatpush.bf16.msrb.mxu1 %v3189_v3  ;;  %v4269_v59 = vld [vmem:[#allocation2 + $0x304] sm:$0xf0]  ;;  %v4651_v60 = vld [vmem:[#allocation1 + $0x36] sm:$0xff]  ;;  %v63_v61 = vld [vmem:[%s5176_s0 + $0x8] sm:$0xff]  ;;  %v3285_v3 = vor.u32 %v4287_v52, %v3284_v51  ;;  %vm2606_vm4 = vcmask 1046534   ;;  %vm2610_vm5 = vcmask 1045508  }
  0x32   :  { %1722 = vmatpush.bf16.msrb.mxu2 %v3253_v4  ;;  %v4656_v0 = vld [vmem:[#allocation1 + $0x24] sm:$0xff]  ;;  %v4660_v2 = vld [vmem:[#allocation1 + $0x2d] sm:$0xff]  ;;  %v3396_v6 = vld [vmem:[#allocation2 + $0x470] sm:$0xf]  ;;  %vm2612_vm6 = vcmask 1043456   ;;  %vm2735_vm7 = vcmask 523264  }
  0x33   :  { %1735 = vmatpush.bf16.msrb.mxu3 %v3317_v7  ;;  %v4658_v1 = vld [vmem:[#allocation1 + $0x3f] sm:$0xff]  ;;  %v3276_v4 = vld [vmem:[#allocation2 + $0x380] sm:$0xf]  ;;  %v4285_v5 = vld [vmem:[#allocation2 + $0x384] sm:$0xf0]  ;;  %vm2752_vm8 = vcmask 517120  }
  0x34   :  { %1697 = vmatpush.bf16.msrb.mxu0 %v3117_v13  ;;  %337 = vst [vmem:[#allocation1] ss:$9 sm:$0xff] %v63_v61  ;;  %v4315_v7 = vld [vmem:[#allocation2 + $0x474] sm:$0xf0]  ;;  %v3460_v8 = vld [vmem:[#allocation2 + $0x4f0] sm:$0xf]  ;;  %v3149_v13 = vor.u32 %v4253_v57, %v3148_v56  ;;  %v3277_v17 = vor.u32 %v4285_v5, %v3276_v4 }
  0x35   :  { %1710 = vmatpush.bf16.msrb.mxu1 %v3181_v14  ;;  %v4331_v10 = vld [vmem:[#allocation2 + $0x4f4] sm:$0xf0]  ;;  %v3524_v11 = vld [vmem:[#allocation2 + $0x570] sm:$0xf]  ;;  %v3213_v14 = vor.u32 %v4269_v59, %v3212_v58  ;;  %v3397_v18 = vor.u32 %v4315_v7, %v3396_v6  ;;  %v3388_v21 = vld [vmem:[#allocation2 + $0x460] sm:$0xf] }
  0x36   :  { %1723 = vmatpush.bf16.msrb.mxu2 %v3245_v15  ;;  %v4347_v12 = vld [vmem:[#allocation2 + $0x574] sm:$0xf0]  ;;  %v3588_v15 = vld [vmem:[#allocation2 + $0x5f0] sm:$0xf]  ;;  %v4313_v22 = vld [vmem:[#allocation2 + $0x464] sm:$0xf0] }
  0x37   :  { %1736 = vmatpush.bf16.msrb.mxu3 %v3309_v19  ;;  %v4363_v16 = vld [vmem:[#allocation2 + $0x5f4] sm:$0xf0]  ;;  %v3461_v19 = vor.u32 %v4331_v10, %v3460_v8  ;;  %v3525_v20 = vor.u32 %v4347_v12, %v3524_v11  ;;  %v3452_v23 = vld [vmem:[#allocation2 + $0x4e0] sm:$0xf]  ;;  %v4329_v25 = vld [vmem:[#allocation2 + $0x4e4] sm:$0xf0]  ;;  %v3389_v33 = vor.u32 %v4313_v22, %v3388_v21 }
  0x38   :  { %1698 = vmatpush.bf16.msrb.mxu0 %v3109_v26  ;;  %v3589_v24 = vor.u32 %v4363_v16, %v3588_v15  ;;  %v3516_v26 = vld [vmem:[#allocation2 + $0x560] sm:$0xf]  ;;  %v4361_v32 = vld [vmem:[#allocation2 + $0x5e4] sm:$0xf0]  ;;  %v3380_v37 = vld [vmem:[#allocation2 + $0x450] sm:$0xf] }
  0x39   :  { %1711 = vmatpush.bf16.msrb.mxu1 %v3173_v30  ;;  %v4345_v30 = vld [vmem:[#allocation2 + $0x564] sm:$0xf0]  ;;  %v4311_v38 = vld [vmem:[#allocation2 + $0x454] sm:$0xf0]  ;;  %v3444_v39 = vld [vmem:[#allocation2 + $0x4d0] sm:$0xf] }
  0x3a   :  { %1724 = vmatpush.bf16.msrb.mxu2 %v3237_v31  ;;  %v3580_v31 = vld [vmem:[#allocation2 + $0x5e0] sm:$0xf]  ;;  %v3517_v36 = vor.u32 %v4345_v30, %v3516_v26  ;;  %v3508_v42 = vld [vmem:[#allocation2 + $0x550] sm:$0xf]  ;;  %v4359_v45 = vld [vmem:[#allocation2 + $0x5d4] sm:$0xf0]  ;;  %v3381_v46 = vor.u32 %v4311_v38, %v3380_v37 }
  0x3b   :  { %1737 = vmatpush.bf16.msrb.mxu3 %v3301_v35  ;;  %v3453_v35 = vor.u32 %v4329_v25, %v3452_v23  ;;  %v3581_v40 = vor.u32 %v4361_v32, %v3580_v31  ;;  %v3372_v49 = vld [vmem:[#allocation2 + $0x440] sm:$0xf]  ;;  %v4309_v50 = vld [vmem:[#allocation2 + $0x444] sm:$0xf0]  ;;  %v4323_v5 = vld [vmem:[#allocation2 + $0x4b4] sm:$0xf0] }
  0x3c   :  { %1699 = vmatpush.bf16.msrb.mxu0 %v3101_v41  ;;  %v4327_v41 = vld [vmem:[#allocation2 + $0x4d4] sm:$0xf0]  ;;  %v3436_v51 = vld [vmem:[#allocation2 + $0x4c0] sm:$0xf]  ;;  %v4325_v53 = vld [vmem:[#allocation2 + $0x4c4] sm:$0xf0]  ;;  %v3373_v58 = vor.u32 %v4309_v50, %v3372_v49 }
  0x3d   :  { %1712 = vmatpush.bf16.msrb.mxu1 %v3165_v43  ;;  %v4343_v43 = vld [vmem:[#allocation2 + $0x554] sm:$0xf0]  ;;  %v3445_v47 = vor.u32 %v4327_v41, %v3444_v39  ;;  %v3500_v54 = vld [vmem:[#allocation2 + $0x540] sm:$0xf]  ;;  %v4357_v57 = vld [vmem:[#allocation2 + $0x5c4] sm:$0xf0]  ;;  %v3437_v59 = vor.u32 %v4325_v53, %v3436_v51 }
  0x3e   :  { %1725 = vmatpush.bf16.msrb.mxu2 %v3229_v44  ;;  %v3572_v44 = vld [vmem:[#allocation2 + $0x5d0] sm:$0xf]  ;;  %v3564_v56 = vld [vmem:[#allocation2 + $0x5c0] sm:$0xf]  ;;  %v4339_v7 = vld [vmem:[#allocation2 + $0x534] sm:$0xf0] }
  0x3f   :  { %1738 = vmatpush.bf16.msrb.mxu3 %v3293_v48  ;;  %v3509_v48 = vor.u32 %v4343_v43, %v3508_v42  ;;  %v3573_v52 = vor.u32 %v4359_v45, %v3572_v44  ;;  %v3565_v4 = vor.u32 %v4357_v57, %v3564_v56  ;;  %v3492_v6 = vld [vmem:[#allocation2 + $0x530] sm:$0xf]  ;;  %v3420_v15 = vld [vmem:[#allocation2 + $0x4a0] sm:$0xf]  ;;  %v4353_v21 = vld [vmem:[#allocation2 + $0x5a4] sm:$0xf0] }
  0x40   :  { %1700 = vmatpush.bf16.msrb.mxu0 %v3093_v55  ;;  %v4341_v55 = vld [vmem:[#allocation2 + $0x544] sm:$0xf0]  ;;  %v3556_v8 = vld [vmem:[#allocation2 + $0x5b0] sm:$0xf]  ;;  %v3493_v12 = vor.u32 %v4339_v7, %v3492_v6  ;;  %v4303_v26 = vld [vmem:[#allocation2 + $0x414] sm:$0xf0] }
  0x41   :  { %1713 = vmatpush.bf16.msrb.mxu1 %v3157_v62  ;;  %v3501_v61 = vor.u32 %v4341_v55, %v3500_v54  ;;  %v3364_v62 = vld [vmem:[#allocation2 + $0x430] sm:$0xf]  ;;  %v4319_v32 = vld [vmem:[#allocation2 + $0x494] sm:$0xf0]  ;;  %v3340_v39 = vld [vmem:[#allocation2 + $0x400] sm:$0xf] }
  0x42   :  { %1726 = vmatpush.bf16.msrb.mxu2 %v3221_v63  ;;  %v4307_v63 = vld [vmem:[#allocation2 + $0x434] sm:$0xf0]  ;;  %v3348_v25 = vld [vmem:[#allocation2 + $0x410] sm:$0xf]  ;;  %v3404_v43 = vld [vmem:[#allocation2 + $0x480] sm:$0xf] }
  0x43   :  { %1739 = vmatpush.bf16.msrb.mxu3 %v3285_v3  ;;  %v3428_v3 = vld [vmem:[#allocation2 + $0x4b0] sm:$0xf]  ;;  %v3365_v10 = vor.u32 %v4307_v63, %v3364_v62  ;;  %v4351_v37 = vld [vmem:[#allocation2 + $0x594] sm:$0xf0]  ;;  %v3349_v38 = vor.u32 %v4303_v26, %v3348_v25  ;;  %v4317_v44 = vld [vmem:[#allocation2 + $0x484] sm:$0xf0] }
  0x44   :  { %1701 = vmatpush.bf16.msrb.mxu0 %v3085_v9  ;;  %v4355_v9 = vld [vmem:[#allocation2 + $0x5b4] sm:$0xf0]  ;;  %v3429_v11 = vor.u32 %v4323_v5, %v3428_v3  ;;  %v3412_v30 = vld [vmem:[#allocation2 + $0x490] sm:$0xf]  ;;  %v3468_v45 = vld [vmem:[#allocation2 + $0x500] sm:$0xf]  ;;  %v3405_v57 = vor.u32 %v4317_v44, %v3404_v43 }
  0x45   :  { %1714 = vmatpush.bf16.msrb.mxu1 %v3149_v13  ;;  %v3356_v13 = vld [vmem:[#allocation2 + $0x420] sm:$0xf]  ;;  %v3557_v16 = vor.u32 %v4355_v9, %v3556_v8  ;;  %v3413_v41 = vor.u32 %v4319_v32, %v3412_v30  ;;  %v4349_v49 = vld [vmem:[#allocation2 + $0x584] sm:$0xf0]  ;;  %v3652_v50 = vld [vmem:[#allocation2 + $0x670] sm:$0xf] }
  0x46   :  { %1727 = vmatpush.bf16.msrb.mxu2 %v3213_v14  ;;  %v4305_v14 = vld [vmem:[#allocation2 + $0x424] sm:$0xf0]  ;;  %v4379_v51 = vld [vmem:[#allocation2 + $0x674] sm:$0xf0]  ;;  %v3780_v55 = vld [vmem:[#allocation2 + $0x770] sm:$0xf] }
  0x47   :  { %1740 = vmatpush.bf16.msrb.mxu3 %v3277_v17  ;;  %1702 = vmatmul.bf16.vlgmr.msrb.gmra.mxu0 %v4656_v0  ;;  %v4321_v17 = vld [vmem:[#allocation2 + $0x4a4] sm:$0xf0]  ;;  %v3357_v22 = vor.u32 %v4305_v14, %v3356_v13  ;;  %v4395_v54 = vld [vmem:[#allocation2 + $0x6f4] sm:$0xf0]  ;;  %v3653_v63 = vor.u32 %v4379_v51, %v3652_v50  ;;  %v3644_v5 = vld [vmem:[#allocation2 + $0x660] sm:$0xf] }
  0x48   :  { %1746 = vmatpush.bf16.msra.mxu0 %v3397_v18  ;;  %1715 = vmatmul.bf16.vlgmr.msrb.gmra.mxu1 %v4660_v2  ;;  %v3484_v18 = vld [vmem:[#allocation2 + $0x520] sm:$0xf]  ;;  %v3421_v23 = vor.u32 %v4321_v17, %v3420_v15  ;;  %v4411_v56 = vld [vmem:[#allocation2 + $0x774] sm:$0xf0]  ;;  %v4377_v6 = vld [vmem:[#allocation2 + $0x664] sm:$0xf0] }
  0x49   :  { %1759 = vmatpush.bf16.msra.mxu1 %v3461_v19  ;;  %1728 = vmatmul.bf16.vlgmr.msrb.gmra.mxu2 %v4651_v60  ;;  %v4337_v19 = vld [vmem:[#allocation2 + $0x524] sm:$0xf0]  ;;  %v3708_v7 = vld [vmem:[#allocation2 + $0x6e0] sm:$0xf]  ;;  %v341_v17 = vld [vmem:[#allocation1 + $0x1b] sm:$0xff]  ;;  %vm2807_vm9 = vcmask 107520  }
  0x4a   :  { %1772 = vmatpush.bf16.msra.mxu2 %v3525_v20  ;;  %1741 = vmatmul.bf16.vlgmr.msrb.gmra.mxu3 %v4658_v1  ;;  %v3548_v20 = vld [vmem:[#allocation2 + $0x5a0] sm:$0xf]  ;;  %v4393_v9 = vld [vmem:[#allocation2 + $0x6e4] sm:$0xf0]  ;;  %v4391_v25 = vld [vmem:[#allocation2 + $0x6d4] sm:$0xf0] }
  0x4b   :  { %1785 = vmatpush.bf16.msra.mxu3 %v3589_v24  ;;  %v3485_v24 = vor.u32 %v4337_v19, %v3484_v18  ;;  %v3549_v31 = vor.u32 %v4353_v21, %v3548_v20  ;;  %v3836_v13 = vld [vmem:[#allocation2 + $0x7e0] sm:$0xf]  ;;  %v4425_v14 = vld [vmem:[#allocation2 + $0x7e4] sm:$0xf0]  ;;  %v3645_v18 = vor.u32 %v4377_v6, %v3644_v5  ;;  %v3709_v19 = vor.u32 %v4393_v9, %v3708_v7  ;;  %v3636_v21 = vld [vmem:[#allocation2 + $0x650] sm:$0xf] }
  0x4c   :  { %1747 = vmatpush.bf16.msra.mxu0 %v3389_v33  ;;  %v3476_v33 = vld [vmem:[#allocation2 + $0x510] sm:$0xf]  ;;  %v4407_v30 = vld [vmem:[#allocation2 + $0x754] sm:$0xf0]  ;;  %v4405_v43 = vld [vmem:[#allocation2 + $0x744] sm:$0xf0] }
  0x4d   :  { %1760 = vmatpush.bf16.msra.mxu1 %v3453_v35  ;;  %v4335_v35 = vld [vmem:[#allocation2 + $0x514] sm:$0xf0]  ;;  %v340_v15 = vld [vmem:[#allocation1 + $0x12] sm:$0xff]  ;;  %v3820_v44 = vld [vmem:[#allocation2 + $0x7c0] sm:$0xf] }
  0x4e   :  { %1773 = vmatpush.bf16.msra.mxu2 %v3517_v36  ;;  %v3540_v36 = vld [vmem:[#allocation2 + $0x590] sm:$0xf]  ;;  %v3477_v42 = vor.u32 %v4335_v35, %v3476_v33  ;;  %v4423_v32 = vld [vmem:[#allocation2 + $0x7d4] sm:$0xf0]  ;;  %v3628_v35 = vld [vmem:[#allocation2 + $0x640] sm:$0xf] }
  0x4f   :  { %1786 = vmatpush.bf16.msra.mxu3 %v3581_v40  ;;  %v4301_v40 = vld [vmem:[#allocation2 + $0x404] sm:$0xf0]  ;;  %v3764_v26 = vld [vmem:[#allocation2 + $0x750] sm:$0xf]  ;;  %v4371_v50 = vld [vmem:[#allocation2 + $0x634] sm:$0xf0] }
  0x50   :  { %1748 = vmatpush.bf16.msra.mxu0 %v3381_v46  ;;  %v3541_v46 = vor.u32 %v4351_v37, %v3540_v36  ;;  %v3341_v53 = vor.u32 %v4301_v40, %v3340_v39  ;;  %v4373_v36 = vld [vmem:[#allocation2 + $0x644] sm:$0xf0]  ;;  %v3692_v39 = vld [vmem:[#allocation2 + $0x6c0] sm:$0xf]  ;;  %v3684_v51 = vld [vmem:[#allocation2 + $0x6b0] sm:$0xf] }
  0x51   :  { %1761 = vmatpush.bf16.msra.mxu1 %v3445_v47  ;;  %v4333_v47 = vld [vmem:[#allocation2 + $0x504] sm:$0xf0]  ;;  %v3740_v6 = vld [vmem:[#allocation2 + $0x720] sm:$0xf] }
  0x52   :  { %1774 = vmatpush.bf16.msra.mxu2 %v3509_v48  ;;  %v3532_v48 = vld [vmem:[#allocation2 + $0x580] sm:$0xf]  ;;  %v4389_v40 = vld [vmem:[#allocation2 + $0x6c4] sm:$0xf0] }
  0x53   :  { %1787 = vmatpush.bf16.msra.mxu3 %v3573_v52  ;;  %v3716_v52 = vld [vmem:[#allocation2 + $0x6f0] sm:$0xf]  ;;  %v3533_v62 = vor.u32 %v4349_v49, %v3532_v48  ;;  %v4385_v5 = vld [vmem:[#allocation2 + $0x6a4] sm:$0xf0] }
  0x54   :  { %1749 = vmatpush.bf16.msra.mxu0 %v3373_v58  ;;  %v3469_v58 = vor.u32 %v4333_v47, %v3468_v45  ;;  %v3717_v3 = vor.u32 %v4395_v54, %v3716_v52  ;;  %v4421_v45 = vld [vmem:[#allocation2 + $0x7c4] sm:$0xf0]  ;;  %v3693_v47 = vor.u32 %v4389_v40, %v3692_v39  ;;  %v3620_v49 = vld [vmem:[#allocation2 + $0x630] sm:$0xf]  ;;  %v2886_v39 = vld [vmem:[#allocation2 + $0x78] sm:$0xf0] }
  0x55   :  { %1762 = vmatpush.bf16.msra.mxu1 %v3437_v59  ;;  %v3844_v59 = vld [vmem:[#allocation2 + $0x7f0] sm:$0xf]  ;;  %v3821_v52 = vor.u32 %v4421_v45, %v3820_v44  ;;  %v4401_v7 = vld [vmem:[#allocation2 + $0x724] sm:$0xf0]  ;;  %v4202_v40 = vld [vmem:[#allocation2 + $0xf4] sm:$0xf] }
  0x56   :  { %1775 = vmatpush.bf16.msra.mxu2 %v3501_v61  ;;  %v4427_v61 = vld [vmem:[#allocation2 + $0x7f4] sm:$0xf0]  ;;  %v3748_v54 = vld [vmem:[#allocation2 + $0x730] sm:$0xf]  ;;  %v4417_v9 = vld [vmem:[#allocation2 + $0x7a4] sm:$0xf0] }
  0x57   :  { %1788 = vmatpush.bf16.msra.mxu3 %v3565_v4  ;;  %v3781_v4 = vor.u32 %v4411_v56, %v3780_v55  ;;  %v3845_v8 = vor.u32 %v4427_v61, %v3844_v59  ;;  %v4403_v55 = vld [vmem:[#allocation2 + $0x734] sm:$0xf0]  ;;  %v3812_v56 = vld [vmem:[#allocation2 + $0x7b0] sm:$0xf]  ;;  %v3014_v44 = vld [vmem:[#allocation2 + $0x178] sm:$0xf0] }
  0x58   :  { %1750 = vmatpush.bf16.msra.mxu0 %v3365_v10  ;;  %v3772_v10 = vld [vmem:[#allocation2 + $0x760] sm:$0xf]  ;;  %v3749_v61 = vor.u32 %v4403_v55, %v3748_v54  ;;  %v2878_v54 = vld [vmem:[#allocation2 + $0x68] sm:$0xf0]  ;;  %v4200_v55 = vld [vmem:[#allocation2 + $0xe4] sm:$0xf] }
  0x59   :  { %1763 = vmatpush.bf16.msra.mxu1 %v3429_v11  ;;  %v4409_v11 = vld [vmem:[#allocation2 + $0x764] sm:$0xf0] }
  0x5a   :  { %1776 = vmatpush.bf16.msra.mxu2 %v3493_v12  ;;  %v338_v12 = vld [vmem:[#allocation1] sm:$0xff]  ;;  %v3773_v20 = vor.u32 %v4409_v11, %v3772_v10 }
  0x5b   :  { %1789 = vmatpush.bf16.msra.mxu3 %v3557_v16  ;;  %v339_v16 = vld [vmem:[#allocation1 + $0x9] sm:$0xff] }
  0x5c   :  { %1751 = vmatpush.bf16.msra.mxu0 %v3357_v22  ;;  %v4375_v22 = vld [vmem:[#allocation2 + $0x654] sm:$0xf0] }
  0x5d   :  { %1764 = vmatpush.bf16.msra.mxu1 %v3421_v23  ;;  %v3700_v23 = vld [vmem:[#allocation2 + $0x6d0] sm:$0xf]  ;;  %v3637_v33 = vor.u32 %v4375_v22, %v3636_v21  ;;  %v4415_v21 = vld [vmem:[#allocation2 + $0x794] sm:$0xf0] }
  0x5e   :  { %1777 = vmatpush.bf16.msra.mxu2 %v3485_v24  ;;  %v3837_v24 = vor.u32 %v4425_v14, %v3836_v13  ;;  %v3701_v37 = vor.u32 %v4391_v25, %v3700_v23  ;;  %v3604_v13 = vld [vmem:[#allocation2 + $0x610] sm:$0xf]  ;;  %v4367_v14 = vld [vmem:[#allocation2 + $0x614] sm:$0xf0]  ;;  %v3596_v23 = vld [vmem:[#allocation2 + $0x600] sm:$0xf] }
  0x5f   :  { %1790 = vmatpush.bf16.msra.mxu3 %v3549_v31  ;;  %v3828_v31 = vld [vmem:[#allocation2 + $0x7d0] sm:$0xf]  ;;  %v3605_v22 = vor.u32 %v4367_v14, %v3604_v13  ;;  %v2934_v13 = vld [vmem:[#allocation2 + $0xd8] sm:$0xf0]  ;;  %v4214_v14 = vld [vmem:[#allocation2 + $0x154] sm:$0xf] }
  0x60   :  { %1752 = vmatpush.bf16.msra.mxu0 %v3349_v38  ;;  %v3765_v38 = vor.u32 %v4407_v30, %v3764_v26  ;;  %v3660_v30 = vld [vmem:[#allocation2 + $0x680] sm:$0xf] }
  0x61   :  { %1765 = vmatpush.bf16.msra.mxu1 %v3413_v41  ;;  %v3756_v41 = vld [vmem:[#allocation2 + $0x740] sm:$0xf] }
  0x62   :  { %1778 = vmatpush.bf16.msra.mxu2 %v3477_v42  ;;  %v3829_v42 = vor.u32 %v4423_v32, %v3828_v31  ;;  %v3757_v48 = vor.u32 %v4405_v43, %v3756_v41  ;;  %v4381_v31 = vld [vmem:[#allocation2 + $0x684] sm:$0xf0]  ;;  %v3724_v32 = vld [vmem:[#allocation2 + $0x700] sm:$0xf]  ;;  %v4218_v43 = vld [vmem:[#allocation2 + $0x174] sm:$0xf] }
  0x63   :  { %1791 = vmatpush.bf16.msra.mxu3 %v3541_v46  ;;  %v3629_v46 = vor.u32 %v4373_v36, %v3628_v35  ;;  %v4397_v35 = vld [vmem:[#allocation2 + $0x704] sm:$0xf0]  ;;  %v3788_v36 = vld [vmem:[#allocation2 + $0x780] sm:$0xf]  ;;  %v3661_v45 = vor.u32 %v4381_v31, %v3660_v30  ;;  %v2990_v30 = vld [vmem:[#allocation2 + $0x148] sm:$0xf0] }
  0x64   :  { %1753 = vmatpush.bf16.msra.mxu0 %v3341_v53  ;;  %v4387_v53 = vld [vmem:[#allocation2 + $0x6b4] sm:$0xf0]  ;;  %v4228_v31 = vld [vmem:[#allocation2 + $0x1c4] sm:$0xf] }
  0x65   :  { %1766 = vmatpush.bf16.msra.mxu1 %v3405_v57  ;;  %v4419_v57 = vld [vmem:[#allocation2 + $0x7b4] sm:$0xf0]  ;;  %v3685_v59 = vor.u32 %v4387_v53, %v3684_v51  ;;  %v4184_v53 = vld [vmem:[#allocation2 + $0x64] sm:$0xf] }
  0x66   :  { %1779 = vmatpush.bf16.msra.mxu2 %v3469_v58  ;;  %v3621_v58 = vor.u32 %v4371_v50, %v3620_v49 }
  0x67   :  { %1792 = vmatpush.bf16.msra.mxu3 %v3533_v62  ;;  %1754 = vmatmul.bf16.vlgmr.msra.gmra.mxu0 %v338_v12  ;;  %v3612_v62 = vld [vmem:[#allocation2 + $0x620] sm:$0xf]  ;;  %v3741_v12 = vor.u32 %v4401_v7, %v3740_v6  ;;  %v2881_v6 = vor.u32 %v4184_v53, %v2878_v54  ;;  %v2910_v53 = vld [vmem:[#allocation2 + $0xa8] sm:$0xf0]  ;;  %v4208_v54 = vld [vmem:[#allocation2 + $0x124] sm:$0xf] }
  0x68   :  { %1798 = vmatpush.bf16.msrb.mxu0 %v3653_v63  ;;  %1767 = vmatmul.bf16.vlgmr.msra.gmra.mxu1 %v339_v16  ;;  %v4369_v63 = vld [vmem:[#allocation2 + $0x624] sm:$0xf0] }
  0x69   :  { %1811 = vmatpush.bf16.msrb.mxu1 %v3717_v3  ;;  %1780 = vmatmul.bf16.vlgmr.msra.gmra.mxu2 %v340_v15  ;;  %v3676_v3 = vld [vmem:[#allocation2 + $0x6a0] sm:$0xf]  ;;  %v3613_v10 = vor.u32 %v4369_v63, %v3612_v62  ;;  %v3668_v15 = vld [vmem:[#allocation2 + $0x690] sm:$0xf]  ;;  %v4232_v62 = vld [vmem:[#allocation2 + $0x1e4] sm:$0xf] }
  0x6a   :  { %1824 = vmatpush.bf16.msrb.mxu2 %v3781_v4  ;;  %1793 = vmatmul.bf16.vlgmr.msra.gmra.mxu3 %v341_v17  ;;  %v3813_v4 = vor.u32 %v4419_v57, %v3812_v56  ;;  %v3677_v11 = vor.u32 %v4385_v5, %v3676_v3  ;;  %v4383_v17 = vld [vmem:[#allocation2 + $0x694] sm:$0xf0]  ;;  %v2942_v57 = vld [vmem:[#allocation2 + $0xe8] sm:$0xf0] }
  0x6b   :  { %1837 = vmatpush.bf16.msrb.mxu3 %v3845_v8  ;;  %v3804_v8 = vld [vmem:[#allocation2 + $0x7a0] sm:$0xf]  ;;  %v3669_v25 = vor.u32 %v4383_v17, %v3668_v15  ;;  %v3070_v63 = vld [vmem:[#allocation2 + $0x1e8] sm:$0xf0]  ;;  %v345_v5 = vld [vmem:[#allocation1 + $0x3f] sm:$0xff]  ;;  %v2945_v7 = vor.u32 %v4200_v55, %v2942_v57 }
  0x6c   :  { %1799 = vmatpush.bf16.msrb.mxu0 %v3645_v18  ;;  %v3805_v16 = vor.u32 %v4417_v9, %v3804_v8  ;;  %v3732_v18 = vld [vmem:[#allocation2 + $0x710] sm:$0xf]  ;;  %v4182_v9 = vld [vmem:[#allocation2 + $0x54] sm:$0xf]  ;;  %v2998_v15 = vld [vmem:[#allocation2 + $0x158] sm:$0xf0] }
  0x6d   :  { %1812 = vmatpush.bf16.msrb.mxu1 %v3709_v19  ;;  %v4399_v19 = vld [vmem:[#allocation2 + $0x714] sm:$0xf0]  ;;  %v344_v3 = vld [vmem:[#allocation1 + $0x36] sm:$0xff]  ;;  %v3062_v17 = vld [vmem:[#allocation2 + $0x1d8] sm:$0xf0] }
  0x6e   :  { %1825 = vmatpush.bf16.msrb.mxu2 %v3773_v20  ;;  %v3796_v20 = vld [vmem:[#allocation2 + $0x790] sm:$0xf]  ;;  %v3733_v26 = vor.u32 %v4399_v19, %v3732_v18  ;;  %v2974_v55 = vld [vmem:[#allocation2 + $0x128] sm:$0xf0] }
  0x6f   :  { %1838 = vmatpush.bf16.msrb.mxu3 %v3837_v24  ;;  %v4365_v24 = vld [vmem:[#allocation2 + $0x604] sm:$0xf0]  ;;  %v3038_v57 = vld [vmem:[#allocation2 + $0x1a8] sm:$0xf0] }
  0x70   :  { %1800 = vmatpush.bf16.msrb.mxu0 %v3637_v33  ;;  %v3797_v33 = vor.u32 %v4415_v21, %v3796_v20  ;;  %v3597_v41 = vor.u32 %v4365_v24, %v3596_v23  ;;  %v3001_v20 = vor.u32 %v4214_v14, %v2998_v15  ;;  %v4180_v21 = vld [vmem:[#allocation2 + $0x44] sm:$0xf] }
  0x71   :  { %1813 = vmatpush.bf16.msrb.mxu1 %v3701_v37  ;;  %v4413_v37 = vld [vmem:[#allocation2 + $0x784] sm:$0xf0]  ;;  %v4196_v23 = vld [vmem:[#allocation2 + $0xc4] sm:$0xf] }
  0x72   :  { %1826 = vmatpush.bf16.msrb.mxu2 %v3765_v38  ;;  %v4186_v38 = vld [vmem:[#allocation2 + $0x74] sm:$0xf]  ;;  %v3789_v49 = vor.u32 %v4413_v37, %v3788_v36  ;;  %v4188_v15 = vld [vmem:[#allocation2 + $0x84] sm:$0xf] }
  0x73   :  { %1839 = vmatpush.bf16.msrb.mxu3 %v3829_v42  ;;  %v2950_v42 = vld [vmem:[#allocation2 + $0xf8] sm:$0xf0]  ;;  %v2889_v50 = vor.u32 %v4186_v38, %v2886_v39  ;;  %v4178_v37 = vld [vmem:[#allocation2 + $0x34] sm:$0xf] }
  0x74   :  { %1801 = vmatpush.bf16.msrb.mxu0 %v3629_v46  ;;  %v3725_v46 = vor.u32 %v4397_v35, %v3724_v32  ;;  %v2953_v51 = vor.u32 %v4202_v40, %v2950_v42  ;;  %v3054_v32 = vld [vmem:[#allocation2 + $0x1c8] sm:$0xf0]  ;;  %v2854_v38 = vld [vmem:[#allocation2 + $0x38] sm:$0xf0]  ;;  %v4194_v39 = vld [vmem:[#allocation2 + $0xb4] sm:$0xf] }
  0x75   :  { %1814 = vmatpush.bf16.msrb.mxu1 %v3693_v47  ;;  %v4234_v47 = vld [vmem:[#allocation2 + $0x1f4] sm:$0xf]  ;;  %v3057_v40 = vor.u32 %v4228_v31, %v3054_v32  ;;  %v3270_v31 = vld [vmem:[#allocation2 + $0x378] sm:$0xf0] }
  0x76   :  { %1827 = vmatpush.bf16.msrb.mxu2 %v3757_v48  ;;  %v3078_v48 = vld [vmem:[#allocation2 + $0x1f8] sm:$0xf0]  ;;  %v4210_v42 = vld [vmem:[#allocation2 + $0x134] sm:$0xf] }
  0x77   :  { %1840 = vmatpush.bf16.msrb.mxu3 %v3821_v52  ;;  %v3017_v52 = vor.u32 %v4218_v43, %v3014_v44  ;;  %v3081_v56 = vor.u32 %v4234_v47, %v3078_v48  ;;  %v2982_v43 = vld [vmem:[#allocation2 + $0x138] sm:$0xf0]  ;;  %v4226_v44 = vld [vmem:[#allocation2 + $0x1b4] sm:$0xf] }
  0x78   :  { %1802 = vmatpush.bf16.msrb.mxu0 %v3621_v58  ;;  %v4216_v58 = vld [vmem:[#allocation2 + $0x164] sm:$0xf]  ;;  %v2985_v48 = vor.u32 %v4210_v42, %v2982_v43  ;;  %v3134_v42 = vld [vmem:[#allocation2 + $0x268] sm:$0xf0] }
  0x79   :  { %1815 = vmatpush.bf16.msrb.mxu1 %v3685_v59  ;;  %v3006_v59 = vld [vmem:[#allocation2 + $0x168] sm:$0xf0]  ;;  %v4264_v43 = vld [vmem:[#allocation2 + $0x2e4] sm:$0xf] }
  0x7a   :  { %1828 = vmatpush.bf16.msrb.mxu2 %v3749_v61  ;;  %v342_v61 = vld [vmem:[#allocation1 + $0x24] sm:$0xff]  ;;  %v3009_v8 = vor.u32 %v4216_v58, %v3006_v59 }
  0x7b   :  { %1841 = vmatpush.bf16.msrb.mxu3 %v3813_v4  ;;  %v343_v4 = vld [vmem:[#allocation1 + $0x2d] sm:$0xff] }
  0x7c   :  { %1803 = vmatpush.bf16.msrb.mxu0 %v3613_v10  ;;  %v2870_v10 = vld [vmem:[#allocation2 + $0x58] sm:$0xf0] }
  0x7d   :  { %1816 = vmatpush.bf16.msrb.mxu1 %v3677_v11  ;;  %v4198_v11 = vld [vmem:[#allocation2 + $0xd4] sm:$0xf]  ;;  %v2873_v18 = vor.u32 %v4182_v9, %v2870_v10  ;;  %v3030_v9 = vld [vmem:[#allocation2 + $0x198] sm:$0xf0] }
  0x7e   :  { %1829 = vmatpush.bf16.msrb.mxu2 %v3741_v12  ;;  %v3073_v12 = vor.u32 %v4232_v62, %v3070_v63  ;;  %v2937_v19 = vor.u32 %v4198_v11, %v2934_v13  ;;  %v4174_v62 = vld [vmem:[#allocation2 + $0x14] sm:$0xf]  ;;  %v2838_v63 = vld [vmem:[#allocation2 + $0x18] sm:$0xf0]  ;;  %v4172_v11 = vld [vmem:[#allocation2 + $0x4] sm:$0xf] }
  0x7f   :  { %1842 = vmatpush.bf16.msrb.mxu3 %v3805_v16  ;;  %v4230_v16 = vld [vmem:[#allocation2 + $0x1d4] sm:$0xf]  ;;  %v2841_v10 = vor.u32 %v4174_v62, %v2838_v63  ;;  %v3318_v62 = vld [vmem:[#allocation2 + $0x3d8] sm:$0xf0] }
  0x80   :  { %1804 = vmatpush.bf16.msrb.mxu0 %v3605_v22  ;;  %v2862_v22 = vld [vmem:[#allocation2 + $0x48] sm:$0xf0]  ;;  %v3065_v24 = vor.u32 %v4230_v16, %v3062_v17  ;;  %v4204_v17 = vld [vmem:[#allocation2 + $0x104] sm:$0xf] }
  0x81   :  { %1817 = vmatpush.bf16.msrb.mxu1 %v3669_v25  ;;  %v2926_v25 = vld [vmem:[#allocation2 + $0xc8] sm:$0xf0] }
  0x82   :  { %1830 = vmatpush.bf16.msrb.mxu2 %v3733_v26  ;;  %v4212_v26 = vld [vmem:[#allocation2 + $0x144] sm:$0xf]  ;;  %v2929_v35 = vor.u32 %v4196_v23, %v2926_v25  ;;  %v2894_v16 = vld [vmem:[#allocation2 + $0x88] sm:$0xf0]  ;;  %v3142_v23 = vld [vmem:[#allocation2 + $0x278] sm:$0xf0] }
  0x83   :  { %1843 = vmatpush.bf16.msrb.mxu3 %v3797_v33  ;;  %v2865_v33 = vor.u32 %v4180_v21, %v2862_v22  ;;  %v2993_v36 = vor.u32 %v4212_v26, %v2990_v30  ;;  %v3022_v21 = vld [vmem:[#allocation2 + $0x188] sm:$0xf0]  ;;  %v4250_v22 = vld [vmem:[#allocation2 + $0x274] sm:$0xf]  ;;  %v3206_v26 = vld [vmem:[#allocation2 + $0x2f8] sm:$0xf0]  ;;  %v2897_v32 = vor.u32 %v4188_v15, %v2894_v16 }
  0x84   :  { %1805 = vmatpush.bf16.msrb.mxu0 %v3597_v41  ;;  %v2918_v41 = vld [vmem:[#allocation2 + $0xb8] sm:$0xf0]  ;;  %v4282_v30 = vld [vmem:[#allocation2 + $0x374] sm:$0xf] }
  0x85   :  { %1818 = vmatpush.bf16.msrb.mxu1 %v3661_v45  ;;  %v3046_v45 = vld [vmem:[#allocation2 + $0x1b8] sm:$0xf0]  ;;  %v2921_v47 = vor.u32 %v4194_v39, %v2918_v41  ;;  %v4248_v41 = vld [vmem:[#allocation2 + $0x264] sm:$0xf]  ;;  %v4258_v15 = vld [vmem:[#allocation2 + $0x2b4] sm:$0xf] }
  0x86   :  { %1831 = vmatpush.bf16.msrb.mxu2 %v3725_v46  ;;  %v2857_v46 = vor.u32 %v4178_v37, %v2854_v38  ;;  %v3145_v38 = vor.u32 %v4250_v22, %v3142_v23  ;;  %v4240_v23 = vld [vmem:[#allocation2 + $0x224] sm:$0xf] }
  0x87   :  { %1844 = vmatpush.bf16.msrb.mxu3 %v3789_v49  ;;  %1806 = vmatmul.bf16.vlgmr.msrb.gmra.mxu0 %v342_v61  ;;  %v4176_v49 = vld [vmem:[#allocation2 + $0x24] sm:$0xf]  ;;  %v2977_v61 = vor.u32 %v4208_v54, %v2974_v55  ;;  %v3126_v54 = vld [vmem:[#allocation2 + $0x258] sm:$0xf0]  ;;  %v4262_v55 = vld [vmem:[#allocation2 + $0x2d4] sm:$0xf] }
  0x88   :  { %1850 = vmatpush.bf16.msra.mxu0 %v2889_v50  ;;  %1819 = vmatmul.bf16.vlgmr.msrb.gmra.mxu1 %v343_v4  ;;  %v2846_v50 = vld [vmem:[#allocation2 + $0x28] sm:$0xf0] }
  0x89   :  { %1863 = vmatpush.bf16.msra.mxu1 %v2953_v51  ;;  %1832 = vmatmul.bf16.vlgmr.msrb.gmra.mxu2 %v344_v3  ;;  %v4192_v51 = vld [vmem:[#allocation2 + $0xa4] sm:$0xf]  ;;  %v2849_v58 = vor.u32 %v4176_v49, %v2846_v50  ;;  %v4190_v3 = vld [vmem:[#allocation2 + $0x94] sm:$0xf]  ;;  %v3326_v49 = vld [vmem:[#allocation2 + $0x3e8] sm:$0xf0]  ;;  %v3137_v50 = vor.u32 %v4248_v41, %v3134_v42 }
  0x8a   :  { %1876 = vmatpush.bf16.msra.mxu2 %v3017_v52  ;;  %1845 = vmatmul.bf16.vlgmr.msrb.gmra.mxu3 %v345_v5  ;;  %v3049_v52 = vor.u32 %v4226_v44, %v3046_v45  ;;  %v2913_v59 = vor.u32 %v4192_v51, %v2910_v53  ;;  %v2902_v5 = vld [vmem:[#allocation2 + $0x98] sm:$0xf0]  ;;  %v3198_v45 = vld [vmem:[#allocation2 + $0x2e8] sm:$0xf0]  ;;  %v4246_v53 = vld [vmem:[#allocation2 + $0x254] sm:$0xf] }
  0x8b   :  { %1889 = vmatpush.bf16.msra.mxu3 %v3081_v56  ;;  %v4224_v56 = vld [vmem:[#allocation2 + $0x1a4] sm:$0xf]  ;;  %v2905_v13 = vor.u32 %v4190_v3, %v2902_v5  ;;  %v3201_v51 = vor.u32 %v4264_v43, %v3198_v45  ;;  %v3129_v63 = vor.u32 %v4246_v53, %v3126_v54  ;;  %v3094_v43 = vld [vmem:[#allocation2 + $0x218] sm:$0xf0]  ;;  %v3086_v54 = vld [vmem:[#allocation2 + $0x208] sm:$0xf0] }
  0x8c   :  { %1851 = vmatpush.bf16.msra.mxu0 %v2881_v6  ;;  %v3041_v4 = vor.u32 %v4224_v56, %v3038_v57  ;;  %v4206_v6 = vld [vmem:[#allocation2 + $0x114] sm:$0xf]  ;;  %v3190_v57 = vld [vmem:[#allocation2 + $0x2d8] sm:$0xf0]  ;;  %v4244_v5 = vld [vmem:[#allocation2 + $0x244] sm:$0xf] }
  0x8d   :  { %1864 = vmatpush.bf16.msra.mxu1 %v2945_v7  ;;  %v2966_v7 = vld [vmem:[#allocation2 + $0x118] sm:$0xf0]  ;;  %v3193_v3 = vor.u32 %v4262_v55, %v3190_v57  ;;  %v4236_v53 = vld [vmem:[#allocation2 + $0x204] sm:$0xf] }
  0x8e   :  { %1877 = vmatpush.bf16.msra.mxu2 %v3009_v8  ;;  %v4222_v8 = vld [vmem:[#allocation2 + $0x194] sm:$0xf]  ;;  %v2969_v14 = vor.u32 %v4206_v6, %v2966_v7  ;;  %v3118_v6 = vld [vmem:[#allocation2 + $0x248] sm:$0xf0]  ;;  %v4260_v7 = vld [vmem:[#allocation2 + $0x2c4] sm:$0xf] }
  0x8f   :  { %1890 = vmatpush.bf16.msra.mxu3 %v3073_v12  ;;  %v2830_v12 = vld [vmem:[#allocation2 + $0x8] sm:$0xf0] }
  0x90   :  { %1852 = vmatpush.bf16.msra.mxu0 %v2873_v18  ;;  %v3033_v18 = vor.u32 %v4222_v8, %v3030_v9  ;;  %v2833_v25 = vor.u32 %v4172_v11, %v2830_v12  ;;  %v4276_v9 = vld [vmem:[#allocation2 + $0x344] sm:$0xf] }
  0x91   :  { %1865 = vmatpush.bf16.msra.mxu1 %v2937_v19  ;;  %v2958_v19 = vld [vmem:[#allocation2 + $0x108] sm:$0xf0]  ;;  %v4292_v11 = vld [vmem:[#allocation2 + $0x3c4] sm:$0xf] }
  0x92   :  { %1878 = vmatpush.bf16.msra.mxu2 %v3001_v20  ;;  %v4220_v20 = vld [vmem:[#allocation2 + $0x184] sm:$0xf] }
  0x93   :  { %1891 = vmatpush.bf16.msra.mxu3 %v3065_v24  ;;  %v4266_v24 = vld [vmem:[#allocation2 + $0x2f4] sm:$0xf]  ;;  %v3025_v37 = vor.u32 %v4220_v20, %v3022_v21  ;;  %v3302_v21 = vld [vmem:[#allocation2 + $0x3b8] sm:$0xf0] }
  0x94   :  { %1853 = vmatpush.bf16.msra.mxu0 %v2865_v33  ;;  %v2961_v33 = vor.u32 %v4204_v17, %v2958_v19  ;;  %v3209_v39 = vor.u32 %v4266_v24, %v3206_v26  ;;  %v3174_v17 = vld [vmem:[#allocation2 + $0x2b8] sm:$0xf0]  ;;  %v4290_v20 = vld [vmem:[#allocation2 + $0x3b4] sm:$0xf]  ;;  %v3102_v26 = vld [vmem:[#allocation2 + $0x228] sm:$0xf0] }
  0x95   :  { %1866 = vmatpush.bf16.msra.mxu1 %v2929_v35  ;;  %v4298_v35 = vld [vmem:[#allocation2 + $0x3f4] sm:$0xf]  ;;  %v3238_v19 = vld [vmem:[#allocation2 + $0x338] sm:$0xf0]  ;;  %v3177_v24 = vor.u32 %v4258_v15, %v3174_v17 }
  0x96   :  { %1879 = vmatpush.bf16.msra.mxu2 %v2993_v36  ;;  %v3334_v36 = vld [vmem:[#allocation2 + $0x3f8] sm:$0xf0] }
  0x97   :  { %1892 = vmatpush.bf16.msra.mxu3 %v3057_v40  ;;  %v3273_v40 = vor.u32 %v4282_v30, %v3270_v31  ;;  %v3337_v44 = vor.u32 %v4298_v35, %v3334_v36  ;;  %v4256_v30 = vld [vmem:[#allocation2 + $0x2a4] sm:$0xf]  ;;  %v3166_v31 = vld [vmem:[#allocation2 + $0x2a8] sm:$0xf0]  ;;  %v4673_v36 = vld [vmem:[%s5178_s2] sm:$0x3] }
  0x98   :  { %1854 = vmatpush.bf16.msra.mxu0 %v2857_v46  ;;  %v4280_v46 = vld [vmem:[#allocation2 + $0x364] sm:$0xf]  ;;  %v3230_v35 = vld [vmem:[#allocation2 + $0x328] sm:$0xf0]  ;;  %v3169_v41 = vor.u32 %v4256_v30, %v3166_v31  ;;  %v322_v45 = vperm.slane %v4673_v36, 0 }
  0x99   :  { %1867 = vmatpush.bf16.msra.mxu1 %v2921_v47  ;;  %v3262_v47 = vld [vmem:[#allocation2 + $0x368] sm:$0xf0]  ;;  %v4344_v30 = vld [vmem:[#allocation2 + $0x564] sm:$0xf] }
  0x9a   :  { %1880 = vmatpush.bf16.msra.mxu2 %v2985_v48  ;;  %v4296_v48 = vld [vmem:[#allocation2 + $0x3e4] sm:$0xf]  ;;  %v3518_v31 = vld [vmem:[#allocation2 + $0x568] sm:$0xf0] }
  0x9b   :  { %1893 = vmatpush.bf16.msra.mxu3 %v3049_v52  ;;  %v3265_v52 = vor.u32 %v4280_v46, %v3262_v47  ;;  %v3329_v56 = vor.u32 %v4296_v48, %v3326_v49  ;;  %v3158_v47 = vld [vmem:[#allocation2 + $0x298] sm:$0xf0]  ;;  %v4270_v48 = vld [vmem:[#allocation2 + $0x314] sm:$0xf] }
  0x9c   :  { %1855 = vmatpush.bf16.msra.mxu0 %v2849_v58  ;;  %v4278_v58 = vld [vmem:[#allocation2 + $0x354] sm:$0xf]  ;;  %v3222_v49 = vld [vmem:[#allocation2 + $0x318] sm:$0xf0] }
  0x9d   :  { %1868 = vmatpush.bf16.msra.mxu1 %v2913_v59  ;;  %v3254_v59 = vld [vmem:[#allocation2 + $0x358] sm:$0xf0]  ;;  %v3225_v57 = vor.u32 %v4270_v48, %v3222_v49  ;;  %v4358_v49 = vld [vmem:[#allocation2 + $0x5d4] sm:$0xf] }
  0x9e   :  { %1881 = vmatpush.bf16.msra.mxu2 %v2977_v61  ;;  %v4294_v61 = vld [vmem:[#allocation2 + $0x3d4] sm:$0xf]  ;;  %v3510_v48 = vld [vmem:[#allocation2 + $0x558] sm:$0xf0] }
  0x9f   :  { %1894 = vmatpush.bf16.msra.mxu3 %v3041_v4  ;;  %v3257_v4 = vor.u32 %v4278_v58, %v3254_v59  ;;  %v3321_v8 = vor.u32 %v4294_v61, %v3318_v62  ;;  %v4252_v58 = vld [vmem:[#allocation2 + $0x284] sm:$0xf]  ;;  %v3150_v59 = vld [vmem:[#allocation2 + $0x288] sm:$0xf0] }
  0xa0   :  { %1856 = vmatpush.bf16.msra.mxu0 %v2841_v10  ;;  %v3246_v10 = vld [vmem:[#allocation2 + $0x348] sm:$0xf0]  ;;  %v4268_v61 = vld [vmem:[#allocation2 + $0x304] sm:$0xf] }
  0xa1   :  { %1869 = vmatpush.bf16.msra.mxu1 %v2905_v13  ;;  %v4242_v13 = vld [vmem:[#allocation2 + $0x234] sm:$0xf] }
  0xa2   :  { %1882 = vmatpush.bf16.msra.mxu2 %v2969_v14  ;;  %v3110_v14 = vld [vmem:[#allocation2 + $0x238] sm:$0xf0] }
  0xa3   :  { %1895 = vmatpush.bf16.msra.mxu3 %v3033_v18  ;;  %v4274_v18 = vld [vmem:[#allocation2 + $0x334] sm:$0xf]  ;;  %v3113_v22 = vor.u32 %v4242_v13, %v3110_v14  ;;  %v3590_v14 = vld [vmem:[#allocation2 + $0x5f8] sm:$0xf0] }
  0xa4   :  { %1857 = vmatpush.bf16.msra.mxu0 %v2833_v25  ;;  %v3241_v25 = vor.u32 %v4274_v18, %v3238_v19  ;;  %v4362_v13 = vld [vmem:[#allocation2 + $0x5f4] sm:$0xf] }
  0xa5   :  { %1870 = vmatpush.bf16.msra.mxu1 %v2897_v32  ;;  %v3305_v32 = vor.u32 %v4290_v20, %v3302_v21 }
  0xa6   :  { %1883 = vmatpush.bf16.msra.mxu2 %v2961_v33  ;;  %v4272_v33 = vld [vmem:[#allocation2 + $0x324] sm:$0xf] }
  0xa7   :  { %1896 = vmatpush.bf16.msra.mxu3 %v3025_v37  ;;  %1858 = vmatmul.bf16.vlgmr.msra.gmra.mxu0 %v4641_v28  ;;  %v3310_v28 = vld [vmem:[#allocation2 + $0x3c8] sm:$0xf0]  ;;  %v4288_v37 = vld [vmem:[#allocation2 + $0x3a4] sm:$0xf]  ;;  %v3233_v42 = vor.u32 %v4272_v33, %v3230_v35 }
  0xa8   :  { %1902 = vmatpush.bf16.msrb.mxu0 %v3145_v38  ;;  %1871 = vmatmul.bf16.vlgmr.msra.gmra.mxu1 %v4645_v34  ;;  %v3249_v34 = vor.u32 %v4276_v9, %v3246_v10  ;;  %v3313_v16 = vor.u32 %v4292_v11, %v3310_v28  ;;  %v3294_v38 = vld [vmem:[#allocation2 + $0x3a8] sm:$0xf0]  ;;  %v3089_v10 = vor.u32 %v4236_v53, %v3086_v54  ;;  %v3462_v11 = vld [vmem:[#allocation2 + $0x4f8] sm:$0xf0]  ;;  %v4346_v28 = vld [vmem:[#allocation2 + $0x574] sm:$0xf] }
  0xa9   :  { %1915 = vmatpush.bf16.msrb.mxu1 %v3209_v39  ;;  %1884 = vmatmul.bf16.vlgmr.msra.gmra.mxu2 %v4639_v27  ;;  %v3182_v27 = vld [vmem:[#allocation2 + $0x2c8] sm:$0xf0]  ;;  %v3105_v39 = vor.u32 %v4240_v23, %v3102_v26  ;;  %v3297_v46 = vor.u32 %v4288_v37, %v3294_v38  ;;  %v4360_v35 = vld [vmem:[#allocation2 + $0x5e4] sm:$0xf] }
  0xaa   :  { %1928 = vmatpush.bf16.msrb.mxu2 %v3273_v40  ;;  %1897 = vmatmul.bf16.vlgmr.msra.gmra.mxu3 %v4643_v29  ;;  %v3121_v29 = vor.u32 %v4244_v5, %v3118_v6  ;;  %v3185_v12 = vor.u32 %v4260_v7, %v3182_v27  ;;  %v4238_v40 = vld [vmem:[#allocation2 + $0x214] sm:$0xf]  ;;  %v4284_v5 = vld [vmem:[#allocation2 + $0x384] sm:$0xf]  ;;  %v3278_v6 = vld [vmem:[#allocation2 + $0x388] sm:$0xf0] }
  0xab   :  { %1941 = vmatpush.bf16.msrb.mxu3 %v3337_v44  ;;  %v4254_v44 = vld [vmem:[#allocation2 + $0x294] sm:$0xf]  ;;  %v1651_v55 = vpop.f32.mrf.mxu0  ;;  %v3390_v23 = vld [vmem:[#allocation2 + $0x468] sm:$0xf0] }
  0xac   :  { %1903 = vmatpush.bf16.msrb.mxu0 %v3137_v50  ;;  %v4286_v50 = vld [vmem:[#allocation2 + $0x394] sm:$0xf]  ;;  %v1652_v62 = vadd.f32 %v1651_v55, %v322_v45  ;;  %v3454_v26 = vld [vmem:[#allocation2 + $0x4e8] sm:$0xf0] }
  0xad   :  { %1916 = vmatpush.bf16.msrb.mxu1 %v3201_v51  ;;  %v3286_v51 = vld [vmem:[#allocation2 + $0x398] sm:$0xf0]  ;;  %v4314_v7 = vld [vmem:[#allocation2 + $0x474] sm:$0xf]  ;;  %v3582_v37 = vld [vmem:[#allocation2 + $0x5e8] sm:$0xf0] }
  0xae   :  { %1929 = vmatpush.bf16.msrb.mxu2 %v3265_v52  ;;  %v3097_v52 = vor.u32 %v4238_v40, %v3094_v43  ;;  %v4330_v27 = vld [vmem:[#allocation2 + $0x4f4] sm:$0xf]  ;;  %v3382_v43 = vld [vmem:[#allocation2 + $0x458] sm:$0xf0]  ;;  %v3585_v45 = vor.u32 %v4360_v35, %v3582_v37 }
  0xaf   :  { %1942 = vmatpush.bf16.msrb.mxu3 %v3329_v56  ;;  %v3161_v56 = vor.u32 %v4254_v44, %v3158_v47  ;;  %v3465_v20 = vor.u32 %v4330_v27, %v3462_v11  ;;  %v4326_v44 = vld [vmem:[#allocation2 + $0x4d4] sm:$0xf] }
  0xb0   :  { %1904 = vmatpush.bf16.msrb.mxu0 %v3129_v63  ;;  %v1664_v63 = vpop.f32.mrf.mxu1  ;;  %v1677_v15 = vpop.f32.mrf.mxu2  ;;  %v4342_v47 = vld [vmem:[#allocation2 + $0x554] sm:$0xf] }
  0xb1   :  { %1917 = vmatpush.bf16.msrb.mxu1 %v3193_v3  ;;  %v3289_v3 = vor.u32 %v4286_v50, %v3286_v51  ;;  %v1665_v9 = vadd.f32 %v1664_v63, %v1652_v62  ;;  %v3574_v50 = vld [vmem:[#allocation2 + $0x5d8] sm:$0xf0]  ;;  %v3513_v55 = vor.u32 %v4342_v47, %v3510_v48  ;;  %v4356_v62 = vld [vmem:[#allocation2 + $0x5c4] sm:$0xf]  ;;  %v4338_v11 = vld [vmem:[#allocation2 + $0x534] sm:$0xf] }
  0xb2   :  { %1930 = vmatpush.bf16.msrb.mxu2 %v3257_v4  ;;  %v3214_v4 = vld [vmem:[#allocation2 + $0x308] sm:$0xf0]  ;;  %v3542_v47 = vld [vmem:[#allocation2 + $0x598] sm:$0xf0] }
  0xb3   :  { %1943 = vmatpush.bf16.msrb.mxu3 %v3321_v8  ;;  %v3398_v8 = vld [vmem:[#allocation2 + $0x478] sm:$0xf0]  ;;  %v1678_v18 = vadd.f32 %v1677_v15, %v1665_v9  ;;  %v1690_v19 = vpop.f32.mrf.mxu3  ;;  %v1653_v33 = vpop.f32.mrf.mxu0 }
  0xb4   :  { %1905 = vmatpush.bf16.msrb.mxu0 %v3121_v29  ;;  %v3526_v29 = vld [vmem:[#allocation2 + $0x578] sm:$0xf0]  ;;  %v3401_v17 = vor.u32 %v4314_v7, %v3398_v8  ;;  %v4322_v7 = vld [vmem:[#allocation2 + $0x4b4] sm:$0xf] }
  0xb5   :  { %1918 = vmatpush.bf16.msrb.mxu1 %v3185_v12  ;;  %v3153_v12 = vor.u32 %v4252_v58, %v3150_v59  ;;  %v3529_v21 = vor.u32 %v4346_v28, %v3526_v29  ;;  %v3577_v58 = vor.u32 %v4358_v49, %v3574_v50  ;;  %v3438_v59 = vld [vmem:[#allocation2 + $0x4c8] sm:$0xf0]  ;;  %v3494_v28 = vld [vmem:[#allocation2 + $0x538] sm:$0xf0]  ;;  %v4354_v29 = vld [vmem:[#allocation2 + $0x5b4] sm:$0xf] }
  0xb6   :  { %1931 = vmatpush.bf16.msrb.mxu2 %v3249_v34  ;;  %v3217_v34 = vor.u32 %v4268_v61, %v3214_v4  ;;  %v4340_v61 = vld [vmem:[#allocation2 + $0x544] sm:$0xf]  ;;  %v3497_v15 = vor.u32 %v4338_v11, %v3494_v28  ;;  %v3342_v50 = vld [vmem:[#allocation2 + $0x408] sm:$0xf0] }
  0xb7   :  { %1944 = vmatpush.bf16.msrb.mxu3 %v3313_v16  ;;  %v3281_v16 = vor.u32 %v4284_v5, %v3278_v6  ;;  %v4306_v5 = vld [vmem:[#allocation2 + $0x434] sm:$0xf]  ;;  %v3366_v6 = vld [vmem:[#allocation2 + $0x438] sm:$0xf0]  ;;  %v4300_v49 = vld [vmem:[#allocation2 + $0x404] sm:$0xf] }
  0xb8   :  { %1906 = vmatpush.bf16.msrb.mxu0 %v3113_v22  ;;  %v4312_v22 = vld [vmem:[#allocation2 + $0x464] sm:$0xf]  ;;  %v1666_v38 = vpop.f32.mrf.mxu1  ;;  %v1679_v51 = vpop.f32.mrf.mxu2 }
  0xb9   :  { %1919 = vmatpush.bf16.msrb.mxu1 %v3177_v24  ;;  %v4328_v24 = vld [vmem:[#allocation2 + $0x4e4] sm:$0xf]  ;;  %v4302_v38 = vld [vmem:[#allocation2 + $0x414] sm:$0xf] }
  0xba   :  { %1932 = vmatpush.bf16.msrb.mxu2 %v3241_v25  ;;  %v3593_v25 = vor.u32 %v4362_v13, %v3590_v14  ;;  %v3457_v40 = vor.u32 %v4328_v24, %v3454_v26  ;;  %v3369_v13 = vor.u32 %v4306_v5, %v3366_v6  ;;  %v4352_v26 = vld [vmem:[#allocation2 + $0x5a4] sm:$0xf] }
  0xbb   :  { %1945 = vmatpush.bf16.msrb.mxu3 %v3305_v32  ;;  %v1691_v32 = vadd.f32 %v1690_v19, %v1678_v18  ;;  %v1692_v53 = vpop.f32.mrf.mxu3  ;;  %v4320_v18 = vld [vmem:[#allocation2 + $0x4a4] sm:$0xf] }
  0xbc   :  { %1907 = vmatpush.bf16.msrb.mxu0 %v3105_v39  ;;  %v3393_v39 = vor.u32 %v4312_v22, %v3390_v23  ;;  %v4336_v22 = vld [vmem:[#allocation2 + $0x524] sm:$0xf]  ;;  %v3486_v23 = vld [vmem:[#allocation2 + $0x528] sm:$0xf0] }
  0xbd   :  { %1920 = vmatpush.bf16.msrb.mxu1 %v3169_v41  ;;  %v3521_v41 = vor.u32 %v4344_v30, %v3518_v31  ;;  %v3550_v30 = vld [vmem:[#allocation2 + $0x5a8] sm:$0xf0]  ;;  %v3489_v37 = vor.u32 %v4336_v22, %v3486_v23  ;;  %v4316_v53 = vld [vmem:[#allocation2 + $0x484] sm:$0xf]  ;;  %v3638_v22 = vld [vmem:[#allocation2 + $0x658] sm:$0xf0] }
  0xbe   :  { %1933 = vmatpush.bf16.msrb.mxu2 %v3233_v42  ;;  %v4310_v42 = vld [vmem:[#allocation2 + $0x454] sm:$0xf]  ;;  %v4376_v28 = vld [vmem:[#allocation2 + $0x664] sm:$0xf] }
  0xbf   :  { %1946 = vmatpush.bf16.msrb.mxu3 %v3297_v46  ;;  %v3446_v46 = vld [vmem:[#allocation2 + $0x4d8] sm:$0xf0]  ;;  %v4390_v23 = vld [vmem:[#allocation2 + $0x6d4] sm:$0xf] }
  0xc0   :  { %1908 = vmatpush.bf16.msrb.mxu0 %v3097_v52  ;;  %v3385_v52 = vor.u32 %v4310_v42, %v3382_v43  ;;  %v3449_v54 = vor.u32 %v4326_v44, %v3446_v46  ;;  %v3553_v42 = vor.u32 %v4352_v26, %v3550_v30  ;;  %v3414_v43 = vld [vmem:[#allocation2 + $0x498] sm:$0xf0]  ;;  %v4334_v44 = vld [vmem:[#allocation2 + $0x514] sm:$0xf] }
  0xc1   :  { %1921 = vmatpush.bf16.msrb.mxu1 %v3161_v56  ;;  %v3374_v56 = vld [vmem:[#allocation2 + $0x448] sm:$0xf0]  ;;  %v4350_v46 = vld [vmem:[#allocation2 + $0x594] sm:$0xf]  ;;  %v3702_v26 = vld [vmem:[#allocation2 + $0x6d8] sm:$0xf0] }
  0xc2   :  { %1934 = vmatpush.bf16.msrb.mxu2 %v3225_v57  ;;  %v4324_v57 = vld [vmem:[#allocation2 + $0x4c4] sm:$0xf]  ;;  %v4406_v30 = vld [vmem:[#allocation2 + $0x754] sm:$0xf] }
  0xc3   :  { %1947 = vmatpush.bf16.msrb.mxu3 %v3289_v3 }
  0xc4   :  { %1909 = vmatpush.bf16.msrb.mxu0 %v3089_v10  ;;  %v1703_v3 = vpop.f32.mrf.mxu0  ;;  %v3430_v10 = vld [vmem:[#allocation2 + $0x4b8] sm:$0xf0] }
  0xc5   :  { %1922 = vmatpush.bf16.msrb.mxu1 %v3153_v12  ;;  %v1704_v8 = vadd.f32 %v1703_v3, %v1691_v32  ;;  %v1716_v27 = vpop.f32.mrf.mxu1  ;;  %v3558_v12 = vld [vmem:[#allocation2 + $0x5b8] sm:$0xf0]  ;;  %v3433_v14 = vor.u32 %v4322_v7, %v3430_v10  ;;  %v4426_v7 = vld [vmem:[#allocation2 + $0x7f4] sm:$0xf] }
  0xc6   :  { %1935 = vmatpush.bf16.msrb.mxu2 %v3217_v34  ;;  %v3718_v3 = vld [vmem:[#allocation2 + $0x6f8] sm:$0xf0] }
  0xc7   :  { %1948 = vmatpush.bf16.msrb.mxu3 %v3281_v16  ;;  %1910 = vmatmul.bf16.vlgmr.msrb.gmra.mxu0 %v4656_v0  ;;  %v3502_v0 = vld [vmem:[#allocation2 + $0x548] sm:$0xf0]  ;;  %v1717_v34 = vadd.f32 %v1716_v27, %v1704_v8  ;;  %v4304_v16 = vld [vmem:[#allocation2 + $0x424] sm:$0xf]  ;;  %v3846_v8 = vld [vmem:[#allocation2 + $0x7f8] sm:$0xf0] }
  0xc8   :  { %1954 = vmatpush.bf16.msra.mxu0 %v3401_v17  ;;  %1923 = vmatmul.bf16.vlgmr.msrb.gmra.mxu1 %v4660_v2  ;;  %v3441_v2 = vor.u32 %v4324_v57, %v3438_v59  ;;  %v3505_v4 = vor.u32 %v4340_v61, %v3502_v0  ;;  %v3358_v17 = vld [vmem:[#allocation2 + $0x428] sm:$0xf0]  ;;  %v4378_v0 = vld [vmem:[#allocation2 + $0x674] sm:$0xf] }
  0xc9   :  { %1967 = vmatpush.bf16.msra.mxu1 %v3465_v20  ;;  %1936 = vmatmul.bf16.vlgmr.msrb.gmra.mxu2 %v4651_v60  ;;  %v4308_v60 = vld [vmem:[#allocation2 + $0x444] sm:$0xf]  ;;  %v3561_v20 = vor.u32 %v4354_v29, %v3558_v12  ;;  %v3361_v31 = vor.u32 %v4304_v16, %v3358_v17  ;;  %v3470_v57 = vld [vmem:[#allocation2 + $0x508] sm:$0xf0] }
  0xca   :  { %1980 = vmatpush.bf16.msra.mxu2 %v3529_v21  ;;  %1949 = vmatmul.bf16.vlgmr.msrb.gmra.mxu3 %v4658_v1  ;;  %v3566_v1 = vld [vmem:[#allocation2 + $0x5c8] sm:$0xf0]  ;;  %v3377_v63 = vor.u32 %v4308_v60, %v3374_v56  ;;  %v3545_v56 = vor.u32 %v4350_v46, %v3542_v47  ;;  %v4392_v12 = vld [vmem:[#allocation2 + $0x6e4] sm:$0xf] }
  0xcb   :  { %1993 = vmatpush.bf16.msra.mxu3 %v3593_v25  ;;  %v3569_v9 = vor.u32 %v4356_v62, %v3566_v1  ;;  %v3422_v21 = vld [vmem:[#allocation2 + $0x4a8] sm:$0xf0]  ;;  %v3654_v62 = vld [vmem:[#allocation2 + $0x678] sm:$0xf0]  ;;  %v4394_v1 = vld [vmem:[#allocation2 + $0x6f4] sm:$0xf] }
  0xcc   :  { %1955 = vmatpush.bf16.msra.mxu0 %v3393_v39  ;;  %v1729_v19 = vpop.f32.mrf.mxu2  ;;  %v1705_v33 = vpop.f32.mrf.mxu0  ;;  %v3425_v35 = vor.u32 %v4320_v18, %v3422_v21  ;;  %v3350_v39 = vld [vmem:[#allocation2 + $0x418] sm:$0xf0]  ;;  %v3534_v59 = vld [vmem:[#allocation2 + $0x588] sm:$0xf0]  ;;  %v3721_v10 = vor.u32 %v4394_v1, %v3718_v3  ;;  %v4424_v16 = vld [vmem:[#allocation2 + $0x7e4] sm:$0xf] }
  0xcd   :  { %1968 = vmatpush.bf16.msra.mxu1 %v3457_v40  ;;  %v1730_v24 = vadd.f32 %v1729_v19, %v1717_v34  ;;  %v1742_v25 = vpop.f32.mrf.mxu3  ;;  %v4318_v40 = vld [vmem:[#allocation2 + $0x494] sm:$0xf]  ;;  %v3353_v48 = vor.u32 %v4302_v38, %v3350_v39  ;;  %v3646_v29 = vld [vmem:[#allocation2 + $0x668] sm:$0xf0]  ;;  %v3849_v34 = vor.u32 %v4426_v7, %v3846_v8  ;;  %v3830_v38 = vld [vmem:[#allocation2 + $0x7d8] sm:$0xf0] }
  0xce   :  { %1981 = vmatpush.bf16.msra.mxu2 %v3521_v41  ;;  %v1718_v41 = vpop.f32.mrf.mxu1  ;;  %v3417_v51 = vor.u32 %v4318_v40, %v3414_v43  ;;  %v3838_v17 = vld [vmem:[#allocation2 + $0x7e8] sm:$0xf0]  ;;  %v3649_v18 = vor.u32 %v4376_v28, %v3646_v29  ;;  %v4374_v21 = vld [vmem:[#allocation2 + $0x654] sm:$0xf]  ;;  %v4372_v43 = vld [vmem:[#allocation2 + $0x644] sm:$0xf] }
  0xcf   :  { %1994 = vmatpush.bf16.msra.mxu3 %v3585_v45  ;;  %v4680_v32 = vadd.f32 %v1742_v25, %v1730_v24  ;;  %v3478_v45 = vld [vmem:[#allocation2 + $0x518] sm:$0xf0]  ;;  %v3841_v25 = vor.u32 %v4424_v16, %v3838_v17  ;;  %v4517_v33 = vld [vmem:[#allocation1 + $0x12] sm:$0xff]  ;;  %v4519_v39 = vld [vmem:[#allocation1 + $0x1b] sm:$0xff]  ;;  %v3641_v40 = vor.u32 %v4374_v21, %v3638_v22  ;;  %v3705_v41 = vor.u32 %v4390_v23, %v3702_v26 }
  0xd0   :  { %1956 = vmatpush.bf16.msra.mxu0 %v3385_v52  ;;  %v3481_v52 = vor.u32 %v4334_v44, %v3478_v45  ;;  %v4516_v24 = vld [vmem:[#allocation1] sm:$0xff]  ;;  %v3630_v44 = vld [vmem:[#allocation2 + $0x648] sm:$0xf0]  ;;  %v4388_v45 = vld [vmem:[#allocation2 + $0x6c4] sm:$0xf] }
  0xd1   :  { %1969 = vmatpush.bf16.msra.mxu1 %v3449_v54  ;;  %v3406_v54 = vld [vmem:[#allocation2 + $0x488] sm:$0xf0]  ;;  %v4402_v1 = vld [vmem:[#allocation2 + $0x734] sm:$0xf]  ;;  %v4384_v8 = vld [vmem:[#allocation2 + $0x6a4] sm:$0xf] }
  0xd2   :  { %1982 = vmatpush.bf16.msra.mxu2 %v3513_v55  ;;  %v4332_v55 = vld [vmem:[#allocation2 + $0x504] sm:$0xf]  ;;  %v3409_v5 = vor.u32 %v4316_v53, %v3406_v54  ;;  %v3694_v47 = vld [vmem:[#allocation2 + $0x6c8] sm:$0xf0]  ;;  %v3633_v54 = vor.u32 %v4372_v43, %v3630_v44  ;;  %v4418_v3 = vld [vmem:[#allocation2 + $0x7b4] sm:$0xf] }
  0xd3   :  { %1995 = vmatpush.bf16.msra.mxu3 %v3577_v58  ;;  %v4348_v58 = vld [vmem:[#allocation2 + $0x584] sm:$0xf]  ;;  %v3473_v6 = vor.u32 %v4332_v55, %v3470_v57  ;;  %v4370_v57 = vld [vmem:[#allocation2 + $0x634] sm:$0xf]  ;;  %v3614_v7 = vld [vmem:[#allocation2 + $0x628] sm:$0xf0] }
  0xd4   :  { %1957 = vmatpush.bf16.msra.mxu0 %v3377_v63  ;;  %v1731_v60 = vpop.f32.mrf.mxu2  ;;  %v3345_v63 = vor.u32 %v4300_v49, %v3342_v50  ;;  %v3537_v27 = vor.u32 %v4348_v58, %v3534_v59  ;;  %v3758_v49 = vld [vmem:[#allocation2 + $0x748] sm:$0xf0]  ;;  %v3622_v58 = vld [vmem:[#allocation2 + $0x638] sm:$0xf0]  ;;  %v4386_v59 = vld [vmem:[#allocation2 + $0x6b4] sm:$0xf] }
  0xd5   :  { %1970 = vmatpush.bf16.msra.mxu1 %v3441_v2  ;;  %v1744_v61 = vpop.f32.mrf.mxu3  ;;  %v4410_v2 = vld [vmem:[#allocation2 + $0x774] sm:$0xf]  ;;  %v3697_v60 = vor.u32 %v4388_v45, %v3694_v47  ;;  %v3742_v28 = vld [vmem:[#allocation2 + $0x728] sm:$0xf0]  ;;  %v3606_v21 = vld [vmem:[#allocation2 + $0x618] sm:$0xf0] }
  0xd6   :  { %1983 = vmatpush.bf16.msra.mxu2 %v3505_v4  ;;  %v3782_v4 = vld [vmem:[#allocation2 + $0x778] sm:$0xf0]  ;;  %v4382_v22 = vld [vmem:[#allocation2 + $0x694] sm:$0xf]  ;;  %v4396_v43 = vld [vmem:[#allocation2 + $0x704] sm:$0xf] }
  0xd7   :  { %1996 = vmatpush.bf16.msra.mxu3 %v3569_v9  ;;  %v3657_v9 = vor.u32 %v4378_v0, %v3654_v62  ;;  %v3785_v11 = vor.u32 %v4410_v2, %v3782_v4  ;;  %v3686_v62 = vld [vmem:[#allocation2 + $0x6b8] sm:$0xf0]  ;;  %v3625_v4 = vor.u32 %v4370_v57, %v3622_v58  ;;  %v3726_v44 = vld [vmem:[#allocation2 + $0x708] sm:$0xf0] }
  0xd8   :  { %1958 = vmatpush.bf16.msra.mxu0 %v3369_v13  ;;  %v3710_v13 = vld [vmem:[#allocation2 + $0x6e8] sm:$0xf0]  ;;  %v3814_v2 = vld [vmem:[#allocation2 + $0x7b8] sm:$0xf0] }
  0xd9   :  { %1971 = vmatpush.bf16.msra.mxu1 %v3433_v14  ;;  %v4408_v14 = vld [vmem:[#allocation2 + $0x764] sm:$0xf]  ;;  %v3713_v19 = vor.u32 %v4392_v12, %v3710_v13  ;;  %v3806_v13 = vld [vmem:[#allocation2 + $0x7a8] sm:$0xf0]  ;;  %v3734_v26 = vld [vmem:[#allocation2 + $0x718] sm:$0xf0] }
  0xda   :  { %1984 = vmatpush.bf16.msra.mxu2 %v3497_v15  ;;  %v3774_v15 = vld [vmem:[#allocation2 + $0x768] sm:$0xf0] }
  0xdb   :  { %1997 = vmatpush.bf16.msra.mxu3 %v3561_v20  ;;  %v3777_v20 = vor.u32 %v4408_v14, %v3774_v15  ;;  %v3790_v47 = vld [vmem:[#allocation2 + $0x788] sm:$0xf0] }
  0xdc   :  { %1959 = vmatpush.bf16.msra.mxu0 %v3361_v31  ;;  %v3766_v31 = vld [vmem:[#allocation2 + $0x758] sm:$0xf0] }
  0xdd   :  { %1972 = vmatpush.bf16.msra.mxu1 %v3425_v35  ;;  %v4518_v35 = vld [vmem:[#allocation1 + $0x9] sm:$0xff] }
  0xde   :  { %1985 = vmatpush.bf16.msra.mxu2 %v3489_v37  ;;  %v4422_v37 = vld [vmem:[#allocation2 + $0x7d4] sm:$0xf] }
  0xdf   :  { %1998 = vmatpush.bf16.msra.mxu3 %v3553_v42  ;;  %v3769_v42 = vor.u32 %v4406_v30, %v3766_v31  ;;  %v3833_v46 = vor.u32 %v4422_v37, %v3830_v38  ;;  %v4414_v30 = vld [vmem:[#allocation2 + $0x794] sm:$0xf]  ;;  %v3798_v31 = vld [vmem:[#allocation2 + $0x798] sm:$0xf0]  ;;  %v4364_v38 = vld [vmem:[#allocation2 + $0x604] sm:$0xf] }
  0xe0   :  { %1960 = vmatpush.bf16.msra.mxu0 %v3353_v48  ;;  %v4404_v48 = vld [vmem:[#allocation2 + $0x744] sm:$0xf] }
  0xe1   :  { %1973 = vmatpush.bf16.msra.mxu1 %v3417_v51  ;;  %v4420_v51 = vld [vmem:[#allocation2 + $0x7c4] sm:$0xf] }
  0xe2   :  { %1986 = vmatpush.bf16.msra.mxu2 %v3481_v52  ;;  %v3822_v52 = vld [vmem:[#allocation2 + $0x7c8] sm:$0xf0] }
  0xe3   :  { %1999 = vmatpush.bf16.msra.mxu3 %v3545_v56  ;;  %v3761_v56 = vor.u32 %v4404_v48, %v3758_v49  ;;  %v3825_v61 = vor.u32 %v4420_v51, %v3822_v52  ;;  %v3729_v51 = vor.u32 %v4396_v43, %v3726_v44  ;;  %v4086_v43 = vld [vmem:[%s5180_s4 + $0x1e8] sm:$0xf0]  ;;  %v3948_v44 = vld [vmem:[%s5180_s4 + $0xc0] sm:$0xf] }
  0xe4   :  { %1961 = vmatpush.bf16.msra.mxu0 %v3345_v63  ;;  %v1755_v50 = vpop.f32.mrf.mxu0  ;;  %v3750_v63 = vld [vmem:[#allocation2 + $0x738] sm:$0xf0] }
  0xe5   :  { %1974 = vmatpush.bf16.msra.mxu1 %v3409_v5  ;;  %v1756_v53 = vadd.f32 %v1755_v50, %v4680_v32  ;;  %v1768_v55 = vpop.f32.mrf.mxu1  ;;  %v3689_v32 = vor.u32 %v4386_v59, %v3686_v62  ;;  %v3753_v5 = vor.u32 %v4402_v1, %v3750_v63 }
  0xe6   :  { %1987 = vmatpush.bf16.msra.mxu2 %v3473_v6  ;;  %v4368_v6 = vld [vmem:[#allocation2 + $0x624] sm:$0xf] }
  0xe7   :  { %2000 = vmatpush.bf16.msra.mxu3 %v3537_v27  ;;  %1962 = vmatmul.bf16.vlgmr.msra.gmra.mxu0 %v4516_v24  ;;  %v1769_v0 = vadd.f32 %v1768_v55, %v1756_v53  ;;  %v3817_v27 = vor.u32 %v4418_v3, %v3814_v2  ;;  %v3617_v15 = vor.u32 %v4368_v6, %v3614_v7  ;;  %v3670_v24 = vld [vmem:[#allocation2 + $0x698] sm:$0xf0]  ;;  %v4522_v55 = vld [vmem:[#allocation1 + $0x36] sm:$0xff] }
  0xe8   :  { %2006 = vmatpush.bf16.msrb.mxu0 %v3657_v9  ;;  %1975 = vmatmul.bf16.vlgmr.msra.gmra.mxu1 %v4518_v35  ;;  %v3673_v35 = vor.u32 %v4382_v22, %v3670_v24  ;;  %v4520_v53 = vld [vmem:[#allocation1 + $0x24] sm:$0xff] }
  0xe9   :  { %2019 = vmatpush.bf16.msrb.mxu1 %v3721_v10  ;;  %1988 = vmatmul.bf16.vlgmr.msra.gmra.mxu2 %v4517_v33  ;;  %v3678_v10 = vld [vmem:[#allocation2 + $0x6a8] sm:$0xf0] }
  0xea   :  { %2032 = vmatpush.bf16.msrb.mxu2 %v3785_v11  ;;  %2001 = vmatmul.bf16.vlgmr.msra.gmra.mxu3 %v4519_v39  ;;  %v4400_v11 = vld [vmem:[#allocation2 + $0x724] sm:$0xf]  ;;  %v3598_v39 = vld [vmem:[#allocation2 + $0x608] sm:$0xf0] }
  0xeb   :  { %2045 = vmatpush.bf16.msrb.mxu3 %v3849_v34  ;;  %v4416_v34 = vld [vmem:[#allocation2 + $0x7a4] sm:$0xf]  ;;  %v3601_v49 = vor.u32 %v4364_v38, %v3598_v39  ;;  %v4489_v38 = vld [vmem:[%s5180_s4 + $0x1e4] sm:$0xf0] }
  0xec   :  { %2007 = vmatpush.bf16.msrb.mxu0 %v3649_v18  ;;  %v1781_v9 = vpop.f32.mrf.mxu2  ;;  %v1757_v14 = vpop.f32.mrf.mxu0  ;;  %v3681_v18 = vor.u32 %v4384_v8, %v3678_v10  ;;  %v3809_v23 = vor.u32 %v4416_v34, %v3806_v13  ;;  %v4076_v13 = vld [vmem:[%s5180_s4 + $0x1c0] sm:$0xf] }
  0xed   :  { %2020 = vmatpush.bf16.msrb.mxu1 %v3713_v19  ;;  %v1782_v29 = vadd.f32 %v1781_v9, %v1769_v0  ;;  %v1794_v12 = vpop.f32.mrf.mxu3  ;;  %v1770_v16 = vpop.f32.mrf.mxu1  ;;  %v3745_v19 = vor.u32 %v4400_v11, %v3742_v28 }
  0xee   :  { %2033 = vmatpush.bf16.msrb.mxu2 %v3777_v20  ;;  %v4366_v20 = vld [vmem:[#allocation2 + $0x614] sm:$0xf]  ;;  %v4044_v16 = vld [vmem:[%s5180_s4 + $0x180] sm:$0xf] }
  0xef   :  { %2046 = vmatpush.bf16.msrb.mxu3 %v3841_v25  ;;  %v1795_v17 = vadd.f32 %v1794_v12, %v1782_v29  ;;  %v4398_v25 = vld [vmem:[#allocation2 + $0x714] sm:$0xf]  ;;  %v3609_v33 = vor.u32 %v4366_v20, %v3606_v21  ;;  %v4012_v20 = vld [vmem:[%s5180_s4 + $0x140] sm:$0xf] }
  0xf0   :  { %2008 = vmatpush.bf16.msrb.mxu0 %v3641_v40  ;;  %v3737_v37 = vor.u32 %v4398_v25, %v3734_v26  ;;  %v4380_v40 = vld [vmem:[#allocation2 + $0x684] sm:$0xf]  ;;  %v4472_v21 = vld [vmem:[%s5180_s4 + $0x15c] sm:$0xf0] }
  0xf1   :  { %2021 = vmatpush.bf16.msrb.mxu1 %v3705_v41  ;;  %v3801_v41 = vor.u32 %v4414_v30, %v3798_v31  ;;  %v3980_v25 = vld [vmem:[%s5180_s4 + $0x100] sm:$0xf]  ;;  %v4484_v30 = vld [vmem:[%s5180_s4 + $0x1c4] sm:$0xf] }
  0xf2   :  { %2034 = vmatpush.bf16.msrb.mxu2 %v3769_v42  ;;  %v3662_v42 = vld [vmem:[#allocation2 + $0x688] sm:$0xf0]  ;;  %v4464_v26 = vld [vmem:[%s5180_s4 + $0x11c] sm:$0xf0] }
  0xf3   :  { %2047 = vmatpush.bf16.msrb.mxu3 %v3833_v46  ;;  %v4412_v46 = vld [vmem:[#allocation2 + $0x784] sm:$0xf]  ;;  %v3665_v50 = vor.u32 %v4380_v40, %v3662_v42 }
  0xf4   :  { %2009 = vmatpush.bf16.msrb.mxu0 %v3633_v54  ;;  %v1783_v45 = vpop.f32.mrf.mxu2  ;;  %v3793_v52 = vor.u32 %v4412_v46, %v3790_v47  ;;  %v4521_v54 = vld [vmem:[#allocation1 + $0x2d] sm:$0xff]  ;;  %v4456_v46 = vld [vmem:[%s5180_s4 + $0xdc] sm:$0xf0]  ;;  %v4476_v47 = vld [vmem:[%s5180_s4 + $0x184] sm:$0xf] }
  0xf5   :  { %2022 = vmatpush.bf16.msrb.mxu1 %v3697_v60  ;;  %v1796_v48 = vpop.f32.mrf.mxu3  ;;  %v4523_v60 = vld [vmem:[#allocation1 + $0x3f] sm:$0xff]  ;;  %v4485_v42 = vld [vmem:[%s5180_s4 + $0x1cc] sm:$0xf] }
  0xf6   :  { %2035 = vmatpush.bf16.msrb.mxu2 %v3761_v56  ;;  %v4089_v45 = vor.u32 %v4485_v42, %v4086_v43  ;;  %v4046_v48 = vld [vmem:[%s5180_s4 + $0x1a0] sm:$0xf0]  ;;  %v3924_v43 = vld [vmem:[%s5180_s4 + $0x88] sm:$0xf] }
  0xf7   :  { %2048 = vmatpush.bf16.msrb.mxu3 %v3825_v61  ;;  %v3918_v42 = vld [vmem:[%s5180_s4 + $0xa0] sm:$0xf0] }
  0xf8   :  { %2010 = vmatpush.bf16.msrb.mxu0 %v3625_v4 }
  0xf9   :  { %2023 = vmatpush.bf16.msrb.mxu1 %v3689_v32  ;;  %v323_v32 = vperm.slane %v4673_v36, 1  ;;  %v4488_v36 = vld [vmem:[%s5180_s4 + $0x1dc] sm:$0xf0] }
  0xfa   :  { %2036 = vmatpush.bf16.msrb.mxu2 %v3753_v5  ;;  %v4077_v14 = vor.u32 %v4488_v36, %v4076_v13 }
  0xfb   :  { %2049 = vmatpush.bf16.msrb.mxu3 %v3817_v27 }
  0xfc   :  { %2011 = vmatpush.bf16.msrb.mxu0 %v3617_v15 }
  0xfd   :  { %2024 = vmatpush.bf16.msrb.mxu1 %v3681_v18 }
  0xfe   :  { %2037 = vmatpush.bf16.msrb.mxu2 %v3745_v19 }
  0xff   :  { %2050 = vmatpush.bf16.msrb.mxu3 %v3809_v23  ;;  %v4013_v23 = vor.u32 %v4472_v21, %v4012_v20  ;;  %v4452_v20 = vld [vmem:[%s5180_s4 + $0xc4] sm:$0xf] }
 0x100   :  { %2012 = vmatpush.bf16.msrb.mxu0 %v3609_v33  ;;  %v3981_v33 = vor.u32 %v4464_v26, %v3980_v25  ;;  %v3950_v21 = vld [vmem:[%s5180_s4 + $0xe0] sm:$0xf0]  ;;  %v4457_v26 = vld [vmem:[%s5180_s4 + $0xe4] sm:$0xf0] }
 0x101   :  { %2025 = vmatpush.bf16.msrb.mxu1 %v3673_v35  ;;  %v4078_v35 = vld [vmem:[%s5180_s4 + $0x1e0] sm:$0xf0]  ;;  %v3953_v25 = vor.u32 %v4452_v20, %v3950_v21  ;;  %v4487_v20 = vld [vmem:[%s5180_s4 + $0x1dc] sm:$0xf] }
 0x102   :  { %2038 = vmatpush.bf16.msrb.mxu2 %v3737_v37  ;;  %v4084_v37 = vld [vmem:[%s5180_s4 + $0x1c8] sm:$0xf]  ;;  %v4081_v40 = vor.u32 %v4484_v30, %v4078_v35  ;;  %v4453_v30 = vld [vmem:[%s5180_s4 + $0xcc] sm:$0xf] }
 0x103   :  { %2051 = vmatpush.bf16.msrb.mxu3 %v3801_v41  ;;  %v4085_v41 = vor.u32 %v4489_v38, %v4084_v37  ;;  %v4092_v37 = vld [vmem:[%s5180_s4 + $0x1d0] sm:$0xf] }
 0x104   :  { %2013 = vmatpush.bf16.msrb.mxu0 %v3601_v49  ;;  %v1807_v56 = vpop.f32.mrf.mxu0  ;;  %v3949_v49 = vor.u32 %v4456_v46, %v3948_v44  ;;  %v4490_v38 = vld [vmem:[%s5180_s4 + $0x1ec] sm:$0xf0]  ;;  %v4449_v46 = vld [vmem:[%s5180_s4 + $0xa4] sm:$0xf0] }
 0x105   :  { %2026 = vmatpush.bf16.msrb.mxu1 %v3665_v50  ;;  %v1808_v57 = vadd.f32 %v1807_v56, %v1795_v17  ;;  %v1820_v58 = vpop.f32.mrf.mxu1  ;;  %v4480_v17 = vld [vmem:[%s5180_s4 + $0x19c] sm:$0xf0]  ;;  %v4049_v50 = vor.u32 %v4476_v47, %v4046_v48  ;;  %v4445_v47 = vld [vmem:[%s5180_s4 + $0x8c] sm:$0xf] }
 0x106   :  { %2039 = vmatpush.bf16.msrb.mxu2 %v3729_v51  ;;  %v4045_v19 = vor.u32 %v4480_v17, %v4044_v16  ;;  %v4052_v51 = vld [vmem:[%s5180_s4 + $0x188] sm:$0xf]  ;;  %v4448_v56 = vld [vmem:[%s5180_s4 + $0x9c] sm:$0xf0]  ;;  %v3926_v48 = vld [vmem:[%s5180_s4 + $0xa8] sm:$0xf0] }
 0x107   :  { %2052 = vmatpush.bf16.msrb.mxu3 %v3793_v52  ;;  %2014 = vmatmul.bf16.vlgmr.msrb.gmra.mxu0 %v4520_v53  ;;  %v1821_v59 = vadd.f32 %v1820_v58, %v1808_v57  ;;  %v4481_v52 = vld [vmem:[%s5180_s4 + $0x1a4] sm:$0xf0]  ;;  %v4477_v53 = vld [vmem:[%s5180_s4 + $0x18c] sm:$0xf]  ;;  %v3852_v16 = vld [vmem:[%s5180_s4] sm:$0xf] }
 0x108   :  { %2027 = vmatmul.bf16.vlgmr.msrb.gmra.mxu1 %v4521_v54  ;;  %2474 = vmatpush.bf16.msra.mxu0 %v4077_v14  ;;  %v4053_v54 = vor.u32 %v4481_v52, %v4052_v51  ;;  %v4432_v17 = vld [vmem:[%s5180_s4 + $0x1c] sm:$0xf0]  ;;  %v4060_v51 = vld [vmem:[%s5180_s4 + $0x190] sm:$0xf] }
 0x109   :  { %2040 = vmatmul.bf16.vlgmr.msrb.gmra.mxu2 %v4522_v55  ;;  %2487 = vmatpush.bf16.msra.mxu1 %v4081_v40  ;;  %v4054_v55 = vld [vmem:[%s5180_s4 + $0x1a8] sm:$0xf0]  ;;  %v4482_v52 = vld [vmem:[%s5180_s4 + $0x1ac] sm:$0xf0] }
 0x10a   :  { %2053 = vmatmul.bf16.vlgmr.msrb.gmra.mxu3 %v4523_v60  ;;  %2500 = vmatpush.bf16.msra.mxu2 %v4085_v41  ;;  %v3916_v60 = vld [vmem:[%s5180_s4 + $0x80] sm:$0xf]  ;;  %v4057_v58 = vor.u32 %v4477_v53, %v4054_v55  ;;  %v4444_v41 = vld [vmem:[%s5180_s4 + $0x84] sm:$0xf]  ;;  %v4061_v53 = vor.u32 %v4482_v52, %v4060_v51  ;;  %v4470_v52 = vld [vmem:[%s5180_s4 + $0x154] sm:$0xf] }
 0x10b   :  { %2513 = vmatpush.bf16.msra.mxu3 %v4089_v45  ;;  %v3921_v45 = vor.u32 %v4444_v41, %v3918_v42  ;;  %v3886_v55 = vld [vmem:[%s5180_s4 + $0x60] sm:$0xf0]  ;;  %v4483_v41 = vld [vmem:[%s5180_s4 + $0x1b4] sm:$0xf0]  ;;  %v4479_v42 = vld [vmem:[%s5180_s4 + $0x19c] sm:$0xf] }
 0x10c   :  { %v1833_v61 = vpop.f32.mrf.mxu2  ;;  %v1809_v1 = vpop.f32.mrf.mxu0  ;;  %2475 = vmatpush.bf16.msra.mxu0 %v4045_v19  ;;  %v3853_v19 = vor.u32 %v4432_v17, %v3852_v16  ;;  %v4100_v16 = vld [vmem:[%s5180_s4 + $0x1d8] sm:$0xf] }
 0x10d   :  { %v1834_v0 = vadd.f32 %v1833_v61, %v1821_v59  ;;  %v1846_v62 = vpop.f32.mrf.mxu3  ;;  %v1822_v63 = vpop.f32.mrf.mxu1  ;;  %v4468_v59 = vld [vmem:[%s5180_s4 + $0x144] sm:$0xf]  ;;  %v4473_v1 = vld [vmem:[%s5180_s4 + $0x164] sm:$0xf0]  ;;  %2488 = vmatpush.bf16.msra.mxu1 %v4049_v50  ;;  %v3929_v50 = vor.u32 %v4445_v47, %v3926_v48  ;;  %v3932_v48 = vld [vmem:[%s5180_s4 + $0x90] sm:$0xf] }
 0x10e   :  { %v4014_v61 = vld [vmem:[%s5180_s4 + $0x160] sm:$0xf0]  ;;  %v4469_v63 = vld [vmem:[%s5180_s4 + $0x14c] sm:$0xf]  ;;  %2501 = vmatpush.bf16.msra.mxu2 %v4053_v54 }
 0x10f   :  { %v4683_v3 = vadd.f32 %v1846_v62, %v1834_v0  ;;  %v4020_v0 = vld [vmem:[%s5180_s4 + $0x148] sm:$0xf]  ;;  %2514 = vmatpush.bf16.msra.mxu3 %v4057_v58  ;;  %v4436_v54 = vld [vmem:[%s5180_s4 + $0x44] sm:$0xf] }
 0x110   :  { %2476 = vmatpush.bf16.msra.mxu0 %v4013_v23  ;;  %v3956_v23 = vld [vmem:[%s5180_s4 + $0xc8] sm:$0xf] }
 0x111   :  { %v4441_v58 = vld [vmem:[%s5180_s4 + $0x64] sm:$0xf0] }
 0x114   :  { %v1835_v2 = vpop.f32.mrf.mxu2  ;;  %2477 = vmatpush.bf16.msra.mxu0 %v3981_v33  ;;  %v3957_v33 = vor.u32 %v4457_v26, %v3956_v23  ;;  %v3964_v26 = vld [vmem:[%s5180_s4 + $0xd0] sm:$0xf] }
 0x115   :  { %v1848_v4 = vpop.f32.mrf.mxu3  ;;  %v4022_v2 = vld [vmem:[%s5180_s4 + $0x168] sm:$0xf0] }
 0x116   :  { %v3917_v4 = vor.u32 %v4448_v56, %v3916_v60  ;;  %v3892_v60 = vld [vmem:[%s5180_s4 + $0x48] sm:$0xf] }
 0x118   :  { %2478 = vmatpush.bf16.msra.mxu0 %v3949_v49  ;;  %v3925_v49 = vor.u32 %v4449_v46, %v3924_v43  ;;  %v4070_v43 = vld [vmem:[%s5180_s4 + $0x1b8] sm:$0xf0] }
 0x119   :  { %v4073_v47 = vor.u32 %v4479_v42, %v4070_v43  ;;  %v3910_v42 = vld [vmem:[%s5180_s4 + $0x78] sm:$0xf0] }
 0x11c   :  { %2479 = vmatpush.bf16.msra.mxu0 %v3917_v4 }
 0x124   :  { %v1859_v5 = vpop.f32.mrf.mxu0 }
 0x125   :  { %v1860_v6 = vadd.f32 %v1859_v5, %v323_v32  ;;  %v1872_v7 = vpop.f32.mrf.mxu1  ;;  %v4017_v32 = vor.u32 %v4468_v59, %v4014_v61  ;;  %v3884_v5 = vld [vmem:[%s5180_s4 + $0x40] sm:$0xf]  ;;  %v4437_v59 = vld [vmem:[%s5180_s4 + $0x4c] sm:$0xf] }
 0x126   :  { %v3894_v61 = vld [vmem:[%s5180_s4 + $0x68] sm:$0xf0] }
 0x127   :  { %v1873_v8 = vadd.f32 %v1872_v7, %v1860_v6  ;;  %v4440_v6 = vld [vmem:[%s5180_s4 + $0x5c] sm:$0xf0]  ;;  %v4021_v7 = vor.u32 %v4473_v1, %v4020_v0  ;;  %2489 = vmatpush.bf16.msra.mxu1 %v4017_v32  ;;  %v3893_v0 = vor.u32 %v4441_v58, %v3892_v60  ;;  %v4428_v32 = vld [vmem:[%s5180_s4 + $0x4] sm:$0xf]  ;;  %v4471_v60 = vld [vmem:[%s5180_s4 + $0x15c] sm:$0xf] }
 0x129   :  { %2502 = vmatpush.bf16.msra.mxu2 %v4021_v7 }
 0x12c   :  { %v1885_v27 = vpop.f32.mrf.mxu2  ;;  %v1861_v28 = vpop.f32.mrf.mxu0 }
 0x12d   :  { %v1886_v9 = vadd.f32 %v1885_v27, %v1873_v8  ;;  %v1898_v10 = vpop.f32.mrf.mxu3  ;;  %v1874_v29 = vpop.f32.mrf.mxu1  ;;  %v4025_v8 = vor.u32 %v4469_v63, %v4022_v2  ;;  %v4460_v27 = vld [vmem:[%s5180_s4 + $0x104] sm:$0xf]  ;;  %v4465_v28 = vld [vmem:[%s5180_s4 + $0x124] sm:$0xf0] }
 0x12e   :  { %v4461_v29 = vld [vmem:[%s5180_s4 + $0x10c] sm:$0xf] }
 0x12f   :  { %v4686_v11 = vadd.f32 %v1898_v10, %v1886_v9  ;;  %v3982_v9 = vld [vmem:[%s5180_s4 + $0x120] sm:$0xf0]  ;;  %v3988_v10 = vld [vmem:[%s5180_s4 + $0x108] sm:$0xf]  ;;  %2515 = vmatpush.bf16.msra.mxu3 %v4025_v8 }
 0x130   :  { %v3985_v13 = vor.u32 %v4460_v27, %v3982_v9  ;;  %v3989_v36 = vor.u32 %v4465_v28, %v3988_v10  ;;  %v4433_v9 = vld [vmem:[%s5180_s4 + $0x24] sm:$0xf0]  ;;  %v4429_v10 = vld [vmem:[%s5180_s4 + $0xc] sm:$0xf] }
 0x132   :  { %2490 = vmatpush.bf16.msra.mxu1 %v3985_v13  ;;  %2503 = vmatpush.bf16.msra.mxu2 %v3989_v36  ;;  %v4486_v36 = vld [vmem:[%s5180_s4 + $0x1d4] sm:$0xf] }
 0x134   :  { %v1887_v12 = vpop.f32.mrf.mxu2 }
 0x135   :  { %v1900_v34 = vpop.f32.mrf.mxu3  ;;  %v3990_v12 = vld [vmem:[%s5180_s4 + $0x128] sm:$0xf0] }
 0x136   :  { %v3885_v34 = vor.u32 %v4440_v6, %v3884_v5  ;;  %v3993_v14 = vor.u32 %v4461_v29, %v3990_v12  ;;  %2491 = vmatpush.bf16.msra.mxu1 %v3953_v25  ;;  %2504 = vmatpush.bf16.msra.mxu2 %v3957_v33  ;;  %v3854_v5 = vld [vmem:[%s5180_s4 + $0x20] sm:$0xf0]  ;;  %v3860_v6 = vld [vmem:[%s5180_s4 + $0x8] sm:$0xf]  ;;  %v3862_v29 = vld [vmem:[%s5180_s4 + $0x28] sm:$0xf0] }
 0x137   :  { %v3857_v27 = vor.u32 %v4428_v32, %v3854_v5  ;;  %v3861_v28 = vor.u32 %v4433_v9, %v3860_v6  ;;  %v4466_v12 = vld [vmem:[%s5180_s4 + $0x12c] sm:$0xf0]  ;;  %v4102_v25 = vld [vmem:[%s5180_s4 + $0x1f8] sm:$0xf0] }
 0x138   :  { %2480 = vmatpush.bf16.msra.mxu0 %v3885_v34  ;;  %2516 = vmatpush.bf16.msra.mxu3 %v3993_v14  ;;  %v3865_v34 = vor.u32 %v4429_v10, %v3862_v29  ;;  %v4094_v14 = vld [vmem:[%s5180_s4 + $0x1f0] sm:$0xf0]  ;;  %v4463_v32 = vld [vmem:[%s5180_s4 + $0x11c] sm:$0xf]  ;;  %v4434_v9 = vld [vmem:[%s5180_s4 + $0x2c] sm:$0xf0] }
 0x139   :  { %v4097_v17 = vor.u32 %v4486_v36, %v4094_v14  ;;  %v4006_v5 = vld [vmem:[%s5180_s4 + $0x138] sm:$0xf0]  ;;  %v3966_v29 = vld [vmem:[%s5180_s4 + $0xf0] sm:$0xf0] }
 0x13a   :  { %2492 = vmatpush.bf16.msra.mxu1 %v3921_v45  ;;  %2505 = vmatpush.bf16.msra.mxu2 %v3925_v49  ;;  %v4450_v49 = vld [vmem:[%s5180_s4 + $0xac] sm:$0xf0] }
 0x13b   :  { %v3933_v51 = vor.u32 %v4450_v49, %v3932_v48  ;;  %v4430_v49 = vld [vmem:[%s5180_s4 + $0x14] sm:$0xf] }
 0x13c   :  { %2481 = vmatpush.bf16.msra.mxu0 %v3853_v19  ;;  %v4491_v19 = vld [vmem:[%s5180_s4 + $0x1f4] sm:$0xf0] }
 0x13d   :  { %v4101_v23 = vor.u32 %v4491_v19, %v4100_v16  ;;  %v4446_v16 = vld [vmem:[%s5180_s4 + $0x94] sm:$0xf]  ;;  %v3940_v19 = vld [vmem:[%s5180_s4 + $0x98] sm:$0xf] }
 0x13e   :  { %2506 = vmatpush.bf16.msra.mxu2 %v3893_v0  ;;  %v4442_v0 = vld [vmem:[%s5180_s4 + $0x6c] sm:$0xf0] }
 0x142   :  { %2507 = vmatpush.bf16.msra.mxu2 %v3861_v28 }
 0x144   :  { %v4694_v15 = vpop.f32.mrf.mxu0 }
 0x145   :  { %v4702_v18 = vpop.f32.mrf.mxu1  ;;  %v1912_v56 = vadd.f32 %v4694_v15, %v4686_v11  ;;  %v4028_v11 = vld [vmem:[%s5180_s4 + $0x150] sm:$0xf] }
 0x146   :  { %v4474_v15 = vld [vmem:[%s5180_s4 + $0x16c] sm:$0xf0]  ;;  %2552 = vmatpush.bf16.msrb.mxu2 %v4101_v23  ;;  %v4451_v23 = vld [vmem:[%s5180_s4 + $0xb4] sm:$0xf0] }
 0x147   :  { %v4029_v63 = vor.u32 %v4474_v15, %v4028_v11  ;;  %v1925_v7 = vadd.f32 %v4702_v18, %v1912_v56  ;;  %v3996_v18 = vld [vmem:[%s5180_s4 + $0x110] sm:$0xf]  ;;  %v4038_v56 = vld [vmem:[%s5180_s4 + $0x178] sm:$0xf0]  ;;  %v4462_v11 = vld [vmem:[%s5180_s4 + $0x114] sm:$0xf] }
 0x148   :  { %v3997_v13 = vor.u32 %v4466_v12, %v3996_v18  ;;  %v4004_v15 = vld [vmem:[%s5180_s4 + $0x118] sm:$0xf] }
 0x149   :  { %v3972_v18 = vld [vmem:[%s5180_s4 + $0xd8] sm:$0xf] }
 0x14c   :  { %v4710_v22 = vpop.f32.mrf.mxu2  ;;  %v1913_v31 = vpop.f32.mrf.mxu0 }
 0x14d   :  { %v4712_v24 = vpop.f32.mrf.mxu3  ;;  %v1926_v39 = vpop.f32.mrf.mxu1  ;;  %v3958_v31 = vld [vmem:[%s5180_s4 + $0xe8] sm:$0xf0]  ;;  %v1938_v21 = vadd.f32 %v4710_v22, %v1925_v7  ;;  %v4478_v22 = vld [vmem:[%s5180_s4 + $0x194] sm:$0xf] }
 0x14e   :  { %v3961_v35 = vor.u32 %v4453_v30, %v3958_v31  ;;  %v4093_v39 = vor.u32 %v4490_v38, %v4092_v37  ;;  %v4458_v30 = vld [vmem:[%s5180_s4 + $0xec] sm:$0xf0]  ;;  %v4105_v31 = vor.u32 %v4487_v20, %v4102_v25  ;;  %v4068_v37 = vld [vmem:[%s5180_s4 + $0x198] sm:$0xf]  ;;  %v4447_v25 = vld [vmem:[%s5180_s4 + $0x9c] sm:$0xf] }
 0x14f   :  { %v3965_v33 = vor.u32 %v4458_v30, %v3964_v26  ;;  %v4069_v46 = vor.u32 %v4483_v41, %v4068_v37  ;;  %v3942_v26 = vld [vmem:[%s5180_s4 + $0xb8] sm:$0xf0]  ;;  %v3902_v37 = vld [vmem:[%s5180_s4 + $0x70] sm:$0xf0] }
 0x150   :  { %2517 = vmatpush.bf16.msra.mxu3 %v3961_v35  ;;  %2526 = vmatpush.bf16.msrb.mxu0 %v4093_v39  ;;  %v4062_v35 = vld [vmem:[%s5180_s4 + $0x1b0] sm:$0xf0]  ;;  %v4439_v41 = vld [vmem:[%s5180_s4 + $0x5c] sm:$0xf] }
 0x151   :  { %v4065_v39 = vor.u32 %v4478_v22, %v4062_v35  ;;  %2553 = vmatpush.bf16.msrb.mxu2 %v4069_v46  ;;  %v3945_v22 = vor.u32 %v4447_v25, %v3942_v26  ;;  %v4438_v35 = vld [vmem:[%s5180_s4 + $0x54] sm:$0xf]  ;;  %v3913_v48 = vor.u32 %v4439_v41, %v3910_v42 }
 0x152   :  { %v3905_v43 = vor.u32 %v4438_v35, %v3902_v37  ;;  %v4505_v37 = vld [vmem:[%s5186_s10 + $0x8] sm:$0xff] }
 0x154   :  { %v1939_v57 = vpop.f32.mrf.mxu2  ;;  %2518 = vmatpush.bf16.msra.mxu3 %v3929_v50  ;;  %2527 = vmatpush.bf16.msrb.mxu0 %v4061_v53  ;;  %v1951_v50 = vadd.f32 %v4712_v24, %v1938_v21  ;;  %v4030_v53 = vld [vmem:[%s5180_s4 + $0x170] sm:$0xf0]  ;;  %v4475_v24 = vld [vmem:[%s5180_s4 + $0x174] sm:$0xf0] }
 0x155   :  { %v1952_v62 = vpop.f32.mrf.mxu3  ;;  %v3889_v57 = vor.u32 %v4436_v54, %v3886_v55  ;;  %v4036_v54 = vld [vmem:[%s5180_s4 + $0x158] sm:$0xf]  ;;  %v4033_v55 = vor.u32 %v4470_v52, %v4030_v53 }
 0x156   :  { %v3897_v62 = vor.u32 %v4437_v59, %v3894_v61  ;;  %v4037_v58 = vor.u32 %v4475_v24, %v4036_v54  ;;  %v4041_v59 = vor.u32 %v4471_v60, %v4038_v56  ;;  %v3900_v61 = vld [vmem:[%s5180_s4 + $0x50] sm:$0xf]  ;;  %v4431_v24 = vld [vmem:[%s5180_s4 + $0x1c] sm:$0xf] }
 0x157   :  { %2493 = vmatpush.bf16.msra.mxu1 %v3889_v57  ;;  %v3878_v60 = vld [vmem:[%s5180_s4 + $0x38] sm:$0xf0] }
 0x158   :  { %2519 = vmatpush.bf16.msra.mxu3 %v3897_v62  ;;  %2528 = vmatpush.bf16.msrb.mxu0 %v4029_v63  ;;  %v3901_v62 = vor.u32 %v4442_v0, %v3900_v61  ;;  %v3881_v61 = vor.u32 %v4431_v24, %v3878_v60 }
 0x159   :  { %2554 = vmatpush.bf16.msrb.mxu2 %v4037_v58 }
 0x15b   :  { %2494 = vmatpush.bf16.msra.mxu1 %v3857_v27  ;;  %v3868_v27 = vld [vmem:[%s5180_s4 + $0x10] sm:$0xf] }
 0x15c   :  { %2520 = vmatpush.bf16.msra.mxu3 %v3865_v34  ;;  %2529 = vmatpush.bf16.msrb.mxu0 %v3997_v13  ;;  %v3869_v28 = vor.u32 %v4434_v9, %v3868_v27  ;;  %v4455_v34 = vld [vmem:[%s5180_s4 + $0xdc] sm:$0xf]  ;;  %v4498_v27 = vld [vmem:[%s5182_s6 + $0x30] sm:$0xff]  ;;  %v4497_v9 = vld [vmem:[%s5182_s6 + $0x28] sm:$0xff] }
 0x15d   :  { %v3974_v13 = vld [vmem:[%s5180_s4 + $0xf8] sm:$0xf0] }
 0x15e   :  { %v3977_v14 = vor.u32 %v4455_v34, %v3974_v13 }
 0x15f   :  { %2539 = vmatpush.bf16.msrb.mxu1 %v4097_v17  ;;  %v3934_v17 = vld [vmem:[%s5180_s4 + $0xb0] sm:$0xf0] }
 0x160   :  { %2565 = vmatpush.bf16.msrb.mxu3 %v4105_v31  ;;  %2530 = vmatpush.bf16.msrb.mxu0 %v3965_v33  ;;  %v3937_v31 = vor.u32 %v4446_v16, %v3934_v17 }
 0x163   :  { %2540 = vmatpush.bf16.msrb.mxu1 %v4065_v39  ;;  %v4443_v39 = vld [vmem:[%s5180_s4 + $0x74] sm:$0xf0] }
 0x164   :  { %v4840_v40 = vpop.f32.mrf.mxu0  ;;  %2566 = vmatpush.bf16.msrb.mxu3 %v4073_v47  ;;  %2531 = vmatpush.bf16.msrb.mxu0 %v3933_v51  ;;  %v3876_v51 = vld [vmem:[%s5180_s4 + $0x18] sm:$0xf] }
 0x165   :  { %v4851_v44 = vpop.f32.mrf.mxu1  ;;  %v1964_v57 = vadd.f32 %v4840_v40, %v1951_v50  ;;  %v3998_v40 = vld [vmem:[%s5180_s4 + $0x130] sm:$0xf0] }
 0x166   :  { %v4001_v63 = vor.u32 %v4462_v11, %v3998_v40  ;;  %v3870_v50 = vld [vmem:[%s5180_s4 + $0x30] sm:$0xf0] }
 0x167   :  { %2541 = vmatpush.bf16.msrb.mxu1 %v4033_v55  ;;  %v1977_v6 = vadd.f32 %v4851_v44, %v1964_v57  ;;  %v4454_v44 = vld [vmem:[%s5180_s4 + $0xd4] sm:$0xf]  ;;  %v4435_v55 = vld [vmem:[%s5180_s4 + $0x34] sm:$0xf0]  ;;  %v3873_v57 = vor.u32 %v4430_v49, %v3870_v50 }
 0x168   :  { %2567 = vmatpush.bf16.msrb.mxu3 %v4041_v59  ;;  %2532 = vmatpush.bf16.msrb.mxu0 %v3901_v62  ;;  %v3969_v12 = vor.u32 %v4454_v44, %v3966_v29  ;;  %v3877_v59 = vor.u32 %v4435_v55, %v3876_v51  ;;  %v4493_v44 = vld [vmem:[%s5182_s6 + $0x8] sm:$0xff]  ;;  %v4492_v29 = vld [vmem:[%s5182_s6] sm:$0xff] }
 0x16b   :  { %2542 = vmatpush.bf16.msrb.mxu1 %v4001_v63 }
 0x16c   :  { %v4894_v1 = vpop.f32.mrf.mxu2  ;;  %v1965_v4 = vpop.f32.mrf.mxu0  ;;  %2533 = vmatpush.bf16.msrb.mxu0 %v3869_v28  ;;  %v4494_v28 = vld [vmem:[%s5182_s6 + $0x10] sm:$0xff] }
 0x16d   :  { %v4896_v2 = vpop.f32.mrf.mxu3  ;;  %v1978_v8 = vpop.f32.mrf.mxu1  ;;  %v4467_v4 = vld [vmem:[%s5180_s4 + $0x134] sm:$0xf0]  ;;  %v1990_v10 = vadd.f32 %v4894_v1, %v1977_v6 }
 0x16e   :  { %v4005_v7 = vor.u32 %v4467_v4, %v4004_v15  ;;  %v4009_v8 = vor.u32 %v4463_v32, %v4006_v5  ;;  %v4459_v1 = vld [vmem:[%s5180_s4 + $0xf4] sm:$0xf0]  ;;  %v2065_v4 = vld [vmem:[%s5179_s3] sm:$0x3] }
 0x16f   :  { %v3973_v36 = vor.u32 %v4459_v1, %v3972_v18  ;;  %v2003_v20 = vadd.f32 %v4896_v2, %v1990_v10  ;;  %2543 = vmatpush.bf16.msrb.mxu1 %v3969_v12  ;;  %v3941_v2 = vor.u32 %v4451_v23, %v3940_v19  ;;  %v4495_v10 = vld [vmem:[%s5182_s6 + $0x18] sm:$0xff]  ;;  %v4502_v12 = vld [vmem:[%s5184_s8 + $0x10] sm:$0xff]  ;;  %v4501_v1 = vld [vmem:[%s5184_s8 + $0x8] sm:$0xff] }
 0x170   :  { %2555 = vmatpush.bf16.msrb.mxu2 %v4005_v7  ;;  %2568 = vmatpush.bf16.msrb.mxu3 %v4009_v8  ;;  %v4499_v8 = vld [vmem:[%s5182_s6 + $0x38] sm:$0xff]  ;;  %v4506_v23 = vld [vmem:[%s5186_s10 + $0x10] sm:$0xff] }
 0x171   :  { %v4503_v18 = vld [vmem:[%s5184_s8 + $0x18] sm:$0xff] }
 0x173   :  { %2544 = vmatpush.bf16.msrb.mxu1 %v3937_v31 }
 0x174   :  { %v1991_v38 = vpop.f32.mrf.mxu2  ;;  %2556 = vmatpush.bf16.msrb.mxu2 %v3973_v36  ;;  %2569 = vmatpush.bf16.msrb.mxu3 %v3977_v14  ;;  %v4500_v36 = vld [vmem:[%s5184_s8] sm:$0xff] }
 0x175   :  { %v2004_v45 = vpop.f32.mrf.mxu3  ;;  %v3908_v38 = vld [vmem:[%s5180_s4 + $0x58] sm:$0xf] }
 0x176   :  { %v3909_v46 = vor.u32 %v4443_v39, %v3908_v38 }
 0x177   :  { %2545 = vmatpush.bf16.msrb.mxu1 %v3905_v43 }
 0x178   :  { %2557 = vmatpush.bf16.msrb.mxu2 %v3941_v2  ;;  %2570 = vmatpush.bf16.msrb.mxu3 %v3945_v22 }
 0x17b   :  { %2546 = vmatpush.bf16.msrb.mxu1 %v3873_v57 }
 0x17c   :  { %2558 = vmatpush.bf16.msrb.mxu2 %v3909_v46  ;;  %2571 = vmatpush.bf16.msrb.mxu3 %v3913_v48 }
 0x180   :  { %2559 = vmatpush.bf16.msrb.mxu2 %v3877_v59  ;;  %2572 = vmatpush.bf16.msrb.mxu3 %v3881_v61 }
 0x184   :  { %v2015_v21 = vpop.f32.mrf.mxu0 }
 0x185   :  { %v2028_v30 = vpop.f32.mrf.mxu1  ;;  %v2016_v33 = vadd.f32 %v2015_v21, %v2003_v20  ;;  %v4507_v20 = vld [vmem:[%s5186_s10 + $0x18] sm:$0xff]  ;;  %v2136_v21 = vld [vmem:[%s5181_s5] sm:$0xff] }
 0x186   :  { %v2140_v25 = vperm.slane %v2136_v21, 2  ;;  %v2141_v26 = vperm.slane %v2136_v21, 3  ;;  %v2139_v31 = vperm.slane %v2136_v21, 1  ;;  %v2143_v2 = vperm.slane %v2136_v21, 5 }
 0x187   :  { %v2029_v45 = vadd.f32 %v2028_v30, %v2016_v33  ;;  %v2138_v30 = vperm.slane %v2136_v21, 0  ;;  %v2142_v33 = vperm.slane %v2136_v21, 4  ;;  %v2144_v49 = vperm.slane %v2136_v21, 6 }
 0x188   :  { %v2145_v50 = vperm.slane %v2136_v21, 7 }
 0x18c   :  { %v2041_v47 = vpop.f32.mrf.mxu2  ;;  %v2017_v54 = vpop.f32.mrf.mxu0 }
 0x18d   :  { %v2042_v52 = vadd.f32 %v2041_v47, %v2029_v45  ;;  %v2054_v53 = vpop.f32.mrf.mxu3  ;;  %v2030_v56 = vpop.f32.mrf.mxu1 }
 0x18f   :  { %v2055_v58 = vadd.f32 %v2054_v53, %v2042_v52 }
 0x191   :  { %v2060_v0 = vrot.slane %v2055_v58, 6  ;;  %v2066_v62 = vmul.f32 0.5, %v2055_v58 }
 0x193   :  { %v2062_v11 = vsel %vm2061_vm0, %v4683_v3, %v2060_v0  ;;  %v2067_v40 = vmul.f32 1.442695, %v2066_v62 }
 0x194   :  { %2064 = vst [vmem:[%s5188_s12] sm:$0xf] %v2062_v11  ;;  %v2043_v15 = vpop.f32.mrf.mxu2 }
 0x195   :  { %4514 = vpow2.f32 %v2067_v40  ;;  %v2056_v63 = vpop.f32.mrf.mxu3 }
 0x19b   :  { %v4515_v32 = vpop.eup %4514 }
 0x19c   :  { %v2069_v5 = vmul.f32 %v4515_v32, %v2065_v4 }
 0x19e   :  { %v2070_v6 = vadd.f32 %v2069_v5, %v4683_v3  ;;  %v4496_v3 = vld [vmem:[%s5182_s6 + $0x20] sm:$0xff] }
 0x19f   :  { %v4511_v5 = vld [vmem:[%s5183_s7] ss:$0 sm:$0xff] }
 0x1a0   :  { %v2071_v7 = vpack.c.bf16 %v2070_v6, %v2070_v6 }
 0x1a2   :  { %2482 = vmatmul.bf16.vlgmr.msra.gmra.mxu0 %v2071_v7  ;;  %2495 = vmatmul.bf16.vlgmr.msra.gmra.mxu1 %v2071_v7 }
 0x1a3   :  { %2508 = vmatmul.bf16.vlgmr.msra.gmra.mxu2 %v2071_v7  ;;  %2521 = vmatmul.bf16.vlgmr.msra.gmra.mxu3 %v2071_v7 }
 0x1a4   :  { %2684 = vmatpush.bf16.msra.mxu0 %v4499_v8  ;;  %2743 = vmatpush.bf16.msra.mxu1 %v4503_v18  ;;  %v4504_v18 = vld [vmem:[%s5186_s10] sm:$0xff] }
 0x1a5   :  { %2798 = vmatpush.bf16.msra.mxu2 %v4507_v20 }
 0x1a8   :  { %2685 = vmatpush.bf16.msra.mxu0 %v4498_v27  ;;  %2744 = vmatpush.bf16.msra.mxu1 %v4502_v12  ;;  %v4512_v12 = vld [vmem:[%s5185_s9] ss:$0 sm:$0xff] }
 0x1a9   :  { %2799 = vmatpush.bf16.msra.mxu2 %v4506_v23 }
 0x1ac   :  { %2686 = vmatpush.bf16.msra.mxu0 %v4497_v9  ;;  %2745 = vmatpush.bf16.msra.mxu1 %v4501_v1 }
 0x1ad   :  { %2800 = vmatpush.bf16.msra.mxu2 %v4505_v37 }
 0x1b0   :  { %2687 = vmatpush.bf16.msra.mxu0 %v4496_v3  ;;  %2746 = vmatpush.bf16.msra.mxu1 %v4500_v36 }
 0x1b1   :  { %2801 = vmatpush.bf16.msra.mxu2 %v4504_v18 }
 0x1b2   :  { %2534 = vmatmul.bf16.vlgmr.msrb.gmra.mxu0 %v2071_v7  ;;  %2547 = vmatmul.bf16.vlgmr.msrb.gmra.mxu1 %v2071_v7 }
 0x1b3   :  { %2560 = vmatmul.bf16.vlgmr.msrb.gmra.mxu2 %v2071_v7  ;;  %2573 = vmatmul.bf16.vlgmr.msrb.gmra.mxu3 %v2071_v7 }
 0x1b4   :  { %2688 = vmatpush.bf16.msra.mxu0 %v4495_v10 }
 0x1b8   :  { %2689 = vmatpush.bf16.msra.mxu0 %v4494_v28 }
 0x1bc   :  { %2690 = vmatpush.bf16.msra.mxu0 %v4493_v44 }
 0x1c0   :  { %2691 = vmatpush.bf16.msra.mxu0 %v4492_v29 }
 0x1c3   :  { %2692 = vmatmul.bf16.vlgmr.msra.gmra.mxu0 %v2071_v7 }
 0x21f   :  { %v2483_v34 = vpop.f32.mrf.mxu0  ;;  %v2496_v13 = vpop.f32.mrf.mxu1 }
 0x220   :  { %v2484_v43 = vadd.f32 %v2483_v34, %v2138_v30  ;;  %v2497_v45 = vadd.f32 %v2496_v13, %v2139_v31 }
 0x222   :  { %v2578_v51 = vpack.c.bf16 %v2497_v45, %v2484_v43 }
 0x224   :  { %v2586_v59 = vrot.slane %v2578_v51, 3 }
 0x226   :  { %v2509_v14 = vpop.f32.mrf.mxu2  ;;  %v2522_v16 = vpop.f32.mrf.mxu3  ;;  %v2596_v63 = vsel %vm2593_vm2, %v2578_v51, %v2586_v59 }
 0x227   :  { %v2485_v17 = vpop.f32.mrf.mxu0  ;;  %v2498_v19 = vpop.f32.mrf.mxu1  ;;  %v2510_v38 = vadd.f32 %v2509_v14, %v2140_v25  ;;  %v2523_v39 = vadd.f32 %v2522_v16, %v2141_v26  ;;  %v4513_v14 = vld [vmem:[%s5187_s11] ss:$0 sm:$0xff] }
 0x229   :  { %v2579_v48 = vpack.c.bf16 %v2523_v39, %v2510_v38 }
 0x22b   :  { %v2587_v55 = vrot.slane %v2579_v48, 6  ;;  %v2588_v24 = vrot.slane %v2579_v48, 1 }
 0x22d   :  { %v2600_v11 = vsel %vm2597_vm1, %v2587_v55, %v2588_v24 }
 0x22e   :  { %v2511_v22 = vpop.f32.mrf.mxu2  ;;  %v2524_v35 = vpop.f32.mrf.mxu3  ;;  %v2601_v6 = vsel %vm2061_vm0, %v2596_v63, %v2600_v11 }
 0x22f   :  { %v2535_v41 = vpop.f32.mrf.mxu0  ;;  %v2548_v42 = vpop.f32.mrf.mxu1 }
 0x230   :  { %v2536_v46 = vadd.f32 %v2535_v41, %v2142_v33  ;;  %v2549_v47 = vadd.f32 %v2548_v42, %v2143_v2 }
 0x232   :  { %v2580_v52 = vpack.c.bf16 %v2549_v47, %v2536_v46 }
 0x234   :  { %v2589_v61 = vrot.slane %v2580_v52, 4  ;;  %v2590_v0 = vrot.slane %v2580_v52, 7 }
 0x236   :  { %v2561_v53 = vpop.f32.mrf.mxu2  ;;  %v2574_v54 = vpop.f32.mrf.mxu3  ;;  %v2605_v4 = vsel %vm2602_vm3, %v2589_v61, %v2590_v0 }
 0x237   :  { %v2562_v60 = vadd.f32 %v2561_v53, %v2144_v49  ;;  %v2575_v56 = vadd.f32 %v2574_v54, %v2145_v50  ;;  %v2537_v57 = vpop.f32.mrf.mxu0  ;;  %v2550_v58 = vpop.f32.mrf.mxu1 }
 0x239   :  { %v2581_v62 = vpack.c.bf16 %v2575_v56, %v2562_v60 }
 0x23b   :  { %v2591_v40 = vrot.slane %v2581_v62, 2  ;;  %v2592_v15 = vrot.slane %v2581_v62, 5 }
 0x23d   :  { %v2609_v32 = vsel %vm2606_vm4, %v2591_v40, %v2592_v15 }
 0x23e   :  { %v2611_v7 = vsel %vm2610_vm5, %v2605_v4, %v2609_v32  ;;  %v2563_v8 = vpop.f32.mrf.mxu2  ;;  %v2576_v27 = vpop.f32.mrf.mxu3 }
 0x23f   :  { %v2613_v9 = vsel %vm2612_vm6, %v2601_v6, %v2611_v7 }
 0x240   :  { %2615 = vst [vmem:[%s5189_s13] sm:$0xff] %v2613_v9  ;;  %v2693_v3 = vpop.f32.mrf.mxu0 }
 0x241   :  { %v2694_v10 = vadd.f32 %v4511_v5, %v2693_v3 }
 0x243   :  { %v2697_v28 = vmax.f32 %v2694_v10, 0.0 }
 0x245   :  { %v2698_v44 = vpack.c.bf16 %v2697_v28, %v2697_v28 }
 0x247   :  { %4154 = vmatmul.msk.bf16.vlgmr.msra.gmra.mxu1 %vm2735_vm7, %v2698_v44 }
 0x248   :  { %v2695_v29 = vpop.f32.mrf.mxu0 }
 0x2c4   :  { %v2748_v1 = vpop.f32.mrf.mxu1 }
 0x2c5   :  { %v2749_v34 = vadd.f32 %v4512_v12, %v2748_v1 }
 0x2c7   :  { %2753 = vst.msk [vmem:[%s5190_s14] sm:$0x3] %vm2752_vm8, %v2749_v34  ;;  %v2754_v13 = vpack.c.bf16 %v2749_v34, %v2749_v34 }
 0x2c9   :  { %4171 = vmatmul.msk.bf16.vlgmr.msra.gmra.mxu2 %vm2735_vm7, %v2754_v13 }
 0x2cc   :  { %v2750_v36 = vpop.f32.mrf.mxu1 }
 0x34c   :  { %v2803_v16 = vpop.f32.mrf.mxu2 }
 0x34d   :  { %v2804_v17 = vadd.f32 %v4513_v14, %v2803_v16 }
 0x34f   :  { %2808 = vst.msk [vmem:[%s5191_s15] sm:$0x3] %vm2807_vm9, %v2804_v17 }
 0x354   :  { %v2805_v19 = vpop.f32.mrf.mxu2 }
 0x355   :  { %2825 = vsyncpa [#allocation3], 1 }

// kernel: concept_vae_forward.9
= control target key start
LH: loop header
LB: loop body
LE: loop exit
PB: predicated region body
PF: predicated region fallthrough
CT: control target
= control target key end

     0   :  { %s1186_s12 = smov 0   ;;  %s1369_s0 = inlined_call_operand.vmem [shape: bf16[2,9,9,32], index: 0, kind: input, shape index: {}]   ;;  %s1370_s1 = inlined_call_operand.vmem [shape: bf16[128,12], index: 1, kind: input, shape index: {}]   ;;  %s1371_s2 = inlined_call_operand.vmem [shape: f32[1,12], index: 2, kind: input, shape index: {}]   ;;  %s1372_s3 = inlined_call_operand.vmem [shape: f32[2,64,12], index: 3, kind: output, shape index: {}]  }
   0x1 LB: > { %s977_s13 = sadd.s32 4294967295, %s1164_s12   ;;  %p981_p0 = scmp.ge.s32.totalorder %s1164_s12, 1  ;;  %s1164_s12 = sphi %s1186_s12, %s13_s12  }
   0x2   : > { %p137_p1 = scmp.lt.s32.totalorder %s1164_s12, 3 }
   0x4   : > { %p138_p2 = pnand %p981_p0, %p137_p1 }
   0x5   : > { %p161_p3 = scmp.lt.s32.totalorder (!%p138_p2), %s977_s13, 1 }
   0x6   : > { %141 = sbr.rel (%p138_p2) target bundleno = 256 (0x100), region = 32 }
   0xb   : > { %v1113_v0 = vld [vmem:[%s1370_s1 + $0x28] sm:$0xff]  ;;  %v1107_v2 = vld [vmem:[%s1370_s1 + $0x18] sm:$0xff]  ;;  %v1112_v4 = vld [vmem:[%s1370_s1 + $0x20] sm:$0xff]  ;;  %s1376_s13 = smov (!%p161_p3, %s977_s13), 1  ;;  %vm335_vm0 = vcmask 261120   ;;  %vm913_vm7 = vcmask 97280  }
   0xc   : > { %v1105_v1 = vld [vmem:[%s1370_s1 + $0x8] sm:$0xff]  ;;  %v1115_v3 = vld [vmem:[%s1370_s1 + $0x38] sm:$0xff]  ;;  %513 = vmatpush.bf16.msra.mxu2 %v1113_v0  ;;  %v1104_v5 = vld [vmem:[%s1370_s1] sm:$0xff]  ;;  %354 = vmatpush.bf16.msra.mxu0 %v1107_v2  ;;  %s1116_s30 = smul.u32 72, %s1376_s13  ;;  %vm192_vm1 = vsmask.f32 3328 }
   0xd   : > { %427 = vmatpush.bf16.msra.mxu1 %v1105_v1  ;;  %718 = vmatpush.bf16.msra.mxu3 %v1115_v3  ;;  %v1106_v6 = vld [vmem:[%s1370_s1 + $0x10] sm:$0xff]  ;;  %vm193_vm2 = vsmask.f32 7440  ;;  %v1334_v39 = vld [vmem:[%s1371_s2] ss:$0 sm:$0xff]  ;;  %s1099_s9 = sshll.u32 %s1376_s13, 6 }
   0xe   : > { %v1114_v7 = vld [vmem:[%s1370_s1 + $0x30] sm:$0xff]  ;;  %s1224_s6 = scalar_lea.vmem %s1369_s0, %s1116_s30  ;;  %vm1245_vm3 = vmor %vm192_vm1, %vm193_vm2  ;;  %s1344_s14 = scalar_lea.vmem %s1372_s3, %s1099_s9 }
   0xf   : > { %v1035_v8 = vld [vmem:[%s1224_s6 + $0x8] sm:$0xf]  ;;  %v1108_v9 = vld [vmem:[%s1224_s6 + $0xc] sm:$0xf0]  ;;  %v999_v10 = vld [vmem:[%s1224_s6] sm:$0xf] }
  0x10   : > { %514 = vmatpush.bf16.msra.mxu2 %v1112_v4  ;;  %355 = vmatpush.bf16.msra.mxu0 %v1106_v6  ;;  %v1036_v11 = vor.u32 %v1108_v9, %v1035_v8  ;;  %v1100_v12 = vld [vmem:[%s1224_s6 + $0x4] sm:$0xf0]  ;;  %v172_v13 = vld [vmem:[%s1224_s6] sm:$0xf]  ;;  %v184_v16 = vld [vmem:[%s1224_s6 + $0x4] sm:$0x1] }
  0x11   : > { %428 = vmatpush.bf16.msra.mxu1 %v1104_v5  ;;  %719 = vmatpush.bf16.msra.mxu3 %v1114_v7  ;;  %v173_v14 = vld [vmem:[%s1224_s6 + $0x8] sm:$0xf]  ;;  %v1000_v15 = vor.u32 %v1100_v12, %v999_v10  ;;  %v185_v17 = vld [vmem:[%s1224_s6 + $0xc] sm:$0x1]  ;;  %v196_v18 = vshrl.u32 %v172_v13, 16  ;;  %v199_v19 = vshll.u32 %v172_v13, 16 }
  0x12   : > { %v205_v20 = vshll.u32 %v184_v16, 16  ;;  %v210_v21 = vshrl.u32 %v173_v14, 16  ;;  %v213_v22 = vshll.u32 %v173_v14, 16  ;;  %v219_v23 = vshll.u32 %v185_v17, 16  ;;  %v1061_v24 = vld [vmem:[%s1224_s6 + $0x8] sm:$0xf] }
  0x13   : > { %1057 = vmatmul.msk.bf16.vlgmr.msra.gmra.mxu2 %vm335_vm0, %v1036_v11  ;;  %v198_v25 = vrot.slane %v196_v18, 4  ;;  %v201_v26 = vrot.slane %v199_v19, 5  ;;  %v1062_v27 = vld [vmem:[%s1224_s6 + $0xc] sm:$0x1]  ;;  %v1063_v28 = vld [vmem:[%s1224_s6 + $0x10] sm:$0xf] }
  0x14   : > { %1021 = vmatmul.msk.bf16.vlgmr.msra.gmra.mxu1 %vm335_vm0, %v1000_v15  ;;  %v207_v29 = vrot.slane %v205_v20, 5  ;;  %v212_v30 = vrot.slane %v210_v21, 4  ;;  %v215_v31 = vrot.slane %v213_v22, 5  ;;  %v221_v32 = vrot.slane %v219_v23, 5  ;;  %v1064_v33 = vld [vmem:[%s1224_s6 + $0x14] sm:$0x1] }
  0x15   : > { %v202_v34 = vor.u32 %v201_v26, %v198_v25  ;;  %v561_v35 = vshrl.u32 %v1061_v24, 16  ;;  %v564_v36 = vshll.u32 %v1061_v24, 16  ;;  %v570_v37 = vshll.u32 %v1062_v27, 16  ;;  %v1241_v38 = vld [vmem:[%s1224_s6 + $0x18] sm:$0xf] }
  0x16   : > { %v216_v40 = vor.u32 %v215_v31, %v212_v30  ;;  %v575_v41 = vshrl.u32 %v1063_v28, 16  ;;  %v578_v42 = vshll.u32 %v1063_v28, 16  ;;  %v584_v43 = vshll.u32 %v1064_v33, 16  ;;  %v1109_v44 = vld [vmem:[%s1224_s6 + $0x1c] sm:$0xf0] }
  0x17   : > { %v203_v45 = vrot.slane %v202_v34, 4  ;;  %v563_v46 = vrot.slane %v561_v35, 4  ;;  %v566_v47 = vrot.slane %v564_v36, 5  ;;  %v572_v48 = vrot.slane %v570_v37, 5  ;;  %v1003_v49 = vld [vmem:[%s1224_s6 + $0x10] sm:$0xf] }
  0x18   : > { %v217_v50 = vrot.slane %v216_v40, 4  ;;  %v577_v51 = vrot.slane %v575_v41, 4  ;;  %v580_v52 = vrot.slane %v578_v42, 5  ;;  %v586_v53 = vrot.slane %v584_v43, 5  ;;  %v1101_v54 = vld [vmem:[%s1224_s6 + $0x14] sm:$0xf0] }
  0x19   : > { %v208_v55 = vsel %vm1245_vm3, %v203_v45, %v207_v29  ;;  %v567_v56 = vor.u32 %v566_v47, %v563_v46  ;;  %v1040_v57 = vor.u32 %v1109_v44, %v1241_v38  ;;  %v1004_v58 = vor.u32 %v1101_v54, %v1003_v49  ;;  %v174_v59 = vld [vmem:[%s1224_s6 + $0x10] sm:$0xf]  ;;  %v175_v60 = vld [vmem:[%s1224_s6 + $0x18] sm:$0xf]  ;;  %v186_v61 = vld [vmem:[%s1224_s6 + $0x14] sm:$0x1] }
  0x1a   : > { %v222_v62 = vsel %vm1245_vm3, %v217_v50, %v221_v32  ;;  %v311_v63 = vunpack.c.l.b16 %v208_v55  ;;  %v581_v0 = vor.u32 %v580_v52, %v577_v51  ;;  %v224_v1 = vshrl.u32 %v174_v59, 16  ;;  %v187_v4 = vld [vmem:[%s1224_s6 + $0x1c] sm:$0x1]  ;;  %v1065_v11 = vld [vmem:[%s1224_s6 + $0x18] sm:$0xf] }
  0x1b   : > { %v312_v2 = vunpack.c.l.b16 %v222_v62  ;;  %v568_v3 = vrot.slane %v567_v56, 4  ;;  %v227_v5 = vshll.u32 %v174_v59, 16  ;;  %v233_v6 = vshll.u32 %v186_v61, 16  ;;  %v1066_v16 = vld [vmem:[%s1224_s6 + $0x1c] sm:$0x1] }
  0x1c   : > { %v582_v7 = vrot.slane %v581_v0, 4  ;;  %v226_v8 = vrot.slane %v224_v1, 4  ;;  %v238_v9 = vshrl.u32 %v175_v60, 16  ;;  %v241_v10 = vshll.u32 %v175_v60, 16  ;;  %v1067_v17 = vld [vmem:[%s1224_s6 + $0x20] sm:$0xf] }
  0x1d   : > { %v319_v12 = vpack.c.b16 %v312_v2, %v311_v63  ;;  %v573_v13 = vsel %vm1245_vm3, %v568_v3, %v572_v48  ;;  %v229_v14 = vrot.slane %v227_v5, 5  ;;  %v235_v15 = vrot.slane %v233_v6, 5  ;;  %v1068_v27 = vld [vmem:[%s1224_s6 + $0x24] sm:$0x1]  ;;  %v176_v37 = vld [vmem:[%s1224_s6 + $0x20] sm:$0xf] }
  0x1e   : > { %v587_v18 = vsel %vm1245_vm3, %v582_v7, %v586_v53  ;;  %v676_v19 = vunpack.c.l.b16 %v573_v13  ;;  %v240_v20 = vrot.slane %v238_v9, 4  ;;  %v243_v21 = vrot.slane %v241_v10, 5  ;;  %v177_v43 = vld [vmem:[%s1224_s6 + $0x28] sm:$0xf]  ;;  %v1110_v51 = vld [vmem:[%s1224_s6 + $0x2c] sm:$0xf0] }
  0x1f   : > { %993 = vmatmul.msk.bf16.vlgmr.msra.gmra.mxu0 %vm335_vm0, %v319_v12  ;;  %v677_v22 = vunpack.c.l.b16 %v587_v18  ;;  %v230_v23 = vor.u32 %v229_v14, %v226_v8  ;;  %v247_v24 = vshll.u32 %v187_v4, 16  ;;  %v589_v25 = vshrl.u32 %v1065_v11, 16  ;;  %v1043_v47 = vld [vmem:[%s1224_s6 + $0x28] sm:$0xf]  ;;  %v188_v52 = vld [vmem:[%s1224_s6 + $0x24] sm:$0x1] }
  0x20   : > { %v244_v26 = vor.u32 %v243_v21, %v240_v20  ;;  %v592_v28 = vshll.u32 %v1065_v11, 16  ;;  %v598_v29 = vshll.u32 %v1066_v16, 16  ;;  %v603_v30 = vshrl.u32 %v1067_v17, 16  ;;  %v189_v55 = vld [vmem:[%s1224_s6 + $0x2c] sm:$0x1] }
  0x21   : > { %v684_v31 = vpack.c.b16 %v677_v22, %v676_v19  ;;  %v231_v32 = vrot.slane %v230_v23, 4  ;;  %v249_v33 = vrot.slane %v247_v24, 5  ;;  %v591_v34 = vrot.slane %v589_v25, 4  ;;  %v1069_v62 = vld [vmem:[%s1224_s6 + $0x28] sm:$0xf] }
  0x22   : > { %v245_v35 = vrot.slane %v244_v26, 4  ;;  %v594_v36 = vrot.slane %v592_v28, 5  ;;  %v605_v40 = vrot.slane %v603_v30, 4  ;;  %v606_v41 = vshll.u32 %v1067_v17, 16  ;;  %v1071_v3 = vld [vmem:[%s1224_s6 + $0x30] sm:$0xf] }
  0x23   : > { %1058 = vmatmul.msk.bf16.gmra.mxu2 %vm335_vm0, %v1040_v57  ;;  %1085 = vmatmul.msk.bf16.vlgmr.msra.gmra.mxu3 %vm335_vm0, %v684_v31  ;;  %v236_v38 = vsel %vm1245_vm3, %v231_v32, %v235_v15  ;;  %v612_v42 = vshll.u32 %v1068_v27, 16  ;;  %v600_v46 = vrot.slane %v598_v29, 5  ;;  %v252_v53 = vshrl.u32 %v176_v37, 16  ;;  %v1070_v10 = vld [vmem:[%s1224_s6 + $0x2c] sm:$0x1] }
  0x24   : > { %1022 = vmatmul.msk.bf16.gmra.mxu1 %vm335_vm0, %v1004_v58  ;;  %v250_v44 = vsel %vm1245_vm3, %v245_v35, %v249_v33  ;;  %v595_v45 = vor.u32 %v594_v36, %v591_v34  ;;  %v313_v48 = vunpack.c.l.b16 %v236_v38  ;;  %v608_v50 = vrot.slane %v606_v41, 5  ;;  %v1007_v15 = vld [vmem:[%s1224_s6 + $0x20] sm:$0xf]  ;;  %v1072_v17 = vld [vmem:[%s1224_s6 + $0x34] sm:$0x1] }
  0x25   : > { %v314_v49 = vunpack.c.l.b16 %v250_v44  ;;  %v255_v56 = vshll.u32 %v176_v37, 16  ;;  %v266_v57 = vshrl.u32 %v177_v43, 16  ;;  %v614_v59 = vrot.slane %v612_v42, 5  ;;  %v1102_v20 = vld [vmem:[%s1224_s6 + $0x24] sm:$0xf0] }
  0x26   : > { %v596_v54 = vrot.slane %v595_v45, 4  ;;  %v609_v58 = vor.u32 %v608_v50, %v605_v40  ;;  %v254_v60 = vrot.slane %v252_v53, 4  ;;  %v269_v61 = vshll.u32 %v177_v43, 16  ;;  %v178_v35 = vld [vmem:[%s1224_s6 + $0x30] sm:$0xf] }
  0x27   : > { %v257_v0 = vrot.slane %v255_v56, 5  ;;  %v261_v1 = vshll.u32 %v188_v52, 16  ;;  %v268_v2 = vrot.slane %v266_v57, 4  ;;  %v320_v4 = vpack.c.b16 %v314_v49, %v313_v48  ;;  %v179_v36 = vld [vmem:[%s1224_s6 + $0x38] sm:$0xf] }
  0x28   : > { %v601_v63 = vsel %vm1245_vm3, %v596_v54, %v600_v46  ;;  %v610_v5 = vrot.slane %v609_v58, 4  ;;  %v1044_v6 = vor.u32 %v1110_v51, %v1043_v47  ;;  %v271_v7 = vrot.slane %v269_v61, 5  ;;  %v1073_v49 = vld [vmem:[%s1224_s6 + $0x38] sm:$0xf]  ;;  %v1075_v50 = vld [vmem:[%s1224_s6 + $0x40] sm:$0xf] }
  0x29   : > { %v258_v8 = vor.u32 %v257_v0, %v254_v60  ;;  %v275_v9 = vshll.u32 %v189_v55, 16  ;;  %v617_v11 = vshrl.u32 %v1069_v62, 16  ;;  %v620_v12 = vshll.u32 %v1069_v62, 16  ;;  %v190_v56 = vld [vmem:[%s1224_s6 + $0x34] sm:$0x1] }
  0x2a   : > { %v615_v13 = vsel %vm1245_vm3, %v610_v5, %v614_v59  ;;  %v678_v14 = vunpack.c.l.b16 %v601_v63  ;;  %v272_v16 = vor.u32 %v271_v7, %v268_v2  ;;  %v631_v18 = vshrl.u32 %v1071_v3, 16  ;;  %v191_v60 = vld [vmem:[%s1224_s6 + $0x3c] sm:$0x1]  ;;  %v1011_v7 = vld [vmem:[%s1224_s6 + $0x30] sm:$0xf] }
  0x2b   : > { %v679_v19 = vunpack.c.l.b16 %v615_v13  ;;  %v263_v21 = vrot.slane %v261_v1, 5  ;;  %v619_v22 = vrot.slane %v617_v11, 4  ;;  %v622_v23 = vrot.slane %v620_v12, 5  ;;  %v1074_v12 = vld [vmem:[%s1224_s6 + $0x3c] sm:$0x1] }
  0x2c   : > { %v259_v24 = vrot.slane %v258_v8, 4  ;;  %v626_v25 = vshll.u32 %v1070_v10, 16  ;;  %v633_v26 = vrot.slane %v631_v18, 4  ;;  %v634_v27 = vshll.u32 %v1071_v3, 16  ;;  %v1047_v3 = vld [vmem:[%s1224_s6 + $0x38] sm:$0xf] }
  0x2d   : > { %v273_v28 = vrot.slane %v272_v16, 4  ;;  %v277_v29 = vrot.slane %v275_v9, 5  ;;  %v623_v30 = vor.u32 %v622_v23, %v619_v22  ;;  %v640_v31 = vshll.u32 %v1072_v17, 16  ;;  %v1103_v8 = vld [vmem:[%s1224_s6 + $0x34] sm:$0xf0] }
  0x2e   : > { %v685_v32 = vpack.c.b16 %v679_v19, %v678_v14  ;;  %v1008_v33 = vor.u32 %v1102_v20, %v1007_v15  ;;  %v636_v34 = vrot.slane %v634_v27, 5  ;;  %v264_v37 = vsel %vm1245_vm3, %v259_v24, %v263_v21  ;;  %v1076_v17 = vld [vmem:[%s1224_s6 + $0x44] sm:$0x1] }
  0x2f   : > { %994 = vmatmul.msk.bf16.gmra.mxu0 %vm335_vm0, %v320_v4  ;;  %v628_v38 = vrot.slane %v626_v25, 5  ;;  %v278_v41 = vsel %vm1245_vm3, %v273_v28, %v277_v29  ;;  %v624_v42 = vrot.slane %v623_v30, 4  ;;  %v642_v43 = vrot.slane %v640_v31, 5  ;;  %v1111_v4 = vld [vmem:[%s1224_s6 + $0x3c] sm:$0xf0] }
  0x30   : > { %v637_v40 = vor.u32 %v636_v34, %v633_v26  ;;  %v280_v44 = vshrl.u32 %v178_v35, 16  ;;  %v283_v46 = vshll.u32 %v178_v35, 16  ;;  %v294_v47 = vshrl.u32 %v179_v36, 16 }
  0x31   : > { %v297_v48 = vshll.u32 %v179_v36, 16  ;;  %v315_v51 = vunpack.c.l.b16 %v264_v37  ;;  %v316_v52 = vunpack.c.l.b16 %v278_v41  ;;  %v629_v53 = vsel %vm1245_vm3, %v624_v42, %v628_v38 }
  0x32   : > { %v638_v45 = vrot.slane %v637_v40, 4  ;;  %v282_v54 = vrot.slane %v280_v44, 4  ;;  %v285_v57 = vrot.slane %v283_v46, 5  ;;  %v296_v58 = vrot.slane %v294_v47, 4 }
  0x33   : > { %1059 = vmatmul.msk.bf16.gmra.mxu2 %vm335_vm0, %v1044_v6  ;;  %1086 = vmatmul.msk.bf16.gmra.mxu3 %vm335_vm0, %v685_v32  ;;  %v299_v59 = vrot.slane %v297_v48, 5  ;;  %v645_v61 = vshrl.u32 %v1073_v49, 16  ;;  %v648_v62 = vshll.u32 %v1073_v49, 16  ;;  %v659_v63 = vshrl.u32 %v1075_v50, 16 }
  0x34   : > { %1023 = vmatmul.msk.bf16.gmra.mxu1 %vm335_vm0, %v1008_v33  ;;  %v643_v55 = vsel %vm1245_vm3, %v638_v45, %v642_v43  ;;  %v662_v0 = vshll.u32 %v1075_v50, 16  ;;  %v321_v1 = vpack.c.b16 %v316_v52, %v315_v51  ;;  %v680_v2 = vunpack.c.l.b16 %v629_v53 }
  0x35   : > { %v289_v5 = vshll.u32 %v190_v56, 16  ;;  %v681_v6 = vunpack.c.l.b16 %v643_v55  ;;  %v286_v9 = vor.u32 %v285_v57, %v282_v54  ;;  %v300_v10 = vor.u32 %v299_v59, %v296_v58 }
  0x36   : > { %v303_v11 = vshll.u32 %v191_v60, 16  ;;  %v647_v13 = vrot.slane %v645_v61, 4  ;;  %v650_v14 = vrot.slane %v648_v62, 5  ;;  %v661_v15 = vrot.slane %v659_v63, 4 }
  0x37   : > { %v664_v16 = vrot.slane %v662_v0, 5  ;;  %v1048_v18 = vor.u32 %v1111_v4, %v1047_v3  ;;  %v1012_v19 = vor.u32 %v1103_v8, %v1011_v7  ;;  %v291_v20 = vrot.slane %v289_v5, 5 }
  0x38   : > { %v686_v21 = vpack.c.b16 %v681_v6, %v680_v2  ;;  %v287_v22 = vrot.slane %v286_v9, 4  ;;  %v305_v23 = vrot.slane %v303_v11, 5  ;;  %v654_v24 = vshll.u32 %v1074_v12, 16 }
  0x39   : > { %v301_v25 = vrot.slane %v300_v10, 4  ;;  %v651_v26 = vor.u32 %v650_v14, %v647_v13  ;;  %v665_v27 = vor.u32 %v664_v16, %v661_v15  ;;  %v668_v28 = vshll.u32 %v1076_v17, 16 }
  0x3a   : > { %v292_v29 = vsel %vm1245_vm3, %v287_v22, %v291_v20  ;;  %v656_v30 = vrot.slane %v654_v24, 5 }
  0x3b   : > { %v306_v31 = vsel %vm1245_vm3, %v301_v25, %v305_v23  ;;  %v652_v32 = vrot.slane %v651_v26, 4  ;;  %v666_v33 = vrot.slane %v665_v27, 4  ;;  %v670_v34 = vrot.slane %v668_v28, 5 }
  0x3c   : > { %v317_v35 = vunpack.c.l.b16 %v292_v29  ;;  %v318_v36 = vunpack.c.l.b16 %v306_v31 }
  0x3d   : > { %v657_v37 = vsel %vm1245_vm3, %v652_v32, %v656_v30  ;;  %v671_v38 = vsel %vm1245_vm3, %v666_v33, %v670_v34 }
  0x3e   : > { %v322_v40 = vpack.c.b16 %v318_v36, %v317_v35  ;;  %v682_v41 = vunpack.c.l.b16 %v657_v37  ;;  %v683_v42 = vunpack.c.l.b16 %v671_v38 }
  0x3f   : > { %995 = vmatmul.msk.bf16.gmra.mxu0 %vm335_vm0, %v321_v1 }
  0x40   : > { %v687_v43 = vpack.c.b16 %v683_v42, %v682_v41 }
  0x43   : > { %1060 = vmatmul.msk.bf16.gmra.mxu2 %vm335_vm0, %v1048_v18  ;;  %1087 = vmatmul.msk.bf16.gmra.mxu3 %vm335_vm0, %v686_v21 }
  0x44   : > { %1024 = vmatmul.msk.bf16.gmra.mxu1 %vm335_vm0, %v1012_v19 }
  0x4f   : > { %996 = vmatmul.msk.bf16.gmra.mxu0 %vm335_vm0, %v322_v40 }
  0x53   : > { %1088 = vmatmul.msk.bf16.gmra.mxu3 %vm335_vm0, %v687_v43 }
  0x91   : > { %v430_v44 = vpop.f32.mrf.mxu1 }
  0x96   : > { %v516_v45 = vpop.f32.mrf.mxu2 }
  0x99   : > { %v432_v47 = vpop.f32.mrf.mxu1 }
  0x9c   : > { %v357_v46 = vpop.f32.mrf.mxu0 }
  0x9d   : > { %v431_v48 = vadd.f32 %v430_v44, %v357_v46 }
  0x9e   : > { %v518_v49 = vpop.f32.mrf.mxu2 }
  0x9f   : > { %v536_v50 = vadd.f32 %v516_v45, %v431_v48 }
  0xa1   : > { %v435_v53 = vpop.f32.mrf.mxu1 }
  0xa4   : > { %v359_v51 = vpop.f32.mrf.mxu0 }
  0xa5   : > { %v433_v56 = vadd.f32 %v432_v47, %v359_v51 }
  0xa6   : > { %v721_v52 = vpop.f32.mrf.mxu3  ;;  %v521_v57 = vpop.f32.mrf.mxu2 }
  0xa7   : > { %v741_v54 = vadd.f32 %v721_v52, %v536_v50  ;;  %v537_v60 = vadd.f32 %v518_v49, %v433_v56 }
  0xa9   : > { %v753_v55 = vadd.f32 %v1334_v39, %v741_v54  ;;  %v437_v0 = vpop.f32.mrf.mxu1 }
  0xab   : > { %v1089_v58 = vmul.f32 -1.442695, %v753_v55 }
  0xac   : > { %v362_v59 = vpop.f32.mrf.mxu0 }
  0xad   : > { %1126 = vpow2.f32 %v1089_v58  ;;  %v436_v63 = vadd.f32 %v435_v53, %v362_v59 }
  0xae   : > { %v723_v61 = vpop.f32.mrf.mxu3  ;;  %v523_v6 = vpop.f32.mrf.mxu2 }
  0xaf   : > { %v742_v62 = vadd.f32 %v723_v61, %v537_v60  ;;  %v538_v4 = vadd.f32 %v521_v57, %v436_v63 }
  0xb1   : > { %v754_v1 = vadd.f32 %v1334_v39, %v742_v62  ;;  %v440_v12 = vpop.f32.mrf.mxu1 }
  0xb3   : > { %v1127_v2 = vpop.eup %1126  ;;  %v1090_v3 = vmul.f32 -1.442695, %v754_v1 }
  0xb4   : > { %v785_v5 = vadd.f32 1.0, %v1127_v2  ;;  %v364_v7 = vpop.f32.mrf.mxu0 }
  0xb5   : > { %1128 = vpow2.f32 %v1090_v3  ;;  %v438_v11 = vadd.f32 %v437_v0, %v364_v7 }
  0xb6   : > { %1130 = vrcp.f32 %v785_v5  ;;  %v726_v8 = vpop.f32.mrf.mxu3  ;;  %v526_v20 = vpop.f32.mrf.mxu2  ;;  %v804_v25 = vand.u32 2147483648, %v785_v5  ;;  %v802_v27 = vand.u32 2147483647, %v785_v5  ;;  %vm798_vm5 = vweird.f32 %v785_v5 }
  0xb7   : > { %v743_v9 = vadd.f32 %v726_v8, %v538_v4  ;;  %v539_v19 = vadd.f32 %v523_v6, %v438_v11 }
  0xb8   : > { %v805_v34 = vor.u32 1.1754944e-38, %v804_v25  ;;  %vm803_vm8 = vcmp.eq.f32.partialorder %v802_v27, 8.507059e+37 }
  0xb9   : > { %v755_v10 = vadd.f32 %v1334_v39, %v743_v9  ;;  %v442_v36 = vpop.f32.mrf.mxu1 }
  0xbb   : > { %v1129_v13 = vpop.eup %1128  ;;  %v1091_v14 = vmul.f32 -1.442695, %v755_v10 }
  0xbc   : > { %v1131_v15 = vpop.eup %1130  ;;  %v786_v16 = vadd.f32 1.0, %v1129_v13  ;;  %v367_v17 = vpop.f32.mrf.mxu0 }
  0xbd   : > { %v794_v18 = vmul.f32 %v1131_v15, %v785_v5  ;;  %1132 = vpow2.f32 %v1091_v14  ;;  %v441_v24 = vadd.f32 %v440_v12, %v367_v17  ;;  %vm799_vm4 = vweird.f32 %v1131_v15 }
  0xbe   : > { %1134 = vrcp.f32 %v786_v16  ;;  %v728_v21 = vpop.f32.mrf.mxu3  ;;  %vm800_vm6 = vmor %vm798_vm5, %vm799_vm4  ;;  %v817_v45 = vand.u32 2147483647, %v786_v16  ;;  %v819_v46 = vand.u32 2147483648, %v786_v16  ;;  %v528_v47 = vpop.f32.mrf.mxu2  ;;  %vm813_vm10 = vweird.f32 %v786_v16 }
  0xbf   : > { %v795_v22 = vsub.f32 1.0, %v794_v18  ;;  %v744_v23 = vadd.f32 %v728_v21, %v539_v19  ;;  %v540_v32 = vadd.f32 %v526_v20, %v441_v24 }
  0xc0   : > { %vm818_vm12 = vcmp.eq.f32.partialorder %v817_v45, 8.507059e+37  ;;  %v820_v55 = vor.u32 1.1754944e-38, %v819_v46 }
  0xc1   : > { %v796_v26 = vmul.f32 %v1131_v15, %v795_v22  ;;  %v756_v28 = vadd.f32 %v1334_v39, %v744_v23  ;;  %v445_v62 = vpop.f32.mrf.mxu1 }
  0xc3   : > { %v1133_v29 = vpop.eup %1132  ;;  %v797_v30 = vadd.f32 %v1131_v15, %v796_v26  ;;  %v1092_v31 = vmul.f32 -1.442695, %v756_v28 }
  0xc4   : > { %v1135_v33 = vpop.eup %1134  ;;  %v787_v35 = vadd.f32 1.0, %v1133_v29  ;;  %v369_v37 = vpop.f32.mrf.mxu0 }
  0xc5   : > { %v801_v38 = vsel %vm800_vm6, %v1131_v15, %v797_v30  ;;  %v809_v40 = vmul.f32 %v1135_v33, %v786_v16  ;;  %1136 = vpow2.f32 %v1092_v31  ;;  %vm814_vm9 = vweird.f32 %v1135_v33 }
  0xc6   : > { %v806_v41 = vsel %vm803_vm8, %v805_v34, %v801_v38  ;;  %1138 = vrcp.f32 %v787_v35  ;;  %v731_v42 = vpop.f32.mrf.mxu3  ;;  %v443_v50 = vadd.f32 %v442_v36, %v369_v37  ;;  %vm815_vm11 = vmor %vm813_vm10, %vm814_vm9  ;;  %v834_v3 = vand.u32 2147483648, %v787_v35  ;;  %v531_v7 = vpop.f32.mrf.mxu2 }
  0xc7   : > { %914 = vst.msk [vmem:[%s1344_s14] sm:$0xff] %vm913_vm7, %v806_v41  ;;  %v810_v43 = vsub.f32 1.0, %v809_v40  ;;  %v745_v44 = vadd.f32 %v731_v42, %v540_v32  ;;  %v832_v5 = vand.u32 2147483647, %v787_v35  ;;  %vm828_vm14 = vweird.f32 %v787_v35 }
  0xc8   : > { %v541_v60 = vadd.f32 %v528_v47, %v443_v50  ;;  %v835_v13 = vor.u32 1.1754944e-38, %v834_v3 }
  0xc9   : > { %v811_v48 = vmul.f32 %v1135_v33, %v810_v43  ;;  %v757_v49 = vadd.f32 %v1334_v39, %v745_v44  ;;  %vm833_vm0 = vcmp.eq.f32.partialorder %v832_v5, 8.507059e+37  ;;  %v447_v24 = vpop.f32.mrf.mxu1 }
  0xcb   : > { %v1137_v51 = vpop.eup %1136  ;;  %v812_v52 = vadd.f32 %v1135_v33, %v811_v48  ;;  %v1093_v53 = vmul.f32 -1.442695, %v757_v49 }
  0xcc   : > { %v1139_v54 = vpop.eup %1138  ;;  %v788_v56 = vadd.f32 1.0, %v1137_v51  ;;  %v372_v57 = vpop.f32.mrf.mxu0 }
  0xcd   : > { %v816_v58 = vsel %vm815_vm11, %v1135_v33, %v812_v52  ;;  %v824_v59 = vmul.f32 %v1139_v54, %v787_v35  ;;  %1140 = vpow2.f32 %v1093_v53  ;;  %v446_v2 = vadd.f32 %v445_v62, %v372_v57 }
  0xce   : > { %v821_v61 = vsel %vm818_vm12, %v820_v55, %v816_v58  ;;  %1142 = vrcp.f32 %v788_v56  ;;  %v733_v63 = vpop.f32.mrf.mxu3  ;;  %vm829_vm13 = vweird.f32 %v1139_v54  ;;  %v847_v22 = vand.u32 2147483647, %v788_v56  ;;  %v533_v34 = vpop.f32.mrf.mxu2 }
  0xcf   : > { %915 = vst.msk [vmem:[%s1344_s14 + $0x8] sm:$0xff] %vm913_vm7, %v821_v61  ;;  %v825_v0 = vsub.f32 1.0, %v824_v59  ;;  %v746_v1 = vadd.f32 %v733_v63, %v541_v60  ;;  %v542_v11 = vadd.f32 %v531_v7, %v446_v2  ;;  %vm830_vm15 = vmor %vm828_vm14, %vm829_vm13  ;;  %v849_v23 = vand.u32 2147483648, %v788_v56 }
  0xd0   : > { %vm843_vm2 = vweird.f32 %v788_v56  ;;  %vm848_vm4 = vcmp.eq.f32.partialorder %v847_v22, 8.507059e+37 }
  0xd1   : > { %v826_v4 = vmul.f32 %v1139_v54, %v825_v0  ;;  %v758_v6 = vadd.f32 %v1334_v39, %v746_v1  ;;  %v850_v32 = vor.u32 1.1754944e-38, %v849_v23 }
  0xd3   : > { %v1141_v8 = vpop.eup %1140  ;;  %v827_v9 = vadd.f32 %v1139_v54, %v826_v4  ;;  %v1094_v10 = vmul.f32 -1.442695, %v758_v6 }
  0xd4   : > { %v1143_v12 = vpop.eup %1142  ;;  %v789_v14 = vadd.f32 1.0, %v1141_v8  ;;  %v374_v19 = vpop.f32.mrf.mxu0 }
  0xd5   : > { %v831_v15 = vsel %vm830_vm15, %v1139_v54, %v827_v9  ;;  %v839_v16 = vmul.f32 %v1143_v12, %v788_v56  ;;  %1144 = vpow2.f32 %v1094_v10  ;;  %vm844_vm1 = vweird.f32 %v1143_v12 }
  0xd6   : > { %v836_v17 = vsel %vm833_vm0, %v835_v13, %v831_v15  ;;  %1146 = vrcp.f32 %v789_v14  ;;  %v736_v18 = vpop.f32.mrf.mxu3  ;;  %v448_v27 = vadd.f32 %v447_v24, %v374_v19  ;;  %vm845_vm3 = vmor %vm843_vm2, %vm844_vm1  ;;  %v864_v43 = vand.u32 2147483648, %v789_v14 }
  0xd7   : > { %916 = vst.msk [vmem:[%s1344_s14 + $0x10] sm:$0xff] %vm913_vm7, %v836_v17  ;;  %v840_v20 = vsub.f32 1.0, %v839_v16  ;;  %v747_v21 = vadd.f32 %v736_v18, %v542_v11  ;;  %v862_v45 = vand.u32 2147483647, %v789_v14  ;;  %vm858_vm6 = vweird.f32 %v789_v14 }
  0xd8   : > { %v543_v37 = vadd.f32 %v533_v34, %v448_v27  ;;  %v865_v51 = vor.u32 1.1754944e-38, %v864_v43 }
  0xd9   : > { %v841_v25 = vmul.f32 %v1143_v12, %v840_v20  ;;  %v759_v26 = vadd.f32 %v1334_v39, %v747_v21  ;;  %vm863_vm9 = vcmp.eq.f32.partialorder %v862_v45, 8.507059e+37 }
  0xdb   : > { %v1145_v28 = vpop.eup %1144  ;;  %v842_v29 = vadd.f32 %v1143_v12, %v841_v25  ;;  %v1095_v30 = vmul.f32 -1.442695, %v759_v26 }
  0xdc   : > { %v1147_v31 = vpop.eup %1146  ;;  %v790_v33 = vadd.f32 1.0, %v1145_v28 }
  0xdd   : > { %v846_v35 = vsel %vm845_vm3, %v1143_v12, %v842_v29  ;;  %v854_v36 = vmul.f32 %v1147_v31, %v789_v14  ;;  %1148 = vpow2.f32 %v1095_v30  ;;  %vm859_vm5 = vweird.f32 %v1147_v31 }
  0xde   : > { %v851_v38 = vsel %vm848_vm4, %v850_v32, %v846_v35  ;;  %1150 = vrcp.f32 %v790_v33  ;;  %v738_v40 = vpop.f32.mrf.mxu3  ;;  %vm860_vm8 = vmor %vm858_vm6, %vm859_vm5  ;;  %v879_v57 = vand.u32 2147483648, %v790_v33  ;;  %v877_v58 = vand.u32 2147483647, %v790_v33 }
  0xdf   : > { %917 = vst.msk [vmem:[%s1344_s14 + $0x18] sm:$0xff] %vm913_vm7, %v851_v38  ;;  %v855_v41 = vsub.f32 1.0, %v854_v36  ;;  %v748_v42 = vadd.f32 %v738_v40, %v543_v37  ;;  %vm873_vm11 = vweird.f32 %v790_v33 }
  0xe0   : > { %v880_v62 = vor.u32 1.1754944e-38, %v879_v57  ;;  %vm878_vm13 = vcmp.eq.f32.partialorder %v877_v58, 8.507059e+37 }
  0xe1   : > { %v856_v44 = vmul.f32 %v1147_v31, %v855_v41  ;;  %v760_v46 = vadd.f32 %v1334_v39, %v748_v42 }
  0xe3   : > { %v1149_v47 = vpop.eup %1148  ;;  %v857_v48 = vadd.f32 %v1147_v31, %v856_v44  ;;  %v1096_v49 = vmul.f32 -1.442695, %v760_v46 }
  0xe4   : > { %v1151_v50 = vpop.eup %1150  ;;  %v791_v52 = vadd.f32 1.0, %v1149_v47 }
  0xe5   : > { %v861_v53 = vsel %vm860_vm8, %v1147_v31, %v857_v48  ;;  %v869_v54 = vmul.f32 %v1151_v50, %v790_v33  ;;  %1152 = vpow2.f32 %v1096_v49  ;;  %vm874_vm10 = vweird.f32 %v1151_v50 }
  0xe6   : > { %v866_v55 = vsel %vm863_vm9, %v865_v51, %v861_v53  ;;  %1154 = vrcp.f32 %v791_v52  ;;  %vm875_vm12 = vmor %vm873_vm11, %vm874_vm10  ;;  %v894_v4 = vand.u32 2147483648, %v791_v52  ;;  %v892_v6 = vand.u32 2147483647, %v791_v52 }
  0xe7   : > { %918 = vst.msk [vmem:[%s1344_s14 + $0x20] sm:$0xff] %vm913_vm7, %v866_v55  ;;  %v870_v56 = vsub.f32 1.0, %v869_v54  ;;  %vm888_vm15 = vweird.f32 %v791_v52 }
  0xe8   : > { %v895_v9 = vor.u32 1.1754944e-38, %v894_v4  ;;  %vm893_vm1 = vcmp.eq.f32.partialorder %v892_v6, 8.507059e+37 }
  0xe9   : > { %v871_v39 = vmul.f32 %v1151_v50, %v870_v56 }
  0xeb   : > { %v1153_v59 = vpop.eup %1152  ;;  %v872_v60 = vadd.f32 %v1151_v50, %v871_v39 }
  0xec   : > { %v1155_v61 = vpop.eup %1154  ;;  %v792_v63 = vadd.f32 1.0, %v1153_v59 }
  0xed   : > { %v876_v0 = vsel %vm875_vm12, %v1151_v50, %v872_v60  ;;  %v884_v1 = vmul.f32 %v1155_v61, %v791_v52  ;;  %vm889_vm14 = vweird.f32 %v1155_v61 }
  0xee   : > { %v881_v2 = vsel %vm878_vm13, %v880_v62, %v876_v0  ;;  %1156 = vrcp.f32 %v792_v63  ;;  %vm890_vm0 = vmor %vm888_vm15, %vm889_vm14  ;;  %v909_v14 = vand.u32 2147483648, %v792_v63  ;;  %v907_v16 = vand.u32 2147483647, %v792_v63 }
  0xef   : > { %919 = vst.msk [vmem:[%s1344_s14 + $0x28] sm:$0xff] %vm913_vm7, %v881_v2  ;;  %v885_v3 = vsub.f32 1.0, %v884_v1  ;;  %vm903_vm3 = vweird.f32 %v792_v63 }
  0xf0   : > { %v910_v18 = vor.u32 1.1754944e-38, %v909_v14  ;;  %vm908_vm5 = vcmp.eq.f32.partialorder %v907_v16, 8.507059e+37 }
  0xf1   : > { %v886_v5 = vmul.f32 %v1155_v61, %v885_v3 }
  0xf3   : > { %v887_v7 = vadd.f32 %v1155_v61, %v886_v5 }
  0xf4   : > { %v1157_v8 = vpop.eup %1156 }
  0xf5   : > { %v891_v10 = vsel %vm890_vm0, %v1155_v61, %v887_v7  ;;  %v899_v11 = vmul.f32 %v1157_v8, %v792_v63  ;;  %vm904_vm2 = vweird.f32 %v1157_v8 }
  0xf6   : > { %v896_v12 = vsel %vm893_vm1, %v895_v9, %v891_v10  ;;  %vm905_vm4 = vmor %vm903_vm3, %vm904_vm2 }
  0xf7   : > { %920 = vst.msk [vmem:[%s1344_s14 + $0x30] sm:$0xff] %vm913_vm7, %v896_v12  ;;  %v900_v13 = vsub.f32 1.0, %v899_v11 }
  0xf9   : > { %v901_v15 = vmul.f32 %v1157_v8, %v900_v13 }
  0xfb   : > { %v902_v17 = vadd.f32 %v1157_v8, %v901_v15 }
  0xfd   : > { %v906_v19 = vsel %vm905_vm4, %v1157_v8, %v902_v17 }
  0xfe   : > { %v911_v20 = vsel %vm908_vm5, %v910_v18, %v906_v19 }
  0xff   : > { %921 = vst.msk [vmem:[%s1344_s14 + $0x38] sm:$0xff] %vm913_vm7, %v911_v20 }
 0x100 PF: > { %s13_s12 = sadd.s32 1, %s1164_s12  }
 0x101   : > { %p10_p4 = scmp.ge.s32.totalorder %s13_s12, 4  }
 0x103   :  { %12 = sbr.rel (!%p10_p4) target bundleno = 1 (0x1), region = 63 }

</bundles_post_ra>
